<compile_context>
chip_gen: v6e
topology: v6e:2x2x1
jax: 0.10.0
libtpu: 0.0.40
codegen_flags: <defaults>
</compile_context>

<pallas_src>
import numpy as np

import jax
import jax.numpy as jnp
from jax import lax
from jax.experimental import pallas as pl
from jax.experimental.pallas import tpu as pltpu

# ---- small, module-consistent config (CoTConfig: hidden, heads, layers) ----
BATCH = 2
SEQ = 16
HIDDEN = 64
HEADS = 4
HEAD_DIM = HIDDEN // HEADS
LAYERS = 3
FFN = 4 * HIDDEN
EPS = 1e-5  # nn.LayerNorm default


# ---------------- shared math (pure jnp: used inside the kernel AND as reference) ----
def _layernorm(x, w, b):
    mu = jnp.mean(x, axis=-1, keepdims=True)
    var = jnp.mean(jnp.square(x - mu), axis=-1, keepdims=True)
    return (x - mu) * lax.rsqrt(var + EPS) * w + b


def _block_forward(x, cosf, sinf, rot, amask, hmask,
                   ln1w, ln1b, wq, wk, wv, bq, bk, bv, wo, bo,
                   ln2w, ln2b, w1, b1, w2, b2):
    """One pre-LN decoder block on a 2-D (S, D) activation slab.

    x f32; wq/wk/wv/wo/w1/w2 bf16; biases & LN params f32; cosf/sinf (S, D) f32;
    rot (D, D) f32 signed permutation (rotate-half); amask (S, S) additive causal mask;
    hmask (HEADS, 1, D) bf16 0/1 per-head lane masks.
    """
    bf16 = jnp.bfloat16
    n = x.shape[0]

    # --- attention sub-block (pre-LN), full-width / lane-dense ---
    h = _layernorm(x, ln1w, ln1b)
    hb = h.astype(bf16)
    q = jnp.dot(hb, wq, preferred_element_type=jnp.float32) + bq          # (S, D) f32
    k = jnp.dot(hb, wk, preferred_element_type=jnp.float32) + bk
    v = jnp.dot(hb, wv, preferred_element_type=jnp.float32) + bv

    # RoPE (rotate-half per head) as one signed-permutation matmul: no lane slicing.
    q = q * cosf + jnp.dot(q, rot, preferred_element_type=jnp.float32) * sinf
    k = k * cosf + jnp.dot(k, rot, preferred_element_type=jnp.float32) * sinf

    qb = (q * (1.0 / HEAD_DIM ** 0.5)).astype(bf16)   # scale = 1/4: exact in bf16
    kb = k.astype(bf16)
    vb = v.astype(bf16)

    ctx = jnp.zeros((n, HIDDEN), jnp.float32)
    for hd in range(HEADS):  # static unroll; head isolation via 0/1 lane masks (VPU only)
        hm = hmask[hd]                                                    # (1, D) bf16
        s = jnp.einsum('nd,md->nm', qb * hm, kb,
                       preferred_element_type=jnp.float32) + amask        # (S, S) f32
        s = s - jnp.max(s, axis=-1, keepdims=True)
        p = jnp.exp(s)
        p = p / jnp.sum(p, axis=-1, keepdims=True)
        ctx = ctx + jnp.einsum('nm,md->nd', p.astype(bf16), vb * hm,
                               preferred_element_type=jnp.float32)        # fills head lanes

    attn = jnp.dot(ctx.astype(bf16), wo, preferred_element_type=jnp.float32) + bo
    x = x + attn

    # --- MLP sub-block (pre-LN) ---
    h2 = _layernorm(x, ln2w, ln2b)
    ff = jnp.dot(h2.astype(bf16), w1, preferred_element_type=jnp.float32) + b1
    ff = jax.nn.gelu(ff, approximate=True)
    ff = jnp.dot(ff.astype(bf16), w2, preferred_element_type=jnp.float32) + b2
    return x + ff


# ---------------- Pallas kernel: one program per batch element, layers unrolled ------
def decoder_kernel(x_ref, cos_ref, sin_ref, rot_ref, mask_ref, hmask_ref,
                   ln1w_ref, ln1b_ref, wq_ref, wk_ref, wv_ref,
                   bq_ref, bk_ref, bv_ref, wo_ref, bo_ref,
                   ln2w_ref, ln2b_ref, w1_ref, b1_ref, w2_ref, b2_ref,
                   lnfw_ref, lnfb_ref, out_ref):
    x = x_ref[...]                      # (S, D) f32 activation slab for this batch elem
    cosf = cos_ref[...]
    sinf = sin_ref[...]
    rot = rot_ref[...]
    amask = mask_ref[...]
    hmask = hmask_ref[...]

    for l in range(LAYERS):             # static unroll: all layer weights VMEM-resident
        x = _block_forward(
            x, cosf, sinf, rot, amask, hmask,
            ln1w_ref[l], ln1b_ref[l],
            wq_ref[l], wk_ref[l], wv_ref[l],
            bq_ref[l], bk_ref[l], bv_ref[l],
            wo_ref[l], bo_ref[l],
            ln2w_ref[l], ln2b_ref[l],
            w1_ref[l], b1_ref[l], w2_ref[l], b2_ref[l])

    out_ref[...] = _layernorm(x, lnfw_ref[...], lnfb_ref[...]).astype(out_ref.dtype)


def _full_spec(a):
    nd = a.ndim
    return pl.BlockSpec(a.shape, lambda b, _nd=nd: (0,) * _nd)


def cot_decoder(x, p):
    B, S, D = BATCH, SEQ, HIDDEN
    w = prepare_weights(p)
    cosf, sinf, rot, amask, hmask = make_tables()
    x2 = x.reshape(B * S, D).astype(jnp.float32)          # wrapper-side layout plumbing

    args = (x2, cosf, sinf, rot, amask, hmask,
            w['ln1_w'], w['ln1_b'], w['wq'], w['wk'], w['wv'],
            w['bq'], w['bk'], w['bv'], w['wo'], w['bo'],
            w['ln2_w'], w['ln2_b'], w['w1'], w['b1'], w['w2'], w['b2'],
            w['lnf_w'], w['lnf_b'])

    in_specs = [pl.BlockSpec((S, D), lambda b: (b, 0))]    # per-batch row block of x
    in_specs += [_full_spec(a) for a in args[1:]]          # everything else fully resident

    out = pl.pallas_call(
        decoder_kernel,
        out_shape=jax.ShapeDtypeStruct((B * S, D), jnp.float32),
        grid_spec=pltpu.PrefetchScalarGridSpec(
            num_scalar_prefetch=0,
            grid=(B,),
            in_specs=in_specs,
            out_specs=pl.BlockSpec((S, D), lambda b: (b, 0)),
        ),
        compiler_params=pltpu.CompilerParams(
            dimension_semantics=("parallel",)),            # 2 batch programs -> 2 TCs on v7x
    )(*args)
    return out.reshape(B, S, D)


# ---------------- pure-JAX reference (same math, no Pallas) --------------------------
def decoder_reference(x, p):
    w = prepare_weights(p)
    cosf, sinf, rot, amask, hmask = make_tables()
    outs = []
    for b in range(BATCH):
        xb = x[b].astype(jnp.float32)
        for l in range(LAYERS):
            xb = _block_forward(xb, cosf, sinf, rot, amask, hmask,
                                w['ln1_w'][l], w['ln1_b'][l],
                                w['wq'][l], w['wk'][l], w['wv'][l],
                                w['bq'][l], w['bk'][l], w['bv'][l],
                                w['wo'][l], w['bo'][l],
                                w['ln2_w'][l], w['ln2_b'][l],
                                w['w1'][l], w['b1'][l], w['w2'][l], w['b2'][l])
        outs.append(_layernorm(xb, w['lnf_w'], w['lnf_b']))
    return jnp.stack(outs, axis=0)


# ---------------- deterministic parameter / table construction -----------------------
def make_params(key):
    k = jax.random.split(key, 8)
    scale = 0.1
    D, F, L = HIDDEN, FFN, LAYERS
    return {
        'ln1_w': jnp.ones((L, 1, D), jnp.float32),
        'ln1_b': jnp.zeros((L, 1, D), jnp.float32),
        'wqkv': scale * jax.random.normal(k[0], (L, D, 3 * D), jnp.float32),
        'bqkv': scale * jax.random.normal(k[1], (L, 1, 3 * D), jnp.float32),
        'wo': scale * jax.random.normal(k[2], (L, D, D), jnp.float32),
        'bo': scale * jax.random.normal(k[3], (L, 1, D), jnp.float32),
        'ln2_w': jnp.ones((L, 1, D), jnp.float32),
        'ln2_b': jnp.zeros((L, 1, D), jnp.float32),
        'w1': scale * jax.random.normal(k[4], (L, D, F), jnp.float32),
        'b1': scale * jax.random.normal(k[5], (L, 1, F), jnp.float32),
        'w2': scale * jax.random.normal(k[6], (L, F, D), jnp.float32),
        'b2': scale * jax.random.normal(k[7], (L, 1, D), jnp.float32),
        'lnf_w': jnp.ones((1, D), jnp.float32),
        'lnf_b': jnp.zeros((1, D), jnp.float32),
    }


def prepare_weights(p):
    """Wrapper-side split of the fused QKV projection + bf16 cast of matmul weights."""
    D = HIDDEN
    bf = jnp.bfloat16
    return {
        'ln1_w': p['ln1_w'], 'ln1_b': p['ln1_b'],
        'wq': p['wqkv'][:, :, :D].astype(bf),
        'wk': p['wqkv'][:, :, D:2 * D].astype(bf),
        'wv': p['wqkv'][:, :, 2 * D:].astype(bf),
        'bq': p['bqkv'][:, :, :D],
        'bk': p['bqkv'][:, :, D:2 * D],
        'bv': p['bqkv'][:, :, 2 * D:],
        'wo': p['wo'].astype(bf), 'bo': p['bo'],
        'ln2_w': p['ln2_w'], 'ln2_b': p['ln2_b'],
        'w1': p['w1'].astype(bf), 'b1': p['b1'],
        'w2': p['w2'].astype(bf), 'b2': p['b2'],
        'lnf_w': p['lnf_w'], 'lnf_b': p['lnf_b'],
    }


def make_tables():
    """Lane-dense RoPE tables, rotate-half permutation, causal mask, per-head masks."""
    d2 = HEAD_DIM // 2

    pos = np.arange(SEQ, dtype=np.float32)[:, None]
    inv_freq = 1.0 / (10000.0 ** (np.arange(0, HEAD_DIM, 2, dtype=np.float32) / HEAD_DIM))
    ang = pos * inv_freq[None, :]                                   # (S, d2)
    ang = np.tile(np.concatenate([ang, ang], axis=-1), (1, HEADS))  # (S, D) lane-dense
    cosf = jnp.asarray(np.cos(ang), jnp.float32)
    sinf = jnp.asarray(np.sin(ang), jnp.float32)

    rot = np.zeros((HIDDEN, HIDDEN), np.float32)   # per-head rotate-half: x @ rot
    for h in range(HEADS):
        o = h * HEAD_DIM
        for i in range(d2):
            rot[o + d2 + i, o + i] = -1.0          # first half  <- -x2
            rot[o + i, o + d2 + i] = 1.0           # second half <-  x1
    rot = jnp.asarray(rot)

    causal = np.tril(np.ones((SEQ, SEQ), np.float32))
    amask = jnp.asarray(np.where(causal > 0, 0.0, -1e30).astype(np.float32))

    hmask = np.zeros((HEADS, 1, HIDDEN), np.float32)
    for h in range(HEADS):
        hmask[h, 0, h * HEAD_DIM:(h + 1) * HEAD_DIM] = 1.0
    hmask = jnp.asarray(hmask, jnp.bfloat16)       # 0/1 exact in bf16

    return cosf, sinf, rot, amask, hmask


if __name__ == "__main__":
    key = jax.random.PRNGKey(0)
    k_params, k_x = jax.random.split(key)
    params = make_params(k_params)
    x = jax.random.normal(k_x, (BATCH, SEQ, HIDDEN), jnp.float32)

    run = jax.jit(cot_decoder)
    out = jax.block_until_ready(run(x, params))

    ref = decoder_reference(x, params)
    assert out.shape == (BATCH, SEQ, HIDDEN), out.shape
    assert bool(jnp.all(jnp.isfinite(out)))
    assert bool(jnp.allclose(out, ref, atol=2e-2, rtol=2e-2)), "kernel/reference mismatch"
    print("KERNEL_OK")
</pallas_src>

<mosaic_0001>
module attributes {stable_mosaic.version = 11 : i64} {
  func.func @decoder_kernel(%arg0: i32, %arg1: memref<16x64xf32, #tpu.memory_space<vmem>>, %arg2: memref<16x64xf32, #tpu.memory_space<vmem>>, %arg3: memref<16x64xf32, #tpu.memory_space<vmem>>, %arg4: memref<64x64xf32, #tpu.memory_space<vmem>>, %arg5: memref<16x16xf32, #tpu.memory_space<vmem>>, %arg6: memref<4x1x64xbf16, #tpu.memory_space<vmem>>, %arg7: memref<3x1x64xf32, #tpu.memory_space<vmem>>, %arg8: memref<3x1x64xf32, #tpu.memory_space<vmem>>, %arg9: memref<3x64x64xbf16, #tpu.memory_space<vmem>>, %arg10: memref<3x64x64xbf16, #tpu.memory_space<vmem>>, %arg11: memref<3x64x64xbf16, #tpu.memory_space<vmem>>, %arg12: memref<3x1x64xf32, #tpu.memory_space<vmem>>, %arg13: memref<3x1x64xf32, #tpu.memory_space<vmem>>, %arg14: memref<3x1x64xf32, #tpu.memory_space<vmem>>, %arg15: memref<3x64x64xbf16, #tpu.memory_space<vmem>>, %arg16: memref<3x1x64xf32, #tpu.memory_space<vmem>>, %arg17: memref<3x1x64xf32, #tpu.memory_space<vmem>>, %arg18: memref<3x1x64xf32, #tpu.memory_space<vmem>>, %arg19: memref<3x64x256xbf16, #tpu.memory_space<vmem>>, %arg20: memref<3x1x256xf32, #tpu.memory_space<vmem>>, %arg21: memref<3x256x64xbf16, #tpu.memory_space<vmem>>, %arg22: memref<3x1x64xf32, #tpu.memory_space<vmem>>, %arg23: memref<1x64xf32, #tpu.memory_space<vmem>>, %arg24: memref<1x64xf32, #tpu.memory_space<vmem>>, %arg25: memref<16x64xf32, #tpu.memory_space<vmem>>) attributes {dimension_semantics = [#tpu.dimension_semantics<parallel>], iteration_bounds = array<i64: 2>, scalar_prefetch = 0 : i64, scratch_operands = 0 : i64, tpu.core_type = #tpu.core_type<tc>, window_params = [{transform_indices = @transform_0, window_bounds = array<i64: 16, 64>}, {pipeline_mode = #tpu.pipeline_mode<synchronous>, transform_indices = @transform_1, window_bounds = array<i64: 16, 64>}, {pipeline_mode = #tpu.pipeline_mode<synchronous>, transform_indices = @transform_2, window_bounds = array<i64: 16, 64>}, {pipeline_mode = #tpu.pipeline_mode<synchronous>, transform_indices = @transform_3, window_bounds = array<i64: 64, 64>}, {pipeline_mode = #tpu.pipeline_mode<synchronous>, transform_indices = @transform_4, window_bounds = array<i64: 16, 16>}, {pipeline_mode = #tpu.pipeline_mode<synchronous>, transform_indices = @transform_5, window_bounds = array<i64: 4, 1, 64>}, {pipeline_mode = #tpu.pipeline_mode<synchronous>, transform_indices = @transform_6, window_bounds = array<i64: 3, 1, 64>}, {pipeline_mode = #tpu.pipeline_mode<synchronous>, transform_indices = @transform_7, window_bounds = array<i64: 3, 1, 64>}, {pipeline_mode = #tpu.pipeline_mode<synchronous>, transform_indices = @transform_8, window_bounds = array<i64: 3, 64, 64>}, {pipeline_mode = #tpu.pipeline_mode<synchronous>, transform_indices = @transform_9, window_bounds = array<i64: 3, 64, 64>}, {pipeline_mode = #tpu.pipeline_mode<synchronous>, transform_indices = @transform_10, window_bounds = array<i64: 3, 64, 64>}, {pipeline_mode = #tpu.pipeline_mode<synchronous>, transform_indices = @transform_11, window_bounds = array<i64: 3, 1, 64>}, {pipeline_mode = #tpu.pipeline_mode<synchronous>, transform_indices = @transform_12, window_bounds = array<i64: 3, 1, 64>}, {pipeline_mode = #tpu.pipeline_mode<synchronous>, transform_indices = @transform_13, window_bounds = array<i64: 3, 1, 64>}, {pipeline_mode = #tpu.pipeline_mode<synchronous>, transform_indices = @transform_14, window_bounds = array<i64: 3, 64, 64>}, {pipeline_mode = #tpu.pipeline_mode<synchronous>, transform_indices = @transform_15, window_bounds = array<i64: 3, 1, 64>}, {pipeline_mode = #tpu.pipeline_mode<synchronous>, transform_indices = @transform_16, window_bounds = array<i64: 3, 1, 64>}, {pipeline_mode = #tpu.pipeline_mode<synchronous>, transform_indices = @transform_17, window_bounds = array<i64: 3, 1, 64>}, {pipeline_mode = #tpu.pipeline_mode<synchronous>, transform_indices = @transform_18, window_bounds = array<i64: 3, 64, 256>}, {pipeline_mode = #tpu.pipeline_mode<synchronous>, transform_indices = @transform_19, window_bounds = array<i64: 3, 1, 256>}, {pipeline_mode = #tpu.pipeline_mode<synchronous>, transform_indices = @transform_20, window_bounds = array<i64: 3, 256, 64>}, {pipeline_mode = #tpu.pipeline_mode<synchronous>, transform_indices = @transform_21, window_bounds = array<i64: 3, 1, 64>}, {pipeline_mode = #tpu.pipeline_mode<synchronous>, transform_indices = @transform_22, window_bounds = array<i64: 1, 64>}, {pipeline_mode = #tpu.pipeline_mode<synchronous>, transform_indices = @transform_23, window_bounds = array<i64: 1, 64>}, {transform_indices = @transform_24, window_bounds = array<i64: 16, 64>}]} {
    %c0 = arith.constant 0 : index
    %c0_0 = arith.constant 0 : index
    %0 = vector.load %arg1[%c0, %c0_0] : memref<16x64xf32, #tpu.memory_space<vmem>>, vector<16x64xf32>
    %c0_1 = arith.constant 0 : index
    %c0_2 = arith.constant 0 : index
    %1 = vector.load %arg2[%c0_1, %c0_2] : memref<16x64xf32, #tpu.memory_space<vmem>>, vector<16x64xf32>
    %c0_3 = arith.constant 0 : index
    %c0_4 = arith.constant 0 : index
    %2 = vector.load %arg3[%c0_3, %c0_4] : memref<16x64xf32, #tpu.memory_space<vmem>>, vector<16x64xf32>
    %c0_5 = arith.constant 0 : index
    %c0_6 = arith.constant 0 : index
    %3 = vector.load %arg4[%c0_5, %c0_6] : memref<64x64xf32, #tpu.memory_space<vmem>>, vector<64x64xf32>
    %c0_7 = arith.constant 0 : index
    %c0_8 = arith.constant 0 : index
    %4 = vector.load %arg5[%c0_7, %c0_8] : memref<16x16xf32, #tpu.memory_space<vmem>>, vector<16x16xf32>
    %c0_9 = arith.constant 0 : index
    %c0_10 = arith.constant 0 : index
    %c0_11 = arith.constant 0 : index
    %5 = vector.load %arg6[%c0_9, %c0_10, %c0_11] : memref<4x1x64xbf16, #tpu.memory_space<vmem>>, vector<4x1x64xbf16>
    %c0_12 = arith.constant 0 : index
    %c0_13 = arith.constant 0 : index
    %c0_14 = arith.constant 0 : index
    %6 = vector.load %arg7[%c0_12, %c0_13, %c0_14] : memref<3x1x64xf32, #tpu.memory_space<vmem>>, vector<1x1x64xf32>
    %7 = vector.shape_cast %6 : vector<1x1x64xf32> to vector<1x64xf32>
    %c0_15 = arith.constant 0 : index
    %c0_16 = arith.constant 0 : index
    %c0_17 = arith.constant 0 : index
    %8 = vector.load %arg8[%c0_15, %c0_16, %c0_17] : memref<3x1x64xf32, #tpu.memory_space<vmem>>, vector<1x1x64xf32>
    %9 = vector.shape_cast %8 : vector<1x1x64xf32> to vector<1x64xf32>
    %c0_18 = arith.constant 0 : index
    %c0_19 = arith.constant 0 : index
    %c0_20 = arith.constant 0 : index
    %10 = vector.load %arg9[%c0_18, %c0_19, %c0_20] : memref<3x64x64xbf16, #tpu.memory_space<vmem>>, vector<1x64x64xbf16>
    %11 = vector.shape_cast %10 : vector<1x64x64xbf16> to vector<64x64xbf16>
    %c0_21 = arith.constant 0 : index
    %c0_22 = arith.constant 0 : index
    %c0_23 = arith.constant 0 : index
    %12 = vector.load %arg10[%c0_21, %c0_22, %c0_23] : memref<3x64x64xbf16, #tpu.memory_space<vmem>>, vector<1x64x64xbf16>
    %13 = vector.shape_cast %12 : vector<1x64x64xbf16> to vector<64x64xbf16>
    %c0_24 = arith.constant 0 : index
    %c0_25 = arith.constant 0 : index
    %c0_26 = arith.constant 0 : index
    %14 = vector.load %arg11[%c0_24, %c0_25, %c0_26] : memref<3x64x64xbf16, #tpu.memory_space<vmem>>, vector<1x64x64xbf16>
    %15 = vector.shape_cast %14 : vector<1x64x64xbf16> to vector<64x64xbf16>
    %c0_27 = arith.constant 0 : index
    %c0_28 = arith.constant 0 : index
    %c0_29 = arith.constant 0 : index
    %16 = vector.load %arg12[%c0_27, %c0_28, %c0_29] : memref<3x1x64xf32, #tpu.memory_space<vmem>>, vector<1x1x64xf32>
    %17 = vector.shape_cast %16 : vector<1x1x64xf32> to vector<1x64xf32>
    %c0_30 = arith.constant 0 : index
    %c0_31 = arith.constant 0 : index
    %c0_32 = arith.constant 0 : index
    %18 = vector.load %arg13[%c0_30, %c0_31, %c0_32] : memref<3x1x64xf32, #tpu.memory_space<vmem>>, vector<1x1x64xf32>
    %19 = vector.shape_cast %18 : vector<1x1x64xf32> to vector<1x64xf32>
    %c0_33 = arith.constant 0 : index
    %c0_34 = arith.constant 0 : index
    %c0_35 = arith.constant 0 : index
    %20 = vector.load %arg14[%c0_33, %c0_34, %c0_35] : memref<3x1x64xf32, #tpu.memory_space<vmem>>, vector<1x1x64xf32>
    %21 = vector.shape_cast %20 : vector<1x1x64xf32> to vector<1x64xf32>
    %c0_36 = arith.constant 0 : index
    %c0_37 = arith.constant 0 : index
    %c0_38 = arith.constant 0 : index
    %22 = vector.load %arg15[%c0_36, %c0_37, %c0_38] : memref<3x64x64xbf16, #tpu.memory_space<vmem>>, vector<1x64x64xbf16>
    %23 = vector.shape_cast %22 : vector<1x64x64xbf16> to vector<64x64xbf16>
    %c0_39 = arith.constant 0 : index
    %c0_40 = arith.constant 0 : index
    %c0_41 = arith.constant 0 : index
    %24 = vector.load %arg16[%c0_39, %c0_40, %c0_41] : memref<3x1x64xf32, #tpu.memory_space<vmem>>, vector<1x1x64xf32>
    %25 = vector.shape_cast %24 : vector<1x1x64xf32> to vector<1x64xf32>
    %c0_42 = arith.constant 0 : index
    %c0_43 = arith.constant 0 : index
    %c0_44 = arith.constant 0 : index
    %26 = vector.load %arg17[%c0_42, %c0_43, %c0_44] : memref<3x1x64xf32, #tpu.memory_space<vmem>>, vector<1x1x64xf32>
    %27 = vector.shape_cast %26 : vector<1x1x64xf32> to vector<1x64xf32>
    %c0_45 = arith.constant 0 : index
    %c0_46 = arith.constant 0 : index
    %c0_47 = arith.constant 0 : index
    %28 = vector.load %arg18[%c0_45, %c0_46, %c0_47] : memref<3x1x64xf32, #tpu.memory_space<vmem>>, vector<1x1x64xf32>
    %29 = vector.shape_cast %28 : vector<1x1x64xf32> to vector<1x64xf32>
    %c0_48 = arith.constant 0 : index
    %c0_49 = arith.constant 0 : index
    %c0_50 = arith.constant 0 : index
    %30 = vector.load %arg19[%c0_48, %c0_49, %c0_50] : memref<3x64x256xbf16, #tpu.memory_space<vmem>>, vector<1x64x256xbf16>
    %31 = vector.shape_cast %30 : vector<1x64x256xbf16> to vector<64x256xbf16>
    %c0_51 = arith.constant 0 : index
    %c0_52 = arith.constant 0 : index
    %c0_53 = arith.constant 0 : index
    %32 = vector.load %arg20[%c0_51, %c0_52, %c0_53] : memref<3x1x256xf32, #tpu.memory_space<vmem>>, vector<1x1x256xf32>
    %33 = vector.shape_cast %32 : vector<1x1x256xf32> to vector<1x256xf32>
    %c0_54 = arith.constant 0 : index
    %c0_55 = arith.constant 0 : index
    %c0_56 = arith.constant 0 : index
    %34 = vector.load %arg21[%c0_54, %c0_55, %c0_56] : memref<3x256x64xbf16, #tpu.memory_space<vmem>>, vector<1x256x64xbf16>
    %35 = vector.shape_cast %34 : vector<1x256x64xbf16> to vector<256x64xbf16>
    %c0_57 = arith.constant 0 : index
    %c0_58 = arith.constant 0 : index
    %c0_59 = arith.constant 0 : index
    %36 = vector.load %arg22[%c0_57, %c0_58, %c0_59] : memref<3x1x64xf32, #tpu.memory_space<vmem>>, vector<1x1x64xf32>
    %37 = vector.shape_cast %36 : vector<1x1x64xf32> to vector<1x64xf32>
    %cst = arith.constant dense<0.000000e+00> : vector<16xf32>
    %38 = vector.multi_reduction <add>, %0, %cst [1] : vector<16x64xf32> to vector<16xf32>
    %39 = vector.shape_cast %38 : vector<16xf32> to vector<16x1xf32>
    %cst_60 = arith.constant 6.400000e+01 : f32
    %40 = vector.broadcast %cst_60 : f32 to vector<16x1xf32>
    %41 = arith.divf %39, %40 : vector<16x1xf32>
    %42 = vector.broadcast %41 : vector<16x1xf32> to vector<16x64xf32>
    %43 = arith.subf %0, %42 : vector<16x64xf32>
    %44 = arith.mulf %43, %43 : vector<16x64xf32>
    %cst_61 = arith.constant dense<0.000000e+00> : vector<16xf32>
    %45 = vector.multi_reduction <add>, %44, %cst_61 [1] : vector<16x64xf32> to vector<16xf32>
    %46 = vector.shape_cast %45 : vector<16xf32> to vector<16x1xf32>
    %cst_62 = arith.constant 6.400000e+01 : f32
    %47 = vector.broadcast %cst_62 : f32 to vector<16x1xf32>
    %48 = arith.divf %46, %47 : vector<16x1xf32>
    %49 = vector.broadcast %41 : vector<16x1xf32> to vector<16x64xf32>
    %50 = arith.subf %0, %49 : vector<16x64xf32>
    %cst_63 = arith.constant 9.99999974E-6 : f32
    %51 = vector.broadcast %cst_63 : f32 to vector<16x1xf32>
    %52 = arith.addf %48, %51 : vector<16x1xf32>
    %53 = math.rsqrt %52 : vector<16x1xf32>
    %54 = vector.broadcast %53 : vector<16x1xf32> to vector<16x64xf32>
    %55 = arith.mulf %50, %54 : vector<16x64xf32>
    %56 = vector.broadcast %7 : vector<1x64xf32> to vector<16x64xf32>
    %57 = arith.mulf %55, %56 : vector<16x64xf32>
    %58 = vector.broadcast %9 : vector<1x64xf32> to vector<16x64xf32>
    %59 = arith.addf %57, %58 : vector<16x64xf32>
    %60 = arith.truncf %59 : vector<16x64xf32> to vector<16x64xbf16>
    %cst_64 = arith.constant dense<0.000000e+00> : vector<16x64xf32>
    %61 = tpu.matmul %60, %11, %cst_64 {dimension_numbers = #tpu.dot_dimension_numbers<[1], [0], [0], [1], [0, 0, 1, 1], [], []>} : vector<16x64xbf16>, vector<64x64xbf16>, vector<16x64xf32> -> vector<16x64xf32>
    %62 = vector.broadcast %17 : vector<1x64xf32> to vector<16x64xf32>
    %63 = arith.addf %61, %62 : vector<16x64xf32>
    %cst_65 = arith.constant dense<0.000000e+00> : vector<16x64xf32>
    %64 = tpu.matmul %60, %13, %cst_65 {dimension_numbers = #tpu.dot_dimension_numbers<[1], [0], [0], [1], [0, 0, 1, 1], [], []>} : vector<16x64xbf16>, vector<64x64xbf16>, vector<16x64xf32> -> vector<16x64xf32>
    %65 = vector.broadcast %19 : vector<1x64xf32> to vector<16x64xf32>
    %66 = arith.addf %64, %65 : vector<16x64xf32>
    %cst_66 = arith.constant dense<0.000000e+00> : vector<16x64xf32>
    %67 = tpu.matmul %60, %15, %cst_66 {dimension_numbers = #tpu.dot_dimension_numbers<[1], [0], [0], [1], [0, 0, 1, 1], [], []>} : vector<16x64xbf16>, vector<64x64xbf16>, vector<16x64xf32> -> vector<16x64xf32>
    %68 = vector.broadcast %21 : vector<1x64xf32> to vector<16x64xf32>
    %69 = arith.addf %67, %68 : vector<16x64xf32>
    %70 = arith.mulf %63, %1 : vector<16x64xf32>
    %cst_67 = arith.constant dense<0.000000e+00> : vector<16x64xf32>
    %71 = tpu.matmul %63, %3, %cst_67 {dimension_numbers = #tpu.dot_dimension_numbers<[1], [0], [0], [1], [0, 0, 1, 1], [], []>} : vector<16x64xf32>, vector<64x64xf32>, vector<16x64xf32> -> vector<16x64xf32>
    %72 = arith.mulf %71, %2 : vector<16x64xf32>
    %73 = arith.addf %70, %72 : vector<16x64xf32>
    %74 = arith.mulf %66, %1 : vector<16x64xf32>
    %cst_68 = arith.constant dense<0.000000e+00> : vector<16x64xf32>
    %75 = tpu.matmul %66, %3, %cst_68 {dimension_numbers = #tpu.dot_dimension_numbers<[1], [0], [0], [1], [0, 0, 1, 1], [], []>} : vector<16x64xf32>, vector<64x64xf32>, vector<16x64xf32> -> vector<16x64xf32>
    %76 = arith.mulf %75, %2 : vector<16x64xf32>
    %77 = arith.addf %74, %76 : vector<16x64xf32>
    %cst_69 = arith.constant 2.500000e-01 : f32
    %78 = vector.broadcast %cst_69 : f32 to vector<16x64xf32>
    %79 = arith.mulf %73, %78 : vector<16x64xf32>
    %80 = arith.truncf %79 : vector<16x64xf32> to vector<16x64xbf16>
    %81 = arith.truncf %77 : vector<16x64xf32> to vector<16x64xbf16>
    %82 = arith.truncf %69 : vector<16x64xf32> to vector<16x64xbf16>
    %cst_70 = arith.constant 0.000000e+00 : f32
    %83 = vector.broadcast %cst_70 : f32 to vector<16x64xf32>
    %84 = vector.extract_strided_slice %5 {offsets = [0, 0, 0], sizes = [1, 1, 64], strides = [1, 1, 1]} : vector<4x1x64xbf16> to vector<1x1x64xbf16>
    %85 = vector.shape_cast %84 : vector<1x1x64xbf16> to vector<1x64xbf16>
    %86 = vector.broadcast %85 : vector<1x64xbf16> to vector<16x64xbf16>
    %87 = arith.mulf %80, %86 : vector<16x64xbf16>
    "tpu.trace_start"() <{level = 10 : i32, message = "nd,md->nm"}> : () -> ()
    %cst_71 = arith.constant dense<0.000000e+00> : vector<16x16xf32>
    %88 = tpu.matmul %87, %81, %cst_71 {dimension_numbers = #tpu.dot_dimension_numbers<[1], [1], [0], [0], [0, 0, 1, 0], [], []>} : vector<16x64xbf16>, vector<16x64xbf16>, vector<16x16xf32> -> vector<16x16xf32>
    "tpu.trace_stop"() : () -> ()
    %89 = arith.addf %88, %4 : vector<16x16xf32>
    %cst_72 = arith.constant dense<0xFF800000> : vector<16xf32>
    %90 = vector.multi_reduction <maximumf>, %89, %cst_72 [1] : vector<16x16xf32> to vector<16xf32>
    %91 = vector.shape_cast %90 : vector<16xf32> to vector<16x1xf32>
    %92 = vector.broadcast %91 : vector<16x1xf32> to vector<16x16xf32>
    %93 = arith.subf %89, %92 : vector<16x16xf32>
    %94 = math.exp %93 : vector<16x16xf32>
    %cst_73 = arith.constant dense<0.000000e+00> : vector<16xf32>
    %95 = vector.multi_reduction <add>, %94, %cst_73 [1] : vector<16x16xf32> to vector<16xf32>
    %96 = vector.shape_cast %95 : vector<16xf32> to vector<16x1xf32>
    %97 = vector.broadcast %96 : vector<16x1xf32> to vector<16x16xf32>
    %98 = arith.divf %94, %97 : vector<16x16xf32>
    %99 = arith.truncf %98 : vector<16x16xf32> to vector<16x16xbf16>
    %100 = vector.broadcast %85 : vector<1x64xbf16> to vector<16x64xbf16>
    %101 = arith.mulf %82, %100 : vector<16x64xbf16>
    "tpu.trace_start"() <{level = 10 : i32, message = "nm,md->nd"}> : () -> ()
    %cst_74 = arith.constant dense<0.000000e+00> : vector<16x64xf32>
    %102 = tpu.matmul %99, %101, %cst_74 {dimension_numbers = #tpu.dot_dimension_numbers<[1], [0], [0], [1], [0, 0, 1, 1], [], []>} : vector<16x16xbf16>, vector<16x64xbf16>, vector<16x64xf32> -> vector<16x64xf32>
    "tpu.trace_stop"() : () -> ()
    %103 = arith.addf %83, %102 : vector<16x64xf32>
    %104 = vector.extract_strided_slice %5 {offsets = [1, 0, 0], sizes = [1, 1, 64], strides = [1, 1, 1]} : vector<4x1x64xbf16> to vector<1x1x64xbf16>
    %105 = vector.shape_cast %104 : vector<1x1x64xbf16> to vector<1x64xbf16>
    %106 = vector.broadcast %105 : vector<1x64xbf16> to vector<16x64xbf16>
    %107 = arith.mulf %80, %106 : vector<16x64xbf16>
    "tpu.trace_start"() <{level = 10 : i32, message = "nd,md->nm"}> : () -> ()
    %cst_75 = arith.constant dense<0.000000e+00> : vector<16x16xf32>
    %108 = tpu.matmul %107, %81, %cst_75 {dimension_numbers = #tpu.dot_dimension_numbers<[1], [1], [0], [0], [0, 0, 1, 0], [], []>} : vector<16x64xbf16>, vector<16x64xbf16>, vector<16x16xf32> -> vector<16x16xf32>
    "tpu.trace_stop"() : () -> ()
    %109 = arith.addf %108, %4 : vector<16x16xf32>
    %cst_76 = arith.constant dense<0xFF800000> : vector<16xf32>
    %110 = vector.multi_reduction <maximumf>, %109, %cst_76 [1] : vector<16x16xf32> to vector<16xf32>
    %111 = vector.shape_cast %110 : vector<16xf32> to vector<16x1xf32>
    %112 = vector.broadcast %111 : vector<16x1xf32> to vector<16x16xf32>
    %113 = arith.subf %109, %112 : vector<16x16xf32>
    %114 = math.exp %113 : vector<16x16xf32>
    %cst_77 = arith.constant dense<0.000000e+00> : vector<16xf32>
    %115 = vector.multi_reduction <add>, %114, %cst_77 [1] : vector<16x16xf32> to vector<16xf32>
    %116 = vector.shape_cast %115 : vector<16xf32> to vector<16x1xf32>
    %117 = vector.broadcast %116 : vector<16x1xf32> to vector<16x16xf32>
    %118 = arith.divf %114, %117 : vector<16x16xf32>
    %119 = arith.truncf %118 : vector<16x16xf32> to vector<16x16xbf16>
    %120 = vector.broadcast %105 : vector<1x64xbf16> to vector<16x64xbf16>
    %121 = arith.mulf %82, %120 : vector<16x64xbf16>
    "tpu.trace_start"() <{level = 10 : i32, message = "nm,md->nd"}> : () -> ()
    %cst_78 = arith.constant dense<0.000000e+00> : vector<16x64xf32>
    %122 = tpu.matmul %119, %121, %cst_78 {dimension_numbers = #tpu.dot_dimension_numbers<[1], [0], [0], [1], [0, 0, 1, 1], [], []>} : vector<16x16xbf16>, vector<16x64xbf16>, vector<16x64xf32> -> vector<16x64xf32>
    "tpu.trace_stop"() : () -> ()
    %123 = arith.addf %103, %122 : vector<16x64xf32>
    %124 = vector.extract_strided_slice %5 {offsets = [2, 0, 0], sizes = [1, 1, 64], strides = [1, 1, 1]} : vector<4x1x64xbf16> to vector<1x1x64xbf16>
    %125 = vector.shape_cast %124 : vector<1x1x64xbf16> to vector<1x64xbf16>
    %126 = vector.broadcast %125 : vector<1x64xbf16> to vector<16x64xbf16>
    %127 = arith.mulf %80, %126 : vector<16x64xbf16>
    "tpu.trace_start"() <{level = 10 : i32, message = "nd,md->nm"}> : () -> ()
    %cst_79 = arith.constant dense<0.000000e+00> : vector<16x16xf32>
    %128 = tpu.matmul %127, %81, %cst_79 {dimension_numbers = #tpu.dot_dimension_numbers<[1], [1], [0], [0], [0, 0, 1, 0], [], []>} : vector<16x64xbf16>, vector<16x64xbf16>, vector<16x16xf32> -> vector<16x16xf32>
    "tpu.trace_stop"() : () -> ()
    %129 = arith.addf %128, %4 : vector<16x16xf32>
    %cst_80 = arith.constant dense<0xFF800000> : vector<16xf32>
    %130 = vector.multi_reduction <maximumf>, %129, %cst_80 [1] : vector<16x16xf32> to vector<16xf32>
    %131 = vector.shape_cast %130 : vector<16xf32> to vector<16x1xf32>
    %132 = vector.broadcast %131 : vector<16x1xf32> to vector<16x16xf32>
    %133 = arith.subf %129, %132 : vector<16x16xf32>
    %134 = math.exp %133 : vector<16x16xf32>
    %cst_81 = arith.constant dense<0.000000e+00> : vector<16xf32>
    %135 = vector.multi_reduction <add>, %134, %cst_81 [1] : vector<16x16xf32> to vector<16xf32>
    %136 = vector.shape_cast %135 : vector<16xf32> to vector<16x1xf32>
    %137 = vector.broadcast %136 : vector<16x1xf32> to vector<16x16xf32>
    %138 = arith.divf %134, %137 : vector<16x16xf32>
    %139 = arith.truncf %138 : vector<16x16xf32> to vector<16x16xbf16>
    %140 = vector.broadcast %125 : vector<1x64xbf16> to vector<16x64xbf16>
    %141 = arith.mulf %82, %140 : vector<16x64xbf16>
    "tpu.trace_start"() <{level = 10 : i32, message = "nm,md->nd"}> : () -> ()
    %cst_82 = arith.constant dense<0.000000e+00> : vector<16x64xf32>
    %142 = tpu.matmul %139, %141, %cst_82 {dimension_numbers = #tpu.dot_dimension_numbers<[1], [0], [0], [1], [0, 0, 1, 1], [], []>} : vector<16x16xbf16>, vector<16x64xbf16>, vector<16x64xf32> -> vector<16x64xf32>
    "tpu.trace_stop"() : () -> ()
    %143 = arith.addf %123, %142 : vector<16x64xf32>
    %144 = vector.extract_strided_slice %5 {offsets = [3, 0, 0], sizes = [1, 1, 64], strides = [1, 1, 1]} : vector<4x1x64xbf16> to vector<1x1x64xbf16>
    %145 = vector.shape_cast %144 : vector<1x1x64xbf16> to vector<1x64xbf16>
    %146 = vector.broadcast %145 : vector<1x64xbf16> to vector<16x64xbf16>
    %147 = arith.mulf %80, %146 : vector<16x64xbf16>
    "tpu.trace_start"() <{level = 10 : i32, message = "nd,md->nm"}> : () -> ()
    %cst_83 = arith.constant dense<0.000000e+00> : vector<16x16xf32>
    %148 = tpu.matmul %147, %81, %cst_83 {dimension_numbers = #tpu.dot_dimension_numbers<[1], [1], [0], [0], [0, 0, 1, 0], [], []>} : vector<16x64xbf16>, vector<16x64xbf16>, vector<16x16xf32> -> vector<16x16xf32>
    "tpu.trace_stop"() : () -> ()
    %149 = arith.addf %148, %4 : vector<16x16xf32>
    %cst_84 = arith.constant dense<0xFF800000> : vector<16xf32>
    %150 = vector.multi_reduction <maximumf>, %149, %cst_84 [1] : vector<16x16xf32> to vector<16xf32>
    %151 = vector.shape_cast %150 : vector<16xf32> to vector<16x1xf32>
    %152 = vector.broadcast %151 : vector<16x1xf32> to vector<16x16xf32>
    %153 = arith.subf %149, %152 : vector<16x16xf32>
    %154 = math.exp %153 : vector<16x16xf32>
    %cst_85 = arith.constant dense<0.000000e+00> : vector<16xf32>
    %155 = vector.multi_reduction <add>, %154, %cst_85 [1] : vector<16x16xf32> to vector<16xf32>
    %156 = vector.shape_cast %155 : vector<16xf32> to vector<16x1xf32>
    %157 = vector.broadcast %156 : vector<16x1xf32> to vector<16x16xf32>
    %158 = arith.divf %154, %157 : vector<16x16xf32>
    %159 = arith.truncf %158 : vector<16x16xf32> to vector<16x16xbf16>
    %160 = vector.broadcast %145 : vector<1x64xbf16> to vector<16x64xbf16>
    %161 = arith.mulf %82, %160 : vector<16x64xbf16>
    "tpu.trace_start"() <{level = 10 : i32, message = "nm,md->nd"}> : () -> ()
    %cst_86 = arith.constant dense<0.000000e+00> : vector<16x64xf32>
    %162 = tpu.matmul %159, %161, %cst_86 {dimension_numbers = #tpu.dot_dimension_numbers<[1], [0], [0], [1], [0, 0, 1, 1], [], []>} : vector<16x16xbf16>, vector<16x64xbf16>, vector<16x64xf32> -> vector<16x64xf32>
    "tpu.trace_stop"() : () -> ()
    %163 = arith.addf %143, %162 : vector<16x64xf32>
    %164 = arith.truncf %163 : vector<16x64xf32> to vector<16x64xbf16>
    %cst_87 = arith.constant dense<0.000000e+00> : vector<16x64xf32>
    %165 = tpu.matmul %164, %23, %cst_87 {dimension_numbers = #tpu.dot_dimension_numbers<[1], [0], [0], [1], [0, 0, 1, 1], [], []>} : vector<16x64xbf16>, vector<64x64xbf16>, vector<16x64xf32> -> vector<16x64xf32>
    %166 = vector.broadcast %25 : vector<1x64xf32> to vector<16x64xf32>
    %167 = arith.addf %165, %166 : vector<16x64xf32>
    %168 = arith.addf %0, %167 : vector<16x64xf32>
    %cst_88 = arith.constant dense<0.000000e+00> : vector<16xf32>
    %169 = vector.multi_reduction <add>, %168, %cst_88 [1] : vector<16x64xf32> to vector<16xf32>
    %170 = vector.shape_cast %169 : vector<16xf32> to vector<16x1xf32>
    %cst_89 = arith.constant 6.400000e+01 : f32
    %171 = vector.broadcast %cst_89 : f32 to vector<16x1xf32>
    %172 = arith.divf %170, %171 : vector<16x1xf32>
    %173 = vector.broadcast %172 : vector<16x1xf32> to vector<16x64xf32>
    %174 = arith.subf %168, %173 : vector<16x64xf32>
    %175 = arith.mulf %174, %174 : vector<16x64xf32>
    %cst_90 = arith.constant dense<0.000000e+00> : vector<16xf32>
    %176 = vector.multi_reduction <add>, %175, %cst_90 [1] : vector<16x64xf32> to vector<16xf32>
    %177 = vector.shape_cast %176 : vector<16xf32> to vector<16x1xf32>
    %cst_91 = arith.constant 6.400000e+01 : f32
    %178 = vector.broadcast %cst_91 : f32 to vector<16x1xf32>
    %179 = arith.divf %177, %178 : vector<16x1xf32>
    %180 = vector.broadcast %172 : vector<16x1xf32> to vector<16x64xf32>
    %181 = arith.subf %168, %180 : vector<16x64xf32>
    %cst_92 = arith.constant 9.99999974E-6 : f32
    %182 = vector.broadcast %cst_92 : f32 to vector<16x1xf32>
    %183 = arith.addf %179, %182 : vector<16x1xf32>
    %184 = math.rsqrt %183 : vector<16x1xf32>
    %185 = vector.broadcast %184 : vector<16x1xf32> to vector<16x64xf32>
    %186 = arith.mulf %181, %185 : vector<16x64xf32>
    %187 = vector.broadcast %27 : vector<1x64xf32> to vector<16x64xf32>
    %188 = arith.mulf %186, %187 : vector<16x64xf32>
    %189 = vector.broadcast %29 : vector<1x64xf32> to vector<16x64xf32>
    %190 = arith.addf %188, %189 : vector<16x64xf32>
    %191 = arith.truncf %190 : vector<16x64xf32> to vector<16x64xbf16>
    %cst_93 = arith.constant dense<0.000000e+00> : vector<16x256xf32>
    %192 = tpu.matmul %191, %31, %cst_93 {dimension_numbers = #tpu.dot_dimension_numbers<[1], [0], [0], [1], [0, 0, 1, 1], [], []>} : vector<16x64xbf16>, vector<64x256xbf16>, vector<16x256xf32> -> vector<16x256xf32>
    %193 = vector.broadcast %33 : vector<1x256xf32> to vector<16x256xf32>
    %194 = arith.addf %192, %193 : vector<16x256xf32>
    %195 = arith.mulf %194, %194 : vector<16x256xf32>
    %196 = arith.mulf %194, %195 : vector<16x256xf32>
    %cst_94 = arith.constant 4.471500e-02 : f32
    %197 = vector.broadcast %cst_94 : f32 to vector<16x256xf32>
    %198 = arith.mulf %197, %196 : vector<16x256xf32>
    %199 = arith.addf %194, %198 : vector<16x256xf32>
    %cst_95 = arith.constant 0.797884583 : f32
    %200 = vector.broadcast %cst_95 : f32 to vector<16x256xf32>
    %201 = arith.mulf %200, %199 : vector<16x256xf32>
    %202 = math.tanh %201 : vector<16x256xf32>
    %cst_96 = arith.constant 1.000000e+00 : f32
    %203 = vector.broadcast %cst_96 : f32 to vector<16x256xf32>
    %204 = arith.addf %203, %202 : vector<16x256xf32>
    %cst_97 = arith.constant 5.000000e-01 : f32
    %205 = vector.broadcast %cst_97 : f32 to vector<16x256xf32>
    %206 = arith.mulf %205, %204 : vector<16x256xf32>
    %207 = arith.mulf %194, %206 : vector<16x256xf32>
    %208 = arith.truncf %207 : vector<16x256xf32> to vector<16x256xbf16>
    %cst_98 = arith.constant dense<0.000000e+00> : vector<16x64xf32>
    %209 = tpu.matmul %208, %35, %cst_98 {dimension_numbers = #tpu.dot_dimension_numbers<[1], [0], [0], [1], [0, 0, 1, 1], [], []>} : vector<16x256xbf16>, vector<256x64xbf16>, vector<16x64xf32> -> vector<16x64xf32>
    %210 = vector.broadcast %37 : vector<1x64xf32> to vector<16x64xf32>
    %211 = arith.addf %209, %210 : vector<16x64xf32>
    %212 = arith.addf %168, %211 : vector<16x64xf32>
    %c1 = arith.constant 1 : index
    %c0_99 = arith.constant 0 : index
    %c0_100 = arith.constant 0 : index
    %213 = vector.load %arg7[%c1, %c0_99, %c0_100] : memref<3x1x64xf32, #tpu.memory_space<vmem>>, vector<1x1x64xf32>
    %214 = vector.shape_cast %213 : vector<1x1x64xf32> to vector<1x64xf32>
    %c1_101 = arith.constant 1 : index
    %c0_102 = arith.constant 0 : index
    %c0_103 = arith.constant 0 : index
    %215 = vector.load %arg8[%c1_101, %c0_102, %c0_103] : memref<3x1x64xf32, #tpu.memory_space<vmem>>, vector<1x1x64xf32>
    %216 = vector.shape_cast %215 : vector<1x1x64xf32> to vector<1x64xf32>
    %c1_104 = arith.constant 1 : index
    %c0_105 = arith.constant 0 : index
    %c0_106 = arith.constant 0 : index
    %217 = vector.load %arg9[%c1_104, %c0_105, %c0_106] : memref<3x64x64xbf16, #tpu.memory_space<vmem>>, vector<1x64x64xbf16>
    %218 = vector.shape_cast %217 : vector<1x64x64xbf16> to vector<64x64xbf16>
    %c1_107 = arith.constant 1 : index
    %c0_108 = arith.constant 0 : index
    %c0_109 = arith.constant 0 : index
    %219 = vector.load %arg10[%c1_107, %c0_108, %c0_109] : memref<3x64x64xbf16, #tpu.memory_space<vmem>>, vector<1x64x64xbf16>
    %220 = vector.shape_cast %219 : vector<1x64x64xbf16> to vector<64x64xbf16>
    %c1_110 = arith.constant 1 : index
    %c0_111 = arith.constant 0 : index
    %c0_112 = arith.constant 0 : index
    %221 = vector.load %arg11[%c1_110, %c0_111, %c0_112] : memref<3x64x64xbf16, #tpu.memory_space<vmem>>, vector<1x64x64xbf16>
    %222 = vector.shape_cast %221 : vector<1x64x64xbf16> to vector<64x64xbf16>
    %c1_113 = arith.constant 1 : index
    %c0_114 = arith.constant 0 : index
    %c0_115 = arith.constant 0 : index
    %223 = vector.load %arg12[%c1_113, %c0_114, %c0_115] : memref<3x1x64xf32, #tpu.memory_space<vmem>>, vector<1x1x64xf32>
    %224 = vector.shape_cast %223 : vector<1x1x64xf32> to vector<1x64xf32>
    %c1_116 = arith.constant 1 : index
    %c0_117 = arith.constant 0 : index
    %c0_118 = arith.constant 0 : index
    %225 = vector.load %arg13[%c1_116, %c0_117, %c0_118] : memref<3x1x64xf32, #tpu.memory_space<vmem>>, vector<1x1x64xf32>
    %226 = vector.shape_cast %225 : vector<1x1x64xf32> to vector<1x64xf32>
    %c1_119 = arith.constant 1 : index
    %c0_120 = arith.constant 0 : index
    %c0_121 = arith.constant 0 : index
    %227 = vector.load %arg14[%c1_119, %c0_120, %c0_121] : memref<3x1x64xf32, #tpu.memory_space<vmem>>, vector<1x1x64xf32>
    %228 = vector.shape_cast %227 : vector<1x1x64xf32> to vector<1x64xf32>
    %c1_122 = arith.constant 1 : index
    %c0_123 = arith.constant 0 : index
    %c0_124 = arith.constant 0 : index
    %229 = vector.load %arg15[%c1_122, %c0_123, %c0_124] : memref<3x64x64xbf16, #tpu.memory_space<vmem>>, vector<1x64x64xbf16>
    %230 = vector.shape_cast %229 : vector<1x64x64xbf16> to vector<64x64xbf16>
    %c1_125 = arith.constant 1 : index
    %c0_126 = arith.constant 0 : index
    %c0_127 = arith.constant 0 : index
    %231 = vector.load %arg16[%c1_125, %c0_126, %c0_127] : memref<3x1x64xf32, #tpu.memory_space<vmem>>, vector<1x1x64xf32>
    %232 = vector.shape_cast %231 : vector<1x1x64xf32> to vector<1x64xf32>
    %c1_128 = arith.constant 1 : index
    %c0_129 = arith.constant 0 : index
    %c0_130 = arith.constant 0 : index
    %233 = vector.load %arg17[%c1_128, %c0_129, %c0_130] : memref<3x1x64xf32, #tpu.memory_space<vmem>>, vector<1x1x64xf32>
    %234 = vector.shape_cast %233 : vector<1x1x64xf32> to vector<1x64xf32>
    %c1_131 = arith.constant 1 : index
    %c0_132 = arith.constant 0 : index
    %c0_133 = arith.constant 0 : index
    %235 = vector.load %arg18[%c1_131, %c0_132, %c0_133] : memref<3x1x64xf32, #tpu.memory_space<vmem>>, vector<1x1x64xf32>
    %236 = vector.shape_cast %235 : vector<1x1x64xf32> to vector<1x64xf32>
    %c1_134 = arith.constant 1 : index
    %c0_135 = arith.constant 0 : index
    %c0_136 = arith.constant 0 : index
    %237 = vector.load %arg19[%c1_134, %c0_135, %c0_136] : memref<3x64x256xbf16, #tpu.memory_space<vmem>>, vector<1x64x256xbf16>
    %238 = vector.shape_cast %237 : vector<1x64x256xbf16> to vector<64x256xbf16>
    %c1_137 = arith.constant 1 : index
    %c0_138 = arith.constant 0 : index
    %c0_139 = arith.constant 0 : index
    %239 = vector.load %arg20[%c1_137, %c0_138, %c0_139] : memref<3x1x256xf32, #tpu.memory_space<vmem>>, vector<1x1x256xf32>
    %240 = vector.shape_cast %239 : vector<1x1x256xf32> to vector<1x256xf32>
    %c1_140 = arith.constant 1 : index
    %c0_141 = arith.constant 0 : index
    %c0_142 = arith.constant 0 : index
    %241 = vector.load %arg21[%c1_140, %c0_141, %c0_142] : memref<3x256x64xbf16, #tpu.memory_space<vmem>>, vector<1x256x64xbf16>
    %242 = vector.shape_cast %241 : vector<1x256x64xbf16> to vector<256x64xbf16>
    %c1_143 = arith.constant 1 : index
    %c0_144 = arith.constant 0 : index
    %c0_145 = arith.constant 0 : index
    %243 = vector.load %arg22[%c1_143, %c0_144, %c0_145] : memref<3x1x64xf32, #tpu.memory_space<vmem>>, vector<1x1x64xf32>
    %244 = vector.shape_cast %243 : vector<1x1x64xf32> to vector<1x64xf32>
    %cst_146 = arith.constant dense<0.000000e+00> : vector<16xf32>
    %245 = vector.multi_reduction <add>, %212, %cst_146 [1] : vector<16x64xf32> to vector<16xf32>
    %246 = vector.shape_cast %245 : vector<16xf32> to vector<16x1xf32>
    %cst_147 = arith.constant 6.400000e+01 : f32
    %247 = vector.broadcast %cst_147 : f32 to vector<16x1xf32>
    %248 = arith.divf %246, %247 : vector<16x1xf32>
    %249 = vector.broadcast %248 : vector<16x1xf32> to vector<16x64xf32>
    %250 = arith.subf %212, %249 : vector<16x64xf32>
    %251 = arith.mulf %250, %250 : vector<16x64xf32>
    %cst_148 = arith.constant dense<0.000000e+00> : vector<16xf32>
    %252 = vector.multi_reduction <add>, %251, %cst_148 [1] : vector<16x64xf32> to vector<16xf32>
    %253 = vector.shape_cast %252 : vector<16xf32> to vector<16x1xf32>
    %cst_149 = arith.constant 6.400000e+01 : f32
    %254 = vector.broadcast %cst_149 : f32 to vector<16x1xf32>
    %255 = arith.divf %253, %254 : vector<16x1xf32>
    %256 = vector.broadcast %248 : vector<16x1xf32> to vector<16x64xf32>
    %257 = arith.subf %212, %256 : vector<16x64xf32>
    %cst_150 = arith.constant 9.99999974E-6 : f32
    %258 = vector.broadcast %cst_150 : f32 to vector<16x1xf32>
    %259 = arith.addf %255, %258 : vector<16x1xf32>
    %260 = math.rsqrt %259 : vector<16x1xf32>
    %261 = vector.broadcast %260 : vector<16x1xf32> to vector<16x64xf32>
    %262 = arith.mulf %257, %261 : vector<16x64xf32>
    %263 = vector.broadcast %214 : vector<1x64xf32> to vector<16x64xf32>
    %264 = arith.mulf %262, %263 : vector<16x64xf32>
    %265 = vector.broadcast %216 : vector<1x64xf32> to vector<16x64xf32>
    %266 = arith.addf %264, %265 : vector<16x64xf32>
    %267 = arith.truncf %266 : vector<16x64xf32> to vector<16x64xbf16>
    %cst_151 = arith.constant dense<0.000000e+00> : vector<16x64xf32>
    %268 = tpu.matmul %267, %218, %cst_151 {dimension_numbers = #tpu.dot_dimension_numbers<[1], [0], [0], [1], [0, 0, 1, 1], [], []>} : vector<16x64xbf16>, vector<64x64xbf16>, vector<16x64xf32> -> vector<16x64xf32>
    %269 = vector.broadcast %224 : vector<1x64xf32> to vector<16x64xf32>
    %270 = arith.addf %268, %269 : vector<16x64xf32>
    %cst_152 = arith.constant dense<0.000000e+00> : vector<16x64xf32>
    %271 = tpu.matmul %267, %220, %cst_152 {dimension_numbers = #tpu.dot_dimension_numbers<[1], [0], [0], [1], [0, 0, 1, 1], [], []>} : vector<16x64xbf16>, vector<64x64xbf16>, vector<16x64xf32> -> vector<16x64xf32>
    %272 = vector.broadcast %226 : vector<1x64xf32> to vector<16x64xf32>
    %273 = arith.addf %271, %272 : vector<16x64xf32>
    %cst_153 = arith.constant dense<0.000000e+00> : vector<16x64xf32>
    %274 = tpu.matmul %267, %222, %cst_153 {dimension_numbers = #tpu.dot_dimension_numbers<[1], [0], [0], [1], [0, 0, 1, 1], [], []>} : vector<16x64xbf16>, vector<64x64xbf16>, vector<16x64xf32> -> vector<16x64xf32>
    %275 = vector.broadcast %228 : vector<1x64xf32> to vector<16x64xf32>
    %276 = arith.addf %274, %275 : vector<16x64xf32>
    %277 = arith.mulf %270, %1 : vector<16x64xf32>
    %cst_154 = arith.constant dense<0.000000e+00> : vector<16x64xf32>
    %278 = tpu.matmul %270, %3, %cst_154 {dimension_numbers = #tpu.dot_dimension_numbers<[1], [0], [0], [1], [0, 0, 1, 1], [], []>} : vector<16x64xf32>, vector<64x64xf32>, vector<16x64xf32> -> vector<16x64xf32>
    %279 = arith.mulf %278, %2 : vector<16x64xf32>
    %280 = arith.addf %277, %279 : vector<16x64xf32>
    %281 = arith.mulf %273, %1 : vector<16x64xf32>
    %cst_155 = arith.constant dense<0.000000e+00> : vector<16x64xf32>
    %282 = tpu.matmul %273, %3, %cst_155 {dimension_numbers = #tpu.dot_dimension_numbers<[1], [0], [0], [1], [0, 0, 1, 1], [], []>} : vector<16x64xf32>, vector<64x64xf32>, vector<16x64xf32> -> vector<16x64xf32>
    %283 = arith.mulf %282, %2 : vector<16x64xf32>
    %284 = arith.addf %281, %283 : vector<16x64xf32>
    %cst_156 = arith.constant 2.500000e-01 : f32
    %285 = vector.broadcast %cst_156 : f32 to vector<16x64xf32>
    %286 = arith.mulf %280, %285 : vector<16x64xf32>
    %287 = arith.truncf %286 : vector<16x64xf32> to vector<16x64xbf16>
    %288 = arith.truncf %284 : vector<16x64xf32> to vector<16x64xbf16>
    %289 = arith.truncf %276 : vector<16x64xf32> to vector<16x64xbf16>
    %cst_157 = arith.constant 0.000000e+00 : f32
    %290 = vector.broadcast %cst_157 : f32 to vector<16x64xf32>
    %291 = vector.extract_strided_slice %5 {offsets = [0, 0, 0], sizes = [1, 1, 64], strides = [1, 1, 1]} : vector<4x1x64xbf16> to vector<1x1x64xbf16>
    %292 = vector.shape_cast %291 : vector<1x1x64xbf16> to vector<1x64xbf16>
    %293 = vector.broadcast %292 : vector<1x64xbf16> to vector<16x64xbf16>
    %294 = arith.mulf %287, %293 : vector<16x64xbf16>
    "tpu.trace_start"() <{level = 10 : i32, message = "nd,md->nm"}> : () -> ()
    %cst_158 = arith.constant dense<0.000000e+00> : vector<16x16xf32>
    %295 = tpu.matmul %294, %288, %cst_158 {dimension_numbers = #tpu.dot_dimension_numbers<[1], [1], [0], [0], [0, 0, 1, 0], [], []>} : vector<16x64xbf16>, vector<16x64xbf16>, vector<16x16xf32> -> vector<16x16xf32>
    "tpu.trace_stop"() : () -> ()
    %296 = arith.addf %295, %4 : vector<16x16xf32>
    %cst_159 = arith.constant dense<0xFF800000> : vector<16xf32>
    %297 = vector.multi_reduction <maximumf>, %296, %cst_159 [1] : vector<16x16xf32> to vector<16xf32>
    %298 = vector.shape_cast %297 : vector<16xf32> to vector<16x1xf32>
    %299 = vector.broadcast %298 : vector<16x1xf32> to vector<16x16xf32>
    %300 = arith.subf %296, %299 : vector<16x16xf32>
    %301 = math.exp %300 : vector<16x16xf32>
    %cst_160 = arith.constant dense<0.000000e+00> : vector<16xf32>
    %302 = vector.multi_reduction <add>, %301, %cst_160 [1] : vector<16x16xf32> to vector<16xf32>
    %303 = vector.shape_cast %302 : vector<16xf32> to vector<16x1xf32>
    %304 = vector.broadcast %303 : vector<16x1xf32> to vector<16x16xf32>
    %305 = arith.divf %301, %304 : vector<16x16xf32>
    %306 = arith.truncf %305 : vector<16x16xf32> to vector<16x16xbf16>
    %307 = vector.broadcast %292 : vector<1x64xbf16> to vector<16x64xbf16>
    %308 = arith.mulf %289, %307 : vector<16x64xbf16>
    "tpu.trace_start"() <{level = 10 : i32, message = "nm,md->nd"}> : () -> ()
    %cst_161 = arith.constant dense<0.000000e+00> : vector<16x64xf32>
    %309 = tpu.matmul %306, %308, %cst_161 {dimension_numbers = #tpu.dot_dimension_numbers<[1], [0], [0], [1], [0, 0, 1, 1], [], []>} : vector<16x16xbf16>, vector<16x64xbf16>, vector<16x64xf32> -> vector<16x64xf32>
    "tpu.trace_stop"() : () -> ()
    %310 = arith.addf %290, %309 : vector<16x64xf32>
    %311 = vector.extract_strided_slice %5 {offsets = [1, 0, 0], sizes = [1, 1, 64], strides = [1, 1, 1]} : vector<4x1x64xbf16> to vector<1x1x64xbf16>
    %312 = vector.shape_cast %311 : vector<1x1x64xbf16> to vector<1x64xbf16>
    %313 = vector.broadcast %312 : vector<1x64xbf16> to vector<16x64xbf16>
    %314 = arith.mulf %287, %313 : vector<16x64xbf16>
    "tpu.trace_start"() <{level = 10 : i32, message = "nd,md->nm"}> : () -> ()
    %cst_162 = arith.constant dense<0.000000e+00> : vector<16x16xf32>
    %315 = tpu.matmul %314, %288, %cst_162 {dimension_numbers = #tpu.dot_dimension_numbers<[1], [1], [0], [0], [0, 0, 1, 0], [], []>} : vector<16x64xbf16>, vector<16x64xbf16>, vector<16x16xf32> -> vector<16x16xf32>
    "tpu.trace_stop"() : () -> ()
    %316 = arith.addf %315, %4 : vector<16x16xf32>
    %cst_163 = arith.constant dense<0xFF800000> : vector<16xf32>
    %317 = vector.multi_reduction <maximumf>, %316, %cst_163 [1] : vector<16x16xf32> to vector<16xf32>
    %318 = vector.shape_cast %317 : vector<16xf32> to vector<16x1xf32>
    %319 = vector.broadcast %318 : vector<16x1xf32> to vector<16x16xf32>
    %320 = arith.subf %316, %319 : vector<16x16xf32>
    %321 = math.exp %320 : vector<16x16xf32>
    %cst_164 = arith.constant dense<0.000000e+00> : vector<16xf32>
    %322 = vector.multi_reduction <add>, %321, %cst_164 [1] : vector<16x16xf32> to vector<16xf32>
    %323 = vector.shape_cast %322 : vector<16xf32> to vector<16x1xf32>
    %324 = vector.broadcast %323 : vector<16x1xf32> to vector<16x16xf32>
    %325 = arith.divf %321, %324 : vector<16x16xf32>
    %326 = arith.truncf %325 : vector<16x16xf32> to vector<16x16xbf16>
    %327 = vector.broadcast %312 : vector<1x64xbf16> to vector<16x64xbf16>
    %328 = arith.mulf %289, %327 : vector<16x64xbf16>
    "tpu.trace_start"() <{level = 10 : i32, message = "nm,md->nd"}> : () -> ()
    %cst_165 = arith.constant dense<0.000000e+00> : vector<16x64xf32>
    %329 = tpu.matmul %326, %328, %cst_165 {dimension_numbers = #tpu.dot_dimension_numbers<[1], [0], [0], [1], [0, 0, 1, 1], [], []>} : vector<16x16xbf16>, vector<16x64xbf16>, vector<16x64xf32> -> vector<16x64xf32>
    "tpu.trace_stop"() : () -> ()
    %330 = arith.addf %310, %329 : vector<16x64xf32>
    %331 = vector.extract_strided_slice %5 {offsets = [2, 0, 0], sizes = [1, 1, 64], strides = [1, 1, 1]} : vector<4x1x64xbf16> to vector<1x1x64xbf16>
    %332 = vector.shape_cast %331 : vector<1x1x64xbf16> to vector<1x64xbf16>
    %333 = vector.broadcast %332 : vector<1x64xbf16> to vector<16x64xbf16>
    %334 = arith.mulf %287, %333 : vector<16x64xbf16>
    "tpu.trace_start"() <{level = 10 : i32, message = "nd,md->nm"}> : () -> ()
    %cst_166 = arith.constant dense<0.000000e+00> : vector<16x16xf32>
    %335 = tpu.matmul %334, %288, %cst_166 {dimension_numbers = #tpu.dot_dimension_numbers<[1], [1], [0], [0], [0, 0, 1, 0], [], []>} : vector<16x64xbf16>, vector<16x64xbf16>, vector<16x16xf32> -> vector<16x16xf32>
    "tpu.trace_stop"() : () -> ()
    %336 = arith.addf %335, %4 : vector<16x16xf32>
    %cst_167 = arith.constant dense<0xFF800000> : vector<16xf32>
    %337 = vector.multi_reduction <maximumf>, %336, %cst_167 [1] : vector<16x16xf32> to vector<16xf32>
    %338 = vector.shape_cast %337 : vector<16xf32> to vector<16x1xf32>
    %339 = vector.broadcast %338 : vector<16x1xf32> to vector<16x16xf32>
    %340 = arith.subf %336, %339 : vector<16x16xf32>
    %341 = math.exp %340 : vector<16x16xf32>
    %cst_168 = arith.constant dense<0.000000e+00> : vector<16xf32>
    %342 = vector.multi_reduction <add>, %341, %cst_168 [1] : vector<16x16xf32> to vector<16xf32>
    %343 = vector.shape_cast %342 : vector<16xf32> to vector<16x1xf32>
    %344 = vector.broadcast %343 : vector<16x1xf32> to vector<16x16xf32>
    %345 = arith.divf %341, %344 : vector<16x16xf32>
    %346 = arith.truncf %345 : vector<16x16xf32> to vector<16x16xbf16>
    %347 = vector.broadcast %332 : vector<1x64xbf16> to vector<16x64xbf16>
    %348 = arith.mulf %289, %347 : vector<16x64xbf16>
    "tpu.trace_start"() <{level = 10 : i32, message = "nm,md->nd"}> : () -> ()
    %cst_169 = arith.constant dense<0.000000e+00> : vector<16x64xf32>
    %349 = tpu.matmul %346, %348, %cst_169 {dimension_numbers = #tpu.dot_dimension_numbers<[1], [0], [0], [1], [0, 0, 1, 1], [], []>} : vector<16x16xbf16>, vector<16x64xbf16>, vector<16x64xf32> -> vector<16x64xf32>
    "tpu.trace_stop"() : () -> ()
    %350 = arith.addf %330, %349 : vector<16x64xf32>
    %351 = vector.extract_strided_slice %5 {offsets = [3, 0, 0], sizes = [1, 1, 64], strides = [1, 1, 1]} : vector<4x1x64xbf16> to vector<1x1x64xbf16>
    %352 = vector.shape_cast %351 : vector<1x1x64xbf16> to vector<1x64xbf16>
    %353 = vector.broadcast %352 : vector<1x64xbf16> to vector<16x64xbf16>
    %354 = arith.mulf %287, %353 : vector<16x64xbf16>
    "tpu.trace_start"() <{level = 10 : i32, message = "nd,md->nm"}> : () -> ()
    %cst_170 = arith.constant dense<0.000000e+00> : vector<16x16xf32>
    %355 = tpu.matmul %354, %288, %cst_170 {dimension_numbers = #tpu.dot_dimension_numbers<[1], [1], [0], [0], [0, 0, 1, 0], [], []>} : vector<16x64xbf16>, vector<16x64xbf16>, vector<16x16xf32> -> vector<16x16xf32>
    "tpu.trace_stop"() : () -> ()
    %356 = arith.addf %355, %4 : vector<16x16xf32>
    %cst_171 = arith.constant dense<0xFF800000> : vector<16xf32>
    %357 = vector.multi_reduction <maximumf>, %356, %cst_171 [1] : vector<16x16xf32> to vector<16xf32>
    %358 = vector.shape_cast %357 : vector<16xf32> to vector<16x1xf32>
    %359 = vector.broadcast %358 : vector<16x1xf32> to vector<16x16xf32>
    %360 = arith.subf %356, %359 : vector<16x16xf32>
    %361 = math.exp %360 : vector<16x16xf32>
    %cst_172 = arith.constant dense<0.000000e+00> : vector<16xf32>
    %362 = vector.multi_reduction <add>, %361, %cst_172 [1] : vector<16x16xf32> to vector<16xf32>
    %363 = vector.shape_cast %362 : vector<16xf32> to vector<16x1xf32>
    %364 = vector.broadcast %363 : vector<16x1xf32> to vector<16x16xf32>
    %365 = arith.divf %361, %364 : vector<16x16xf32>
    %366 = arith.truncf %365 : vector<16x16xf32> to vector<16x16xbf16>
    %367 = vector.broadcast %352 : vector<1x64xbf16> to vector<16x64xbf16>
    %368 = arith.mulf %289, %367 : vector<16x64xbf16>
    "tpu.trace_start"() <{level = 10 : i32, message = "nm,md->nd"}> : () -> ()
    %cst_173 = arith.constant dense<0.000000e+00> : vector<16x64xf32>
    %369 = tpu.matmul %366, %368, %cst_173 {dimension_numbers = #tpu.dot_dimension_numbers<[1], [0], [0], [1], [0, 0, 1, 1], [], []>} : vector<16x16xbf16>, vector<16x64xbf16>, vector<16x64xf32> -> vector<16x64xf32>
    "tpu.trace_stop"() : () -> ()
    %370 = arith.addf %350, %369 : vector<16x64xf32>
    %371 = arith.truncf %370 : vector<16x64xf32> to vector<16x64xbf16>
    %cst_174 = arith.constant dense<0.000000e+00> : vector<16x64xf32>
    %372 = tpu.matmul %371, %230, %cst_174 {dimension_numbers = #tpu.dot_dimension_numbers<[1], [0], [0], [1], [0, 0, 1, 1], [], []>} : vector<16x64xbf16>, vector<64x64xbf16>, vector<16x64xf32> -> vector<16x64xf32>
    %373 = vector.broadcast %232 : vector<1x64xf32> to vector<16x64xf32>
    %374 = arith.addf %372, %373 : vector<16x64xf32>
    %375 = arith.addf %212, %374 : vector<16x64xf32>
    %cst_175 = arith.constant dense<0.000000e+00> : vector<16xf32>
    %376 = vector.multi_reduction <add>, %375, %cst_175 [1] : vector<16x64xf32> to vector<16xf32>
    %377 = vector.shape_cast %376 : vector<16xf32> to vector<16x1xf32>
    %cst_176 = arith.constant 6.400000e+01 : f32
    %378 = vector.broadcast %cst_176 : f32 to vector<16x1xf32>
    %379 = arith.divf %377, %378 : vector<16x1xf32>
    %380 = vector.broadcast %379 : vector<16x1xf32> to vector<16x64xf32>
    %381 = arith.subf %375, %380 : vector<16x64xf32>
    %382 = arith.mulf %381, %381 : vector<16x64xf32>
    %cst_177 = arith.constant dense<0.000000e+00> : vector<16xf32>
    %383 = vector.multi_reduction <add>, %382, %cst_177 [1] : vector<16x64xf32> to vector<16xf32>
    %384 = vector.shape_cast %383 : vector<16xf32> to vector<16x1xf32>
    %cst_178 = arith.constant 6.400000e+01 : f32
    %385 = vector.broadcast %cst_178 : f32 to vector<16x1xf32>
    %386 = arith.divf %384, %385 : vector<16x1xf32>
    %387 = vector.broadcast %379 : vector<16x1xf32> to vector<16x64xf32>
    %388 = arith.subf %375, %387 : vector<16x64xf32>
    %cst_179 = arith.constant 9.99999974E-6 : f32
    %389 = vector.broadcast %cst_179 : f32 to vector<16x1xf32>
    %390 = arith.addf %386, %389 : vector<16x1xf32>
    %391 = math.rsqrt %390 : vector<16x1xf32>
    %392 = vector.broadcast %391 : vector<16x1xf32> to vector<16x64xf32>
    %393 = arith.mulf %388, %392 : vector<16x64xf32>
    %394 = vector.broadcast %234 : vector<1x64xf32> to vector<16x64xf32>
    %395 = arith.mulf %393, %394 : vector<16x64xf32>
    %396 = vector.broadcast %236 : vector<1x64xf32> to vector<16x64xf32>
    %397 = arith.addf %395, %396 : vector<16x64xf32>
    %398 = arith.truncf %397 : vector<16x64xf32> to vector<16x64xbf16>
    %cst_180 = arith.constant dense<0.000000e+00> : vector<16x256xf32>
    %399 = tpu.matmul %398, %238, %cst_180 {dimension_numbers = #tpu.dot_dimension_numbers<[1], [0], [0], [1], [0, 0, 1, 1], [], []>} : vector<16x64xbf16>, vector<64x256xbf16>, vector<16x256xf32> -> vector<16x256xf32>
    %400 = vector.broadcast %240 : vector<1x256xf32> to vector<16x256xf32>
    %401 = arith.addf %399, %400 : vector<16x256xf32>
    %402 = arith.mulf %401, %401 : vector<16x256xf32>
    %403 = arith.mulf %401, %402 : vector<16x256xf32>
    %cst_181 = arith.constant 4.471500e-02 : f32
    %404 = vector.broadcast %cst_181 : f32 to vector<16x256xf32>
    %405 = arith.mulf %404, %403 : vector<16x256xf32>
    %406 = arith.addf %401, %405 : vector<16x256xf32>
    %cst_182 = arith.constant 0.797884583 : f32
    %407 = vector.broadcast %cst_182 : f32 to vector<16x256xf32>
    %408 = arith.mulf %407, %406 : vector<16x256xf32>
    %409 = math.tanh %408 : vector<16x256xf32>
    %cst_183 = arith.constant 1.000000e+00 : f32
    %410 = vector.broadcast %cst_183 : f32 to vector<16x256xf32>
    %411 = arith.addf %410, %409 : vector<16x256xf32>
    %cst_184 = arith.constant 5.000000e-01 : f32
    %412 = vector.broadcast %cst_184 : f32 to vector<16x256xf32>
    %413 = arith.mulf %412, %411 : vector<16x256xf32>
    %414 = arith.mulf %401, %413 : vector<16x256xf32>
    %415 = arith.truncf %414 : vector<16x256xf32> to vector<16x256xbf16>
    %cst_185 = arith.constant dense<0.000000e+00> : vector<16x64xf32>
    %416 = tpu.matmul %415, %242, %cst_185 {dimension_numbers = #tpu.dot_dimension_numbers<[1], [0], [0], [1], [0, 0, 1, 1], [], []>} : vector<16x256xbf16>, vector<256x64xbf16>, vector<16x64xf32> -> vector<16x64xf32>
    %417 = vector.broadcast %244 : vector<1x64xf32> to vector<16x64xf32>
    %418 = arith.addf %416, %417 : vector<16x64xf32>
    %419 = arith.addf %375, %418 : vector<16x64xf32>
    %c2 = arith.constant 2 : index
    %c0_186 = arith.constant 0 : index
    %c0_187 = arith.constant 0 : index
    %420 = vector.load %arg7[%c2, %c0_186, %c0_187] : memref<3x1x64xf32, #tpu.memory_space<vmem>>, vector<1x1x64xf32>
    %421 = vector.shape_cast %420 : vector<1x1x64xf32> to vector<1x64xf32>
    %c2_188 = arith.constant 2 : index
    %c0_189 = arith.constant 0 : index
    %c0_190 = arith.constant 0 : index
    %422 = vector.load %arg8[%c2_188, %c0_189, %c0_190] : memref<3x1x64xf32, #tpu.memory_space<vmem>>, vector<1x1x64xf32>
    %423 = vector.shape_cast %422 : vector<1x1x64xf32> to vector<1x64xf32>
    %c2_191 = arith.constant 2 : index
    %c0_192 = arith.constant 0 : index
    %c0_193 = arith.constant 0 : index
    %424 = vector.load %arg9[%c2_191, %c0_192, %c0_193] : memref<3x64x64xbf16, #tpu.memory_space<vmem>>, vector<1x64x64xbf16>
    %425 = vector.shape_cast %424 : vector<1x64x64xbf16> to vector<64x64xbf16>
    %c2_194 = arith.constant 2 : index
    %c0_195 = arith.constant 0 : index
    %c0_196 = arith.constant 0 : index
    %426 = vector.load %arg10[%c2_194, %c0_195, %c0_196] : memref<3x64x64xbf16, #tpu.memory_space<vmem>>, vector<1x64x64xbf16>
    %427 = vector.shape_cast %426 : vector<1x64x64xbf16> to vector<64x64xbf16>
    %c2_197 = arith.constant 2 : index
    %c0_198 = arith.constant 0 : index
    %c0_199 = arith.constant 0 : index
    %428 = vector.load %arg11[%c2_197, %c0_198, %c0_199] : memref<3x64x64xbf16, #tpu.memory_space<vmem>>, vector<1x64x64xbf16>
    %429 = vector.shape_cast %428 : vector<1x64x64xbf16> to vector<64x64xbf16>
    %c2_200 = arith.constant 2 : index
    %c0_201 = arith.constant 0 : index
    %c0_202 = arith.constant 0 : index
    %430 = vector.load %arg12[%c2_200, %c0_201, %c0_202] : memref<3x1x64xf32, #tpu.memory_space<vmem>>, vector<1x1x64xf32>
    %431 = vector.shape_cast %430 : vector<1x1x64xf32> to vector<1x64xf32>
    %c2_203 = arith.constant 2 : index
    %c0_204 = arith.constant 0 : index
    %c0_205 = arith.constant 0 : index
    %432 = vector.load %arg13[%c2_203, %c0_204, %c0_205] : memref<3x1x64xf32, #tpu.memory_space<vmem>>, vector<1x1x64xf32>
    %433 = vector.shape_cast %432 : vector<1x1x64xf32> to vector<1x64xf32>
    %c2_206 = arith.constant 2 : index
    %c0_207 = arith.constant 0 : index
    %c0_208 = arith.constant 0 : index
    %434 = vector.load %arg14[%c2_206, %c0_207, %c0_208] : memref<3x1x64xf32, #tpu.memory_space<vmem>>, vector<1x1x64xf32>
    %435 = vector.shape_cast %434 : vector<1x1x64xf32> to vector<1x64xf32>
    %c2_209 = arith.constant 2 : index
    %c0_210 = arith.constant 0 : index
    %c0_211 = arith.constant 0 : index
    %436 = vector.load %arg15[%c2_209, %c0_210, %c0_211] : memref<3x64x64xbf16, #tpu.memory_space<vmem>>, vector<1x64x64xbf16>
    %437 = vector.shape_cast %436 : vector<1x64x64xbf16> to vector<64x64xbf16>
    %c2_212 = arith.constant 2 : index
    %c0_213 = arith.constant 0 : index
    %c0_214 = arith.constant 0 : index
    %438 = vector.load %arg16[%c2_212, %c0_213, %c0_214] : memref<3x1x64xf32, #tpu.memory_space<vmem>>, vector<1x1x64xf32>
    %439 = vector.shape_cast %438 : vector<1x1x64xf32> to vector<1x64xf32>
    %c2_215 = arith.constant 2 : index
    %c0_216 = arith.constant 0 : index
    %c0_217 = arith.constant 0 : index
    %440 = vector.load %arg17[%c2_215, %c0_216, %c0_217] : memref<3x1x64xf32, #tpu.memory_space<vmem>>, vector<1x1x64xf32>
    %441 = vector.shape_cast %440 : vector<1x1x64xf32> to vector<1x64xf32>
    %c2_218 = arith.constant 2 : index
    %c0_219 = arith.constant 0 : index
    %c0_220 = arith.constant 0 : index
    %442 = vector.load %arg18[%c2_218, %c0_219, %c0_220] : memref<3x1x64xf32, #tpu.memory_space<vmem>>, vector<1x1x64xf32>
    %443 = vector.shape_cast %442 : vector<1x1x64xf32> to vector<1x64xf32>
    %c2_221 = arith.constant 2 : index
    %c0_222 = arith.constant 0 : index
    %c0_223 = arith.constant 0 : index
    %444 = vector.load %arg19[%c2_221, %c0_222, %c0_223] : memref<3x64x256xbf16, #tpu.memory_space<vmem>>, vector<1x64x256xbf16>
    %445 = vector.shape_cast %444 : vector<1x64x256xbf16> to vector<64x256xbf16>
    %c2_224 = arith.constant 2 : index
    %c0_225 = arith.constant 0 : index
    %c0_226 = arith.constant 0 : index
    %446 = vector.load %arg20[%c2_224, %c0_225, %c0_226] : memref<3x1x256xf32, #tpu.memory_space<vmem>>, vector<1x1x256xf32>
    %447 = vector.shape_cast %446 : vector<1x1x256xf32> to vector<1x256xf32>
    %c2_227 = arith.constant 2 : index
    %c0_228 = arith.constant 0 : index
    %c0_229 = arith.constant 0 : index
    %448 = vector.load %arg21[%c2_227, %c0_228, %c0_229] : memref<3x256x64xbf16, #tpu.memory_space<vmem>>, vector<1x256x64xbf16>
    %449 = vector.shape_cast %448 : vector<1x256x64xbf16> to vector<256x64xbf16>
    %c2_230 = arith.constant 2 : index
    %c0_231 = arith.constant 0 : index
    %c0_232 = arith.constant 0 : index
    %450 = vector.load %arg22[%c2_230, %c0_231, %c0_232] : memref<3x1x64xf32, #tpu.memory_space<vmem>>, vector<1x1x64xf32>
    %451 = vector.shape_cast %450 : vector<1x1x64xf32> to vector<1x64xf32>
    %cst_233 = arith.constant dense<0.000000e+00> : vector<16xf32>
    %452 = vector.multi_reduction <add>, %419, %cst_233 [1] : vector<16x64xf32> to vector<16xf32>
    %453 = vector.shape_cast %452 : vector<16xf32> to vector<16x1xf32>
    %cst_234 = arith.constant 6.400000e+01 : f32
    %454 = vector.broadcast %cst_234 : f32 to vector<16x1xf32>
    %455 = arith.divf %453, %454 : vector<16x1xf32>
    %456 = vector.broadcast %455 : vector<16x1xf32> to vector<16x64xf32>
    %457 = arith.subf %419, %456 : vector<16x64xf32>
    %458 = arith.mulf %457, %457 : vector<16x64xf32>
    %cst_235 = arith.constant dense<0.000000e+00> : vector<16xf32>
    %459 = vector.multi_reduction <add>, %458, %cst_235 [1] : vector<16x64xf32> to vector<16xf32>
    %460 = vector.shape_cast %459 : vector<16xf32> to vector<16x1xf32>
    %cst_236 = arith.constant 6.400000e+01 : f32
    %461 = vector.broadcast %cst_236 : f32 to vector<16x1xf32>
    %462 = arith.divf %460, %461 : vector<16x1xf32>
    %463 = vector.broadcast %455 : vector<16x1xf32> to vector<16x64xf32>
    %464 = arith.subf %419, %463 : vector<16x64xf32>
    %cst_237 = arith.constant 9.99999974E-6 : f32
    %465 = vector.broadcast %cst_237 : f32 to vector<16x1xf32>
    %466 = arith.addf %462, %465 : vector<16x1xf32>
    %467 = math.rsqrt %466 : vector<16x1xf32>
    %468 = vector.broadcast %467 : vector<16x1xf32> to vector<16x64xf32>
    %469 = arith.mulf %464, %468 : vector<16x64xf32>
    %470 = vector.broadcast %421 : vector<1x64xf32> to vector<16x64xf32>
    %471 = arith.mulf %469, %470 : vector<16x64xf32>
    %472 = vector.broadcast %423 : vector<1x64xf32> to vector<16x64xf32>
    %473 = arith.addf %471, %472 : vector<16x64xf32>
    %474 = arith.truncf %473 : vector<16x64xf32> to vector<16x64xbf16>
    %cst_238 = arith.constant dense<0.000000e+00> : vector<16x64xf32>
    %475 = tpu.matmul %474, %425, %cst_238 {dimension_numbers = #tpu.dot_dimension_numbers<[1], [0], [0], [1], [0, 0, 1, 1], [], []>} : vector<16x64xbf16>, vector<64x64xbf16>, vector<16x64xf32> -> vector<16x64xf32>
    %476 = vector.broadcast %431 : vector<1x64xf32> to vector<16x64xf32>
    %477 = arith.addf %475, %476 : vector<16x64xf32>
    %cst_239 = arith.constant dense<0.000000e+00> : vector<16x64xf32>
    %478 = tpu.matmul %474, %427, %cst_239 {dimension_numbers = #tpu.dot_dimension_numbers<[1], [0], [0], [1], [0, 0, 1, 1], [], []>} : vector<16x64xbf16>, vector<64x64xbf16>, vector<16x64xf32> -> vector<16x64xf32>
    %479 = vector.broadcast %433 : vector<1x64xf32> to vector<16x64xf32>
    %480 = arith.addf %478, %479 : vector<16x64xf32>
    %cst_240 = arith.constant dense<0.000000e+00> : vector<16x64xf32>
    %481 = tpu.matmul %474, %429, %cst_240 {dimension_numbers = #tpu.dot_dimension_numbers<[1], [0], [0], [1], [0, 0, 1, 1], [], []>} : vector<16x64xbf16>, vector<64x64xbf16>, vector<16x64xf32> -> vector<16x64xf32>
    %482 = vector.broadcast %435 : vector<1x64xf32> to vector<16x64xf32>
    %483 = arith.addf %481, %482 : vector<16x64xf32>
    %484 = arith.mulf %477, %1 : vector<16x64xf32>
    %cst_241 = arith.constant dense<0.000000e+00> : vector<16x64xf32>
    %485 = tpu.matmul %477, %3, %cst_241 {dimension_numbers = #tpu.dot_dimension_numbers<[1], [0], [0], [1], [0, 0, 1, 1], [], []>} : vector<16x64xf32>, vector<64x64xf32>, vector<16x64xf32> -> vector<16x64xf32>
    %486 = arith.mulf %485, %2 : vector<16x64xf32>
    %487 = arith.addf %484, %486 : vector<16x64xf32>
    %488 = arith.mulf %480, %1 : vector<16x64xf32>
    %cst_242 = arith.constant dense<0.000000e+00> : vector<16x64xf32>
    %489 = tpu.matmul %480, %3, %cst_242 {dimension_numbers = #tpu.dot_dimension_numbers<[1], [0], [0], [1], [0, 0, 1, 1], [], []>} : vector<16x64xf32>, vector<64x64xf32>, vector<16x64xf32> -> vector<16x64xf32>
    %490 = arith.mulf %489, %2 : vector<16x64xf32>
    %491 = arith.addf %488, %490 : vector<16x64xf32>
    %cst_243 = arith.constant 2.500000e-01 : f32
    %492 = vector.broadcast %cst_243 : f32 to vector<16x64xf32>
    %493 = arith.mulf %487, %492 : vector<16x64xf32>
    %494 = arith.truncf %493 : vector<16x64xf32> to vector<16x64xbf16>
    %495 = arith.truncf %491 : vector<16x64xf32> to vector<16x64xbf16>
    %496 = arith.truncf %483 : vector<16x64xf32> to vector<16x64xbf16>
    %cst_244 = arith.constant 0.000000e+00 : f32
    %497 = vector.broadcast %cst_244 : f32 to vector<16x64xf32>
    %498 = vector.extract_strided_slice %5 {offsets = [0, 0, 0], sizes = [1, 1, 64], strides = [1, 1, 1]} : vector<4x1x64xbf16> to vector<1x1x64xbf16>
    %499 = vector.shape_cast %498 : vector<1x1x64xbf16> to vector<1x64xbf16>
    %500 = vector.broadcast %499 : vector<1x64xbf16> to vector<16x64xbf16>
    %501 = arith.mulf %494, %500 : vector<16x64xbf16>
    "tpu.trace_start"() <{level = 10 : i32, message = "nd,md->nm"}> : () -> ()
    %cst_245 = arith.constant dense<0.000000e+00> : vector<16x16xf32>
    %502 = tpu.matmul %501, %495, %cst_245 {dimension_numbers = #tpu.dot_dimension_numbers<[1], [1], [0], [0], [0, 0, 1, 0], [], []>} : vector<16x64xbf16>, vector<16x64xbf16>, vector<16x16xf32> -> vector<16x16xf32>
    "tpu.trace_stop"() : () -> ()
    %503 = arith.addf %502, %4 : vector<16x16xf32>
    %cst_246 = arith.constant dense<0xFF800000> : vector<16xf32>
    %504 = vector.multi_reduction <maximumf>, %503, %cst_246 [1] : vector<16x16xf32> to vector<16xf32>
    %505 = vector.shape_cast %504 : vector<16xf32> to vector<16x1xf32>
    %506 = vector.broadcast %505 : vector<16x1xf32> to vector<16x16xf32>
    %507 = arith.subf %503, %506 : vector<16x16xf32>
    %508 = math.exp %507 : vector<16x16xf32>
    %cst_247 = arith.constant dense<0.000000e+00> : vector<16xf32>
    %509 = vector.multi_reduction <add>, %508, %cst_247 [1] : vector<16x16xf32> to vector<16xf32>
    %510 = vector.shape_cast %509 : vector<16xf32> to vector<16x1xf32>
    %511 = vector.broadcast %510 : vector<16x1xf32> to vector<16x16xf32>
    %512 = arith.divf %508, %511 : vector<16x16xf32>
    %513 = arith.truncf %512 : vector<16x16xf32> to vector<16x16xbf16>
    %514 = vector.broadcast %499 : vector<1x64xbf16> to vector<16x64xbf16>
    %515 = arith.mulf %496, %514 : vector<16x64xbf16>
    "tpu.trace_start"() <{level = 10 : i32, message = "nm,md->nd"}> : () -> ()
    %cst_248 = arith.constant dense<0.000000e+00> : vector<16x64xf32>
    %516 = tpu.matmul %513, %515, %cst_248 {dimension_numbers = #tpu.dot_dimension_numbers<[1], [0], [0], [1], [0, 0, 1, 1], [], []>} : vector<16x16xbf16>, vector<16x64xbf16>, vector<16x64xf32> -> vector<16x64xf32>
    "tpu.trace_stop"() : () -> ()
    %517 = arith.addf %497, %516 : vector<16x64xf32>
    %518 = vector.extract_strided_slice %5 {offsets = [1, 0, 0], sizes = [1, 1, 64], strides = [1, 1, 1]} : vector<4x1x64xbf16> to vector<1x1x64xbf16>
    %519 = vector.shape_cast %518 : vector<1x1x64xbf16> to vector<1x64xbf16>
    %520 = vector.broadcast %519 : vector<1x64xbf16> to vector<16x64xbf16>
    %521 = arith.mulf %494, %520 : vector<16x64xbf16>
    "tpu.trace_start"() <{level = 10 : i32, message = "nd,md->nm"}> : () -> ()
    %cst_249 = arith.constant dense<0.000000e+00> : vector<16x16xf32>
    %522 = tpu.matmul %521, %495, %cst_249 {dimension_numbers = #tpu.dot_dimension_numbers<[1], [1], [0], [0], [0, 0, 1, 0], [], []>} : vector<16x64xbf16>, vector<16x64xbf16>, vector<16x16xf32> -> vector<16x16xf32>
    "tpu.trace_stop"() : () -> ()
    %523 = arith.addf %522, %4 : vector<16x16xf32>
    %cst_250 = arith.constant dense<0xFF800000> : vector<16xf32>
    %524 = vector.multi_reduction <maximumf>, %523, %cst_250 [1] : vector<16x16xf32> to vector<16xf32>
    %525 = vector.shape_cast %524 : vector<16xf32> to vector<16x1xf32>
    %526 = vector.broadcast %525 : vector<16x1xf32> to vector<16x16xf32>
    %527 = arith.subf %523, %526 : vector<16x16xf32>
    %528 = math.exp %527 : vector<16x16xf32>
    %cst_251 = arith.constant dense<0.000000e+00> : vector<16xf32>
    %529 = vector.multi_reduction <add>, %528, %cst_251 [1] : vector<16x16xf32> to vector<16xf32>
    %530 = vector.shape_cast %529 : vector<16xf32> to vector<16x1xf32>
    %531 = vector.broadcast %530 : vector<16x1xf32> to vector<16x16xf32>
    %532 = arith.divf %528, %531 : vector<16x16xf32>
    %533 = arith.truncf %532 : vector<16x16xf32> to vector<16x16xbf16>
    %534 = vector.broadcast %519 : vector<1x64xbf16> to vector<16x64xbf16>
    %535 = arith.mulf %496, %534 : vector<16x64xbf16>
    "tpu.trace_start"() <{level = 10 : i32, message = "nm,md->nd"}> : () -> ()
    %cst_252 = arith.constant dense<0.000000e+00> : vector<16x64xf32>
    %536 = tpu.matmul %533, %535, %cst_252 {dimension_numbers = #tpu.dot_dimension_numbers<[1], [0], [0], [1], [0, 0, 1, 1], [], []>} : vector<16x16xbf16>, vector<16x64xbf16>, vector<16x64xf32> -> vector<16x64xf32>
    "tpu.trace_stop"() : () -> ()
    %537 = arith.addf %517, %536 : vector<16x64xf32>
    %538 = vector.extract_strided_slice %5 {offsets = [2, 0, 0], sizes = [1, 1, 64], strides = [1, 1, 1]} : vector<4x1x64xbf16> to vector<1x1x64xbf16>
    %539 = vector.shape_cast %538 : vector<1x1x64xbf16> to vector<1x64xbf16>
    %540 = vector.broadcast %539 : vector<1x64xbf16> to vector<16x64xbf16>
    %541 = arith.mulf %494, %540 : vector<16x64xbf16>
    "tpu.trace_start"() <{level = 10 : i32, message = "nd,md->nm"}> : () -> ()
    %cst_253 = arith.constant dense<0.000000e+00> : vector<16x16xf32>
    %542 = tpu.matmul %541, %495, %cst_253 {dimension_numbers = #tpu.dot_dimension_numbers<[1], [1], [0], [0], [0, 0, 1, 0], [], []>} : vector<16x64xbf16>, vector<16x64xbf16>, vector<16x16xf32> -> vector<16x16xf32>
    "tpu.trace_stop"() : () -> ()
    %543 = arith.addf %542, %4 : vector<16x16xf32>
    %cst_254 = arith.constant dense<0xFF800000> : vector<16xf32>
    %544 = vector.multi_reduction <maximumf>, %543, %cst_254 [1] : vector<16x16xf32> to vector<16xf32>
    %545 = vector.shape_cast %544 : vector<16xf32> to vector<16x1xf32>
    %546 = vector.broadcast %545 : vector<16x1xf32> to vector<16x16xf32>
    %547 = arith.subf %543, %546 : vector<16x16xf32>
    %548 = math.exp %547 : vector<16x16xf32>
    %cst_255 = arith.constant dense<0.000000e+00> : vector<16xf32>
    %549 = vector.multi_reduction <add>, %548, %cst_255 [1] : vector<16x16xf32> to vector<16xf32>
    %550 = vector.shape_cast %549 : vector<16xf32> to vector<16x1xf32>
    %551 = vector.broadcast %550 : vector<16x1xf32> to vector<16x16xf32>
    %552 = arith.divf %548, %551 : vector<16x16xf32>
    %553 = arith.truncf %552 : vector<16x16xf32> to vector<16x16xbf16>
    %554 = vector.broadcast %539 : vector<1x64xbf16> to vector<16x64xbf16>
    %555 = arith.mulf %496, %554 : vector<16x64xbf16>
    "tpu.trace_start"() <{level = 10 : i32, message = "nm,md->nd"}> : () -> ()
    %cst_256 = arith.constant dense<0.000000e+00> : vector<16x64xf32>
    %556 = tpu.matmul %553, %555, %cst_256 {dimension_numbers = #tpu.dot_dimension_numbers<[1], [0], [0], [1], [0, 0, 1, 1], [], []>} : vector<16x16xbf16>, vector<16x64xbf16>, vector<16x64xf32> -> vector<16x64xf32>
    "tpu.trace_stop"() : () -> ()
    %557 = arith.addf %537, %556 : vector<16x64xf32>
    %558 = vector.extract_strided_slice %5 {offsets = [3, 0, 0], sizes = [1, 1, 64], strides = [1, 1, 1]} : vector<4x1x64xbf16> to vector<1x1x64xbf16>
    %559 = vector.shape_cast %558 : vector<1x1x64xbf16> to vector<1x64xbf16>
    %560 = vector.broadcast %559 : vector<1x64xbf16> to vector<16x64xbf16>
    %561 = arith.mulf %494, %560 : vector<16x64xbf16>
    "tpu.trace_start"() <{level = 10 : i32, message = "nd,md->nm"}> : () -> ()
    %cst_257 = arith.constant dense<0.000000e+00> : vector<16x16xf32>
    %562 = tpu.matmul %561, %495, %cst_257 {dimension_numbers = #tpu.dot_dimension_numbers<[1], [1], [0], [0], [0, 0, 1, 0], [], []>} : vector<16x64xbf16>, vector<16x64xbf16>, vector<16x16xf32> -> vector<16x16xf32>
    "tpu.trace_stop"() : () -> ()
    %563 = arith.addf %562, %4 : vector<16x16xf32>
    %cst_258 = arith.constant dense<0xFF800000> : vector<16xf32>
    %564 = vector.multi_reduction <maximumf>, %563, %cst_258 [1] : vector<16x16xf32> to vector<16xf32>
    %565 = vector.shape_cast %564 : vector<16xf32> to vector<16x1xf32>
    %566 = vector.broadcast %565 : vector<16x1xf32> to vector<16x16xf32>
    %567 = arith.subf %563, %566 : vector<16x16xf32>
    %568 = math.exp %567 : vector<16x16xf32>
    %cst_259 = arith.constant dense<0.000000e+00> : vector<16xf32>
    %569 = vector.multi_reduction <add>, %568, %cst_259 [1] : vector<16x16xf32> to vector<16xf32>
    %570 = vector.shape_cast %569 : vector<16xf32> to vector<16x1xf32>
    %571 = vector.broadcast %570 : vector<16x1xf32> to vector<16x16xf32>
    %572 = arith.divf %568, %571 : vector<16x16xf32>
    %573 = arith.truncf %572 : vector<16x16xf32> to vector<16x16xbf16>
    %574 = vector.broadcast %559 : vector<1x64xbf16> to vector<16x64xbf16>
    %575 = arith.mulf %496, %574 : vector<16x64xbf16>
    "tpu.trace_start"() <{level = 10 : i32, message = "nm,md->nd"}> : () -> ()
    %cst_260 = arith.constant dense<0.000000e+00> : vector<16x64xf32>
    %576 = tpu.matmul %573, %575, %cst_260 {dimension_numbers = #tpu.dot_dimension_numbers<[1], [0], [0], [1], [0, 0, 1, 1], [], []>} : vector<16x16xbf16>, vector<16x64xbf16>, vector<16x64xf32> -> vector<16x64xf32>
    "tpu.trace_stop"() : () -> ()
    %577 = arith.addf %557, %576 : vector<16x64xf32>
    %578 = arith.truncf %577 : vector<16x64xf32> to vector<16x64xbf16>
    %cst_261 = arith.constant dense<0.000000e+00> : vector<16x64xf32>
    %579 = tpu.matmul %578, %437, %cst_261 {dimension_numbers = #tpu.dot_dimension_numbers<[1], [0], [0], [1], [0, 0, 1, 1], [], []>} : vector<16x64xbf16>, vector<64x64xbf16>, vector<16x64xf32> -> vector<16x64xf32>
    %580 = vector.broadcast %439 : vector<1x64xf32> to vector<16x64xf32>
    %581 = arith.addf %579, %580 : vector<16x64xf32>
    %582 = arith.addf %419, %581 : vector<16x64xf32>
    %cst_262 = arith.constant dense<0.000000e+00> : vector<16xf32>
    %583 = vector.multi_reduction <add>, %582, %cst_262 [1] : vector<16x64xf32> to vector<16xf32>
    %584 = vector.shape_cast %583 : vector<16xf32> to vector<16x1xf32>
    %cst_263 = arith.constant 6.400000e+01 : f32
    %585 = vector.broadcast %cst_263 : f32 to vector<16x1xf32>
    %586 = arith.divf %584, %585 : vector<16x1xf32>
    %587 = vector.broadcast %586 : vector<16x1xf32> to vector<16x64xf32>
    %588 = arith.subf %582, %587 : vector<16x64xf32>
    %589 = arith.mulf %588, %588 : vector<16x64xf32>
    %cst_264 = arith.constant dense<0.000000e+00> : vector<16xf32>
    %590 = vector.multi_reduction <add>, %589, %cst_264 [1] : vector<16x64xf32> to vector<16xf32>
    %591 = vector.shape_cast %590 : vector<16xf32> to vector<16x1xf32>
    %cst_265 = arith.constant 6.400000e+01 : f32
    %592 = vector.broadcast %cst_265 : f32 to vector<16x1xf32>
    %593 = arith.divf %591, %592 : vector<16x1xf32>
    %594 = vector.broadcast %586 : vector<16x1xf32> to vector<16x64xf32>
    %595 = arith.subf %582, %594 : vector<16x64xf32>
    %cst_266 = arith.constant 9.99999974E-6 : f32
    %596 = vector.broadcast %cst_266 : f32 to vector<16x1xf32>
    %597 = arith.addf %593, %596 : vector<16x1xf32>
    %598 = math.rsqrt %597 : vector<16x1xf32>
    %599 = vector.broadcast %598 : vector<16x1xf32> to vector<16x64xf32>
    %600 = arith.mulf %595, %599 : vector<16x64xf32>
    %601 = vector.broadcast %441 : vector<1x64xf32> to vector<16x64xf32>
    %602 = arith.mulf %600, %601 : vector<16x64xf32>
    %603 = vector.broadcast %443 : vector<1x64xf32> to vector<16x64xf32>
    %604 = arith.addf %602, %603 : vector<16x64xf32>
    %605 = arith.truncf %604 : vector<16x64xf32> to vector<16x64xbf16>
    %cst_267 = arith.constant dense<0.000000e+00> : vector<16x256xf32>
    %606 = tpu.matmul %605, %445, %cst_267 {dimension_numbers = #tpu.dot_dimension_numbers<[1], [0], [0], [1], [0, 0, 1, 1], [], []>} : vector<16x64xbf16>, vector<64x256xbf16>, vector<16x256xf32> -> vector<16x256xf32>
    %607 = vector.broadcast %447 : vector<1x256xf32> to vector<16x256xf32>
    %608 = arith.addf %606, %607 : vector<16x256xf32>
    %609 = arith.mulf %608, %608 : vector<16x256xf32>
    %610 = arith.mulf %608, %609 : vector<16x256xf32>
    %cst_268 = arith.constant 4.471500e-02 : f32
    %611 = vector.broadcast %cst_268 : f32 to vector<16x256xf32>
    %612 = arith.mulf %611, %610 : vector<16x256xf32>
    %613 = arith.addf %608, %612 : vector<16x256xf32>
    %cst_269 = arith.constant 0.797884583 : f32
    %614 = vector.broadcast %cst_269 : f32 to vector<16x256xf32>
    %615 = arith.mulf %614, %613 : vector<16x256xf32>
    %616 = math.tanh %615 : vector<16x256xf32>
    %cst_270 = arith.constant 1.000000e+00 : f32
    %617 = vector.broadcast %cst_270 : f32 to vector<16x256xf32>
    %618 = arith.addf %617, %616 : vector<16x256xf32>
    %cst_271 = arith.constant 5.000000e-01 : f32
    %619 = vector.broadcast %cst_271 : f32 to vector<16x256xf32>
    %620 = arith.mulf %619, %618 : vector<16x256xf32>
    %621 = arith.mulf %608, %620 : vector<16x256xf32>
    %622 = arith.truncf %621 : vector<16x256xf32> to vector<16x256xbf16>
    %cst_272 = arith.constant dense<0.000000e+00> : vector<16x64xf32>
    %623 = tpu.matmul %622, %449, %cst_272 {dimension_numbers = #tpu.dot_dimension_numbers<[1], [0], [0], [1], [0, 0, 1, 1], [], []>} : vector<16x256xbf16>, vector<256x64xbf16>, vector<16x64xf32> -> vector<16x64xf32>
    %624 = vector.broadcast %451 : vector<1x64xf32> to vector<16x64xf32>
    %625 = arith.addf %623, %624 : vector<16x64xf32>
    %626 = arith.addf %582, %625 : vector<16x64xf32>
    %c0_273 = arith.constant 0 : index
    %c0_274 = arith.constant 0 : index
    %627 = vector.load %arg23[%c0_273, %c0_274] : memref<1x64xf32, #tpu.memory_space<vmem>>, vector<1x64xf32>
    %c0_275 = arith.constant 0 : index
    %c0_276 = arith.constant 0 : index
    %628 = vector.load %arg24[%c0_275, %c0_276] : memref<1x64xf32, #tpu.memory_space<vmem>>, vector<1x64xf32>
    %cst_277 = arith.constant dense<0.000000e+00> : vector<16xf32>
    %629 = vector.multi_reduction <add>, %626, %cst_277 [1] : vector<16x64xf32> to vector<16xf32>
    %630 = vector.shape_cast %629 : vector<16xf32> to vector<16x1xf32>
    %cst_278 = arith.constant 6.400000e+01 : f32
    %631 = vector.broadcast %cst_278 : f32 to vector<16x1xf32>
    %632 = arith.divf %630, %631 : vector<16x1xf32>
    %633 = vector.broadcast %632 : vector<16x1xf32> to vector<16x64xf32>
    %634 = arith.subf %626, %633 : vector<16x64xf32>
    %635 = arith.mulf %634, %634 : vector<16x64xf32>
    %cst_279 = arith.constant dense<0.000000e+00> : vector<16xf32>
    %636 = vector.multi_reduction <add>, %635, %cst_279 [1] : vector<16x64xf32> to vector<16xf32>
    %637 = vector.shape_cast %636 : vector<16xf32> to vector<16x1xf32>
    %cst_280 = arith.constant 6.400000e+01 : f32
    %638 = vector.broadcast %cst_280 : f32 to vector<16x1xf32>
    %639 = arith.divf %637, %638 : vector<16x1xf32>
    %640 = vector.broadcast %632 : vector<16x1xf32> to vector<16x64xf32>
    %641 = arith.subf %626, %640 : vector<16x64xf32>
    %cst_281 = arith.constant 9.99999974E-6 : f32
    %642 = vector.broadcast %cst_281 : f32 to vector<16x1xf32>
    %643 = arith.addf %639, %642 : vector<16x1xf32>
    %644 = math.rsqrt %643 : vector<16x1xf32>
    %645 = vector.broadcast %644 : vector<16x1xf32> to vector<16x64xf32>
    %646 = arith.mulf %641, %645 : vector<16x64xf32>
    %647 = vector.broadcast %627 : vector<1x64xf32> to vector<16x64xf32>
    %648 = arith.mulf %646, %647 : vector<16x64xf32>
    %649 = vector.broadcast %628 : vector<1x64xf32> to vector<16x64xf32>
    %650 = arith.addf %648, %649 : vector<16x64xf32>
    %c0_282 = arith.constant 0 : index
    %c0_283 = arith.constant 0 : index
    %651 = vector.load %arg25[%c0_282, %c0_283] : memref<16x64xf32, #tpu.memory_space<vmem>>, vector<16x64xf32>
    tpu.vector_store %arg25[%c0_282, %c0_283], %650 {strides = array<i32>} : memref<16x64xf32, #tpu.memory_space<vmem>>, vector<16x64xf32>,
    return
  }
  func.func @transform_0(%arg0: i32) -> (i32, i32) {
    %c0_i32 = arith.constant 0 : i32
    %c0_i32_0 = arith.constant 0 : i32
    return %arg0, %c0_i32 : i32, i32
  }
  func.func @transform_1(%arg0: i32) -> (i32, i32) {
    %c0_i32 = arith.constant 0 : i32
    %c0_i32_0 = arith.constant 0 : i32
    %c0_i32_1 = arith.constant 0 : i32
    return %c0_i32, %c0_i32_0 : i32, i32
  }
  func.func @transform_2(%arg0: i32) -> (i32, i32) {
    %c0_i32 = arith.constant 0 : i32
    %c0_i32_0 = arith.constant 0 : i32
    %c0_i32_1 = arith.constant 0 : i32
    return %c0_i32, %c0_i32_0 : i32, i32
  }
  func.func @transform_3(%arg0: i32) -> (i32, i32) {
    %c0_i32 = arith.constant 0 : i32
    %c0_i32_0 = arith.constant 0 : i32
    %c0_i32_1 = arith.constant 0 : i32
    return %c0_i32, %c0_i32_0 : i32, i32
  }
  func.func @transform_4(%arg0: i32) -> (i32, i32) {
    %c0_i32 = arith.constant 0 : i32
    %c0_i32_0 = arith.constant 0 : i32
    %c0_i32_1 = arith.constant 0 : i32
    return %c0_i32, %c0_i32_0 : i32, i32
  }
  func.func @transform_5(%arg0: i32) -> (i32, i32, i32) {
    %c0_i32 = arith.constant 0 : i32
    %c0_i32_0 = arith.constant 0 : i32
    %c0_i32_1 = arith.constant 0 : i32
    %c0_i32_2 = arith.constant 0 : i32
    return %c0_i32, %c0_i32_0, %c0_i32_1 : i32, i32, i32
  }
  func.func @transform_6(%arg0: i32) -> (i32, i32, i32) {
    %c0_i32 = arith.constant 0 : i32
    %c0_i32_0 = arith.constant 0 : i32
    %c0_i32_1 = arith.constant 0 : i32
    %c0_i32_2 = arith.constant 0 : i32
    return %c0_i32, %c0_i32_0, %c0_i32_1 : i32, i32, i32
  }
  func.func @transform_7(%arg0: i32) -> (i32, i32, i32) {
    %c0_i32 = arith.constant 0 : i32
    %c0_i32_0 = arith.constant 0 : i32
    %c0_i32_1 = arith.constant 0 : i32
    %c0_i32_2 = arith.constant 0 : i32
    return %c0_i32, %c0_i32_0, %c0_i32_1 : i32, i32, i32
  }
  func.func @transform_8(%arg0: i32) -> (i32, i32, i32) {
    %c0_i32 = arith.constant 0 : i32
    %c0_i32_0 = arith.constant 0 : i32
    %c0_i32_1 = arith.constant 0 : i32
    %c0_i32_2 = arith.constant 0 : i32
    return %c0_i32, %c0_i32_0, %c0_i32_1 : i32, i32, i32
  }
  func.func @transform_9(%arg0: i32) -> (i32, i32, i32) {
    %c0_i32 = arith.constant 0 : i32
    %c0_i32_0 = arith.constant 0 : i32
    %c0_i32_1 = arith.constant 0 : i32
    %c0_i32_2 = arith.constant 0 : i32
    return %c0_i32, %c0_i32_0, %c0_i32_1 : i32, i32, i32
  }
  func.func @transform_10(%arg0: i32) -> (i32, i32, i32) {
    %c0_i32 = arith.constant 0 : i32
    %c0_i32_0 = arith.constant 0 : i32
    %c0_i32_1 = arith.constant 0 : i32
    %c0_i32_2 = arith.constant 0 : i32
    return %c0_i32, %c0_i32_0, %c0_i32_1 : i32, i32, i32
  }
  func.func @transform_11(%arg0: i32) -> (i32, i32, i32) {
    %c0_i32 = arith.constant 0 : i32
    %c0_i32_0 = arith.constant 0 : i32
    %c0_i32_1 = arith.constant 0 : i32
    %c0_i32_2 = arith.constant 0 : i32
    return %c0_i32, %c0_i32_0, %c0_i32_1 : i32, i32, i32
  }
  func.func @transform_12(%arg0: i32) -> (i32, i32, i32) {
    %c0_i32 = arith.constant 0 : i32
    %c0_i32_0 = arith.constant 0 : i32
    %c0_i32_1 = arith.constant 0 : i32
    %c0_i32_2 = arith.constant 0 : i32
    return %c0_i32, %c0_i32_0, %c0_i32_1 : i32, i32, i32
  }
  func.func @transform_13(%arg0: i32) -> (i32, i32, i32) {
    %c0_i32 = arith.constant 0 : i32
    %c0_i32_0 = arith.constant 0 : i32
    %c0_i32_1 = arith.constant 0 : i32
    %c0_i32_2 = arith.constant 0 : i32
    return %c0_i32, %c0_i32_0, %c0_i32_1 : i32, i32, i32
  }
  func.func @transform_14(%arg0: i32) -> (i32, i32, i32) {
    %c0_i32 = arith.constant 0 : i32
    %c0_i32_0 = arith.constant 0 : i32
    %c0_i32_1 = arith.constant 0 : i32
    %c0_i32_2 = arith.constant 0 : i32
    return %c0_i32, %c0_i32_0, %c0_i32_1 : i32, i32, i32
  }
  func.func @transform_15(%arg0: i32) -> (i32, i32, i32) {
    %c0_i32 = arith.constant 0 : i32
    %c0_i32_0 = arith.constant 0 : i32
    %c0_i32_1 = arith.constant 0 : i32
    %c0_i32_2 = arith.constant 0 : i32
    return %c0_i32, %c0_i32_0, %c0_i32_1 : i32, i32, i32
  }
  func.func @transform_16(%arg0: i32) -> (i32, i32, i32) {
    %c0_i32 = arith.constant 0 : i32
    %c0_i32_0 = arith.constant 0 : i32
    %c0_i32_1 = arith.constant 0 : i32
    %c0_i32_2 = arith.constant 0 : i32
    return %c0_i32, %c0_i32_0, %c0_i32_1 : i32, i32, i32
  }
  func.func @transform_17(%arg0: i32) -> (i32, i32, i32) {
    %c0_i32 = arith.constant 0 : i32
    %c0_i32_0 = arith.constant 0 : i32
    %c0_i32_1 = arith.constant 0 : i32
    %c0_i32_2 = arith.constant 0 : i32
    return %c0_i32, %c0_i32_0, %c0_i32_1 : i32, i32, i32
  }
  func.func @transform_18(%arg0: i32) -> (i32, i32, i32) {
    %c0_i32 = arith.constant 0 : i32
    %c0_i32_0 = arith.constant 0 : i32
    %c0_i32_1 = arith.constant 0 : i32
    %c0_i32_2 = arith.constant 0 : i32
    return %c0_i32, %c0_i32_0, %c0_i32_1 : i32, i32, i32
  }
  func.func @transform_19(%arg0: i32) -> (i32, i32, i32) {
    %c0_i32 = arith.constant 0 : i32
    %c0_i32_0 = arith.constant 0 : i32
    %c0_i32_1 = arith.constant 0 : i32
    %c0_i32_2 = arith.constant 0 : i32
    return %c0_i32, %c0_i32_0, %c0_i32_1 : i32, i32, i32
  }
  func.func @transform_20(%arg0: i32) -> (i32, i32, i32) {
    %c0_i32 = arith.constant 0 : i32
    %c0_i32_0 = arith.constant 0 : i32
    %c0_i32_1 = arith.constant 0 : i32
    %c0_i32_2 = arith.constant 0 : i32
    return %c0_i32, %c0_i32_0, %c0_i32_1 : i32, i32, i32
  }
  func.func @transform_21(%arg0: i32) -> (i32, i32, i32) {
    %c0_i32 = arith.constant 0 : i32
    %c0_i32_0 = arith.constant 0 : i32
    %c0_i32_1 = arith.constant 0 : i32
    %c0_i32_2 = arith.constant 0 : i32
    return %c0_i32, %c0_i32_0, %c0_i32_1 : i32, i32, i32
  }
  func.func @transform_22(%arg0: i32) -> (i32, i32) {
    %c0_i32 = arith.constant 0 : i32
    %c0_i32_0 = arith.constant 0 : i32
    %c0_i32_1 = arith.constant 0 : i32
    return %c0_i32, %c0_i32_0 : i32, i32
  }
  func.func @transform_23(%arg0: i32) -> (i32, i32) {
    %c0_i32 = arith.constant 0 : i32
    %c0_i32_0 = arith.constant 0 : i32
    %c0_i32_1 = arith.constant 0 : i32
    return %c0_i32, %c0_i32_0 : i32, i32
  }
  func.func @transform_24(%arg0: i32) -> (i32, i32) {
    %c0_i32 = arith.constant 0 : i32
    %c0_i32_0 = arith.constant 0 : i32
    return %arg0, %c0_i32 : i32, i32
  }
}

</mosaic_0001>

<bundles_post_ra>
// kernel: cot_decoder.1
= control target key start
LH: loop header
LB: loop body
LE: loop exit
PB: predicated region body
PF: predicated region fallthrough
CT: control target
= control target key end

     0   :  { %s7770_s0 = inlined_call_operand.vmem [shape: f32[32,64], index: 0, kind: input, shape index: {}]   ;;  %s7771_s1 = inlined_call_operand.vmem [shape: f32[16,64], index: 1, kind: input, shape index: {}]   ;;  %s7772_s2 = inlined_call_operand.vmem [shape: f32[16,64], index: 2, kind: input, shape index: {}]   ;;  %s7773_s3 = inlined_call_operand.vmem [shape: f32[64,64], index: 3, kind: input, shape index: {}]   ;;  %s7774_s4 = inlined_call_operand.vmem [shape: f32[16,16], index: 4, kind: input, shape index: {}]   ;;  %s7775_s5 = inlined_call_operand.vmem [shape: bf16[4,1,64], index: 5, kind: input, shape index: {}]   ;;  %s7776_s6 = inlined_call_operand.vmem [shape: f32[3,1,64], index: 6, kind: input, shape index: {}]   ;;  %s7777_s7 = inlined_call_operand.vmem [shape: f32[3,1,64], index: 7, kind: input, shape index: {}]   ;;  %s7778_s8 = inlined_call_operand.vmem [shape: bf16[3,64,64], index: 8, kind: input, shape index: {}]   ;;  %s7779_s9 = inlined_call_operand.vmem [shape: bf16[3,64,64], index: 9, kind: input, shape index: {}]   ;;  %s7780_s10 = inlined_call_operand.vmem [shape: bf16[3,64,64], index: 10, kind: input, shape index: {}]   ;;  %s7781_s11 = inlined_call_operand.vmem [shape: f32[3,1,64], index: 11, kind: input, shape index: {}]   ;;  %s7782_s12 = inlined_call_operand.vmem [shape: f32[3,1,64], index: 12, kind: input, shape index: {}]   ;;  %s7783_s13 = inlined_call_operand.vmem [shape: f32[3,1,64], index: 13, kind: input, shape index: {}]   ;;  %s7784_s14 = inlined_call_operand.vmem [shape: bf16[3,64,64], index: 14, kind: input, shape index: {}]   ;;  %s7785_s15 = inlined_call_operand.vmem [shape: f32[3,1,64], index: 15, kind: input, shape index: {}]   ;;  %s7786_s16 = inlined_call_operand.vmem [shape: f32[3,1,64], index: 16, kind: input, shape index: {}]   ;;  %s7787_s17 = inlined_call_operand.vmem [shape: f32[3,1,64], index: 17, kind: input, shape index: {}]   ;;  %s7788_s18 = inlined_call_operand.vmem [shape: bf16[3,64,256], index: 18, kind: input, shape index: {}]   ;;  %s7789_s19 = inlined_call_operand.vmem [shape: f32[3,1,256], index: 19, kind: input, shape index: {}]   ;;  %s7790_s20 = inlined_call_operand.vmem [shape: bf16[3,256,64], index: 20, kind: input, shape index: {}]   ;;  %s7791_s21 = inlined_call_operand.vmem [shape: f32[3,1,64], index: 21, kind: input, shape index: {}]   ;;  %s7792_s22 = inlined_call_operand.vmem [shape: f32[1,64], index: 22, kind: input, shape index: {}]   ;;  %s7793_s23 = inlined_call_operand.vmem [shape: f32[1,64], index: 23, kind: input, shape index: {}]   ;;  %s7794_s24 = inlined_call_operand.hbm [shape: f32[32,64], index: 24, kind: output, shape index: {}]  }
   0x1   :  { %7818 = sst [smem:[#allocation14_spill]] %s7770_s0 }
   0x2   :  { %7819 = sst [smem:[#allocation15_spill]] %s7771_s1 }
   0x3   :  { %7820 = sst [smem:[#allocation16_spill]] %s7772_s2 }
   0x4   :  { %7821 = sst [smem:[#allocation17_spill]] %s7773_s3 }
   0x5   :  { %7822 = sst [smem:[#allocation18_spill]] %s7774_s4 }
   0x6   :  { %7823 = sst [smem:[#allocation19_spill]] %s7775_s5 }
   0x7   :  { %7824 = sst [smem:[#allocation20_spill]] %s7776_s6 }
   0x8   :  { %7825 = sst [smem:[#allocation21_spill]] %s7777_s7 }
   0x9   :  { %7826 = sst [smem:[#allocation22_spill]] %s7778_s8 }
   0xa   :  { %7827 = sst [smem:[#allocation23_spill]] %s7779_s9 }
   0xb   :  { %7828 = sst [smem:[#allocation24_spill]] %s7792_s22 }
   0xc   :  { %7829 = sst [smem:[#allocation25_spill]] %s7793_s23 }
   0xd   :  { %7830 = sst [smem:[#allocation26_spill]] %s7794_s24 }
   0xe   :  { %29 = vsyncpa [#allocation3], 0 }
   0xf   :  { %31 = vsyncpa [#allocation3 + $0x1], 0  ;;  %s6642_s5 = smov 0   ;;  %s6644_s26 = smov 0  }
  0x10   :  { %s6646_s27 = smov 0   ;;  %s6648_s28 = smov 0  }
  0x11 LB: > { %7831 = sst [smem:[#allocation5_spill]] %s6497_s5  ;;  %s6663_s6 = sadd.s32 4294967295, %s6509_s28   ;;  %s6509_s28 = sphi %s6648_s28, %s7865_s28   ;;  %s6505_s27 = sphi %s6646_s27, %s7868_s27   ;;  %s6501_s26 = sphi %s6644_s26, %s7867_s26   ;;  %s6497_s5 = sphi %s6642_s5, %s7866_s5  }
  0x12   : > { %7832 = sst [smem:[#allocation6_spill]] %s6501_s26  ;;  %s5082_s2 = sadd.s32 4294967294, %s6509_s28  }
  0x13   : > { %7833 = sst [smem:[#allocation7_spill]] %s6505_s27  ;;  %s6667_s29 = sadd.s32 1, %s6509_s28  }
  0x14   : > { %7834 = sst [smem:[#allocation8_spill]] %s6509_s28  ;;  %s553_s0 = sadd.s32 1, %s6505_s27 }
  0x15   : > { %7835 = sst [smem:[#allocation9_spill]] %s6663_s6  ;;  %s550_s7 = ssub.s32 %s6509_s28, %s6667_s29 }
  0x16   : > { %7836 = sst [smem:[#allocation10_spill]] %s6667_s29  ;;  %p563_p0 = scmp.ne.s32.totalorder %s6505_s27, %s6501_s26 }
  0x17   : > { %p551_p1 = scmp.eq.s32.totalorder %s550_s7, 0  ;;  %p564_p2 = scmp.eq.s32.totalorder %s6663_s6, 1 }
  0x18   : > { %p569_p3 = scmp.ne.s32.totalorder %s6501_s26, %s6497_s5  ;;  %p570_p4 = scmp.eq.s32.totalorder %s5082_s2, 1 }
  0x19   : > { %s6678_s30 = scalar_select %p551_p1, %s6505_s27, %s553_s0  }
  0x1a   : > { %p6680_p5 = por %p564_p2, %p563_p0  ;;  %p6684_p6 = por %p570_p4, %p569_p3 }
  0x1b   : > { %7837 = sst [smem:[#allocation11_spill]] %s6678_s30  ;;  %p5085_p7 = scmp.ge.s32.totalorder %s6509_s28, 1 }
  0x1c   : > { %s7838_s3 = scalar_select %p6680_p5, 1, 0 }
  0x1d   : > { %s7840_s25 = scalar_select %p6684_p6, 1, 0 }
  0x1e   : > { %7839 = sst [smem:[#allocation12_spill]] %s7838_s3  ;;  %p666_p8 = scmp.lt.s32.totalorder %s6509_s28, 3 }
  0x1f   : > { %7841 = sst [smem:[#allocation13_spill]] %s7840_s25 }
  0x20   : > { %p667_p9 = pnand %p5085_p7, %p666_p8 }
  0x21   : > { %s5087_s8 = sshll.u32 (!%p667_p9), %s6663_s6, 1  ;;  %s7842_s0 = sld [smem:[#allocation14_spill]] (!%p667_p9) }
  0x22   : > { %670 = sbr.rel (%p667_p9) target bundleno = 8166 (0x1fe6), region = 116  ;;  %p733_p10 = scmp.lt.s32.totalorder (!%p667_p9), %s5087_s8, 3 }
  0x23   : > { %s7843_s1 = sld [smem:[#allocation22_spill]] (!%p667_p9) }
  0x24   : > { %s7844_s30 = sld [smem:[#allocation17_spill]] (!%p667_p9) }
  0x25   : > { %s7847_s9 = sld [smem:[#allocation23_spill]] (!%p667_p9) }
  0x26   : > { %s7848_s29 = sld [smem:[#allocation19_spill]] (!%p667_p9) }
  0x27   : > { %vm842_vm0 = vcmask 523264   ;;  %s7870_s8 = smov (!%p733_p10, %s5087_s8), 3  ;;  %v6140_v15 = vld [vmem:[%s7780_s10 + $0x18] sm:$0xff]   ;;  %v6511_v16 = vmov 0.0   ;;  %v6142_v18 = vld [vmem:[%s7780_s10 + $0x10] sm:$0xff]   ;;  %vm6512_vm1 = vmmov 0   ;;  %v1285_v63 = vlaneseq }
  0x28   : > { %s5088_s4 = sshll.u32 %s7870_s8, 3  ;;  %5693 = vmatprep.subr.bf16.mxu1 %v6511_v16  ;;  %5717 = vmatprep.subr.bf16.mxu0 %v6511_v16  ;;  %v6144_v20 = vld [vmem:[%s7780_s10 + $0x8] sm:$0xff]   ;;  %v6146_v22 = vld [vmem:[%s7780_s10] sm:$0xff]   ;;  %s7846_s8 = sld [smem:[#allocation21_spill]]  ;;  %vm1337_vm2 = vcmask 130048  }
  0x29   : > { %s6694_s7 = scalar_lea.vmem %s7842_s0, %s5088_s4  ;;  %v6139_v14 = vld [vmem:[%s7843_s1 + $0x18] sm:$0xff]   ;;  %5718 = vmatpush3.bf16.msra.mxu0 %v6140_v15  ;;  %v6141_v17 = vld [vmem:[%s7843_s1 + $0x10] sm:$0xff]   ;;  %5701 = vmatprep.mubr.msk.bf16.mxu1 %vm6512_vm1, %v6511_v16  ;;  %v6143_v19 = vld [vmem:[%s7843_s1 + $0x8] sm:$0xff]   ;;  %s7845_s4 = sld [smem:[#allocation20_spill]] }
  0x2a   : > { %v740_v0 = vld [vmem:[%s6694_s7] sm:$0xff]  ;;  %v741_v1 = vld [vmem:[%s6694_s7 + $0x8] sm:$0xff]  ;;  %5694 = vmatpush3.bf16.msra.mxu1 %v6139_v14  ;;  %5719 = vmatprep.subr.bf16.mxu0 %v6511_v16  ;;  %v753_v23 = vld [vmem:[%s7844_s30 + $0x38] sm:$0xff]  ;;  %s7849_s28 = sld [smem:[#allocation15_spill]] }
  0x2b   : > { %v843_v2 = vsel %vm842_vm0, %v740_v0, 0.0  ;;  %v846_v3 = vsel %vm842_vm0, %v741_v1, 0.0  ;;  %5695 = vmatprep.subr.bf16.mxu1 %v6511_v16  ;;  %5725 = vmatprep.mubr.msk.bf16.mxu0 %vm6512_vm1, %v6511_v16  ;;  %v6145_v21 = vld [vmem:[%s7843_s1] sm:$0xff]   ;;  %v6147_v40 = vld [vmem:[%s7847_s9 + $0x18] sm:$0xff]   ;;  %v6148_v42 = vld [vmem:[%s7847_s9 + $0x10] sm:$0xff]   ;;  %s7851_s5 = sld [smem:[#allocation16_spill]] }
  0x2c   : > { %844 = vadd.xlane.f32.xlu0 %v843_v2  ;;  %v752_v43 = vld [vmem:[%s7844_s30 + $0x30] sm:$0xff]  ;;  %v751_v44 = vld [vmem:[%s7844_s30 + $0x28] sm:$0xff]  ;;  %v750_v46 = vld [vmem:[%s7844_s30 + $0x20] sm:$0xff]  ;;  %s7853_s27 = sld [smem:[#allocation18_spill]] }
  0x2d   : > { %5720 = vmatpush3.bf16.msra.mxu0 %v6142_v18  ;;  %v6149_v45 = vld [vmem:[%s7847_s9 + $0x8] sm:$0xff]   ;;  %v749_v47 = vld [vmem:[%s7844_s30 + $0x18] sm:$0xff]  ;;  %v6150_v48 = vld [vmem:[%s7847_s9] sm:$0xff]   ;;  %s7857_s22 = sld [smem:[#allocation24_spill]] }
  0x2e   : > { %5696 = vmatpush3.bf16.msra.mxu1 %v6141_v17  ;;  %5721 = vmatprep.subr.bf16.mxu0 %v6511_v16  ;;  %v5090_v36 = vld [vmem:[%s7846_s8] ss:$0 sm:$0xff]  ;;  %v748_v49 = vld [vmem:[%s7844_s30 + $0x10] sm:$0xff]  ;;  %v747_v50 = vld [vmem:[%s7844_s30 + $0x8] sm:$0xff]  ;;  %s7858_s6 = sld [smem:[#allocation25_spill]] }
  0x2f   : > { %5697 = vmatprep.subr.bf16.mxu1 %v6511_v16  ;;  %v5089_v32 = vld [vmem:[%s7845_s4] ss:$0 sm:$0xff] }
  0x30   : > { %847 = vadd.xlane.f32.xlu0 %v846_v3  ;;  %v746_v51 = vld [vmem:[%s7844_s30] sm:$0xff]  ;;  %s7850_s25 = smov %s7849_s28  ;;  %v743_v18 = vld [vmem:[%s7849_s28 + $0x8] sm:$0xff]  ;;  %s7856_s28 = sld [smem:[#allocation9_spill]] }
  0x31   : > { %5722 = vmatpush3.bf16.msra.mxu0 %v6144_v20  ;;  %v5091_v52 = vld [vmem:[%s7781_s11] ss:$0 sm:$0xff]  ;;  %s7852_s3 = smov %s7851_s5 }
  0x32   : > { %5698 = vmatpush3.bf16.msra.mxu1 %v6143_v19  ;;  %5723 = vmatprep.subr.bf16.mxu0 %v6511_v16  ;;  %v5103_v2 = vld [vmem:[%s7783_s13] ss:$0 sm:$0xff]  ;;  %v745_v19 = vld [vmem:[%s7851_s5 + $0x8] sm:$0xff]  ;;  %s7854_s24 = smov %s7853_s27  ;;  %s7860_s5 = sld [smem:[#allocation26_spill]] }
  0x33   : > { %5699 = vmatprep.subr.bf16.mxu1 %v6511_v16  ;;  %v742_v20 = vld [vmem:[%s7850_s25] sm:$0xff] }
  0x35   : > { %5724 = vmatpush3.bf16.msra.mxu0 %v6146_v22  ;;  %v744_v22 = vld [vmem:[%s7852_s3] sm:$0xff] }
  0x36   : > { %5700 = vmatpush3.bf16.msra.mxu1 %v6145_v21  ;;  %5748 = vmatprep.subr.mxu0 %v753_v23 }
  0x37   : > { %5705 = vmatprep.subr.bf16.mxu1 %v6511_v16 }
  0xb5   : > { %v845_v4 = vpop.xlane.xlu0 %844 }
  0xb6   : > { %v850_v5 = vmul.f32 0.015625, %v845_v4  ;;  %v5097_v4 = vld [vmem:[%s7782_s12] ss:$0 sm:$0xff] }
  0xb8   : > { %v852_v6 = vsub.f32 %v740_v0, %v850_v5  ;;  %v6798_v0 = vshrl.u32 %v1285_v63, 7 }
  0xb9   : > { %v848_v7 = vpop.xlane.xlu0 %847 }
  0xba   : > { %v851_v8 = vmul.f32 0.015625, %v848_v7  ;;  %v854_v9 = vmul.f32 %v852_v6, %v852_v6  ;;  %v6810_v5 = vsub.s32 0, %v6798_v0 }
  0xbc   : > { %v853_v10 = vsub.f32 %v741_v1, %v851_v8  ;;  %v856_v11 = vsel %vm842_vm0, %v854_v9, 0.0  ;;  %v757_v1 = vld [vmem:[%s7848_s29 + $0x1] sm:$0x1] }
  0xbd   : > { %857 = vadd.xlane.f32.xlu1 %v856_v11 }
  0xbe   : > { %v855_v12 = vmul.f32 %v853_v10, %v853_v10 }
  0xc0   : > { %v859_v13 = vsel %vm842_vm0, %v855_v12, 0.0 }
  0xc1   : > { %860 = vadd.xlane.f32.xlu1 %v859_v13 }
 0x146   : > { %v858_v24 = vpop.xlane.xlu1 %857 }
 0x147   : > { %v862_v25 = vmul.f32 0.015625, %v858_v24 }
 0x149   : > { %v864_v26 = vadd.f32 1e-05, %v862_v25 }
 0x14a   : > { %v861_v27 = vpop.xlane.xlu1 %860 }
 0x14b   : > { %6271 = vrsqrt.f32 %v864_v26  ;;  %v863_v28 = vmul.f32 0.015625, %v861_v27 }
 0x14d   : > { %v865_v29 = vadd.f32 1e-05, %v863_v28 }
 0x14f   : > { %6273 = vrsqrt.f32 %v865_v29 }
 0x158   : > { %v6272_v30 = vpop.eup %6271 }
 0x159   : > { %v868_v31 = vmul.f32 %v6272_v30, %v852_v6  ;;  %v1363_v6 = vpack.i.b16 %v757_v1, %v757_v1 }
 0x15b   : > { %v876_v35 = vmul.f32 %v5089_v32, %v868_v31  ;;  %v6815_v12 = vrot.slane %v1363_v6, %v6810_v5 }
 0x15c   : > { %v6274_v33 = vpop.eup %6273 }
 0x15d   : > { %v869_v34 = vmul.f32 %v6274_v33, %v853_v10  ;;  %v884_v38 = vadd.f32 %v5090_v36, %v876_v35 }
 0x15f   : > { %v877_v37 = vmul.f32 %v5089_v32, %v869_v34 }
 0x161   : > { %v885_v39 = vadd.f32 %v5090_v36, %v877_v37 }
 0x163   : > { %v886_v41 = vpack.c.bf16 %v885_v39, %v884_v38 }
 0x165   : > { %5702 = vmatmul.mubr.msk.bf16.vlgmr.msra.gmra.mxu1 %vm842_vm0, %v886_v41  ;;  %5726 = vmatmul.mubr.msk.bf16.vlgmr.msra.gmra.mxu0 %vm842_vm0, %v886_v41 }
 0x166   : > { %5706 = vmatpush3.bf16.msra.mxu1 %v6147_v40  ;;  %5713 = vmatprep.mubr.msk.bf16.mxu1 %vm6512_vm1, %v6511_v16 }
 0x167   : > { %5707 = vmatprep.subr.bf16.mxu1 %v6511_v16  ;;  %5749 = vmatpush3.msra.mxu0 %v753_v23 }
 0x168   : > { %5750 = vmatprep.subr.mxu0 %v752_v43 }
 0x169   : > { %5751 = vmatpush3.msra.mxu0 %v752_v43 }
 0x16a   : > { %5708 = vmatpush3.bf16.msra.mxu1 %v6148_v42  ;;  %5752 = vmatprep.subr.mxu0 %v751_v44 }
 0x16b   : > { %5709 = vmatprep.subr.bf16.mxu1 %v6511_v16  ;;  %5753 = vmatpush3.msra.mxu0 %v751_v44 }
 0x16c   : > { %5754 = vmatprep.subr.mxu0 %v750_v46 }
 0x16d   : > { %5755 = vmatpush3.msra.mxu0 %v750_v46 }
 0x16e   : > { %5710 = vmatpush3.bf16.msra.mxu1 %v6149_v45  ;;  %5756 = vmatprep.subr.mxu0 %v749_v47 }
 0x16f   : > { %5711 = vmatprep.subr.bf16.mxu1 %v6511_v16  ;;  %5757 = vmatpush3.msra.mxu0 %v749_v47 }
 0x170   : > { %5758 = vmatprep.subr.mxu0 %v748_v49 }
 0x171   : > { %5759 = vmatpush3.msra.mxu0 %v748_v49 }
 0x172   : > { %5712 = vmatpush3.bf16.msra.mxu1 %v6150_v48  ;;  %5760 = vmatprep.subr.mxu0 %v747_v50 }
 0x173   : > { %5729 = vmatprep.subr.mxu1 %v753_v23  ;;  %5761 = vmatpush3.msra.mxu0 %v747_v50 }
 0x174   : > { %5762 = vmatprep.subr.mxu0 %v746_v51 }
 0x175   : > { %5714 = vmatmul.mubr.msk.bf16.vlgmr.msra.gmra.mxu1 %vm842_vm0, %v886_v41  ;;  %5763 = vmatpush3.msra.mxu0 %v746_v51  ;;  %v756_v41 = vld [vmem:[%s7848_s29] sm:$0x1] }
 0x176   : > { %5730 = vmatpush3.msra.mxu1 %v753_v23  ;;  %5779 = vmatprep.subr.bf16.mxu0 %v6511_v16 }
 0x177   : > { %5731 = vmatprep.subr.mxu1 %v752_v43 }
 0x178   : > { %5732 = vmatpush3.msra.mxu1 %v752_v43 }
 0x179   : > { %5733 = vmatprep.subr.mxu1 %v751_v44 }
 0x17a   : > { %5734 = vmatpush3.msra.mxu1 %v751_v44  ;;  %v1283_v44 = vpack.i.b16 %v756_v41, %v756_v41 }
 0x17b   : > { %5735 = vmatprep.subr.mxu1 %v750_v46 }
 0x17c   : > { %5736 = vmatpush3.msra.mxu1 %v750_v46  ;;  %v6847_v45 = vrot.slane %v1283_v44, %v6810_v5 }
 0x17d   : > { %5737 = vmatprep.subr.mxu1 %v749_v47 }
 0x17e   : > { %5738 = vmatpush3.msra.mxu1 %v749_v47 }
 0x17f   : > { %5739 = vmatprep.subr.mxu1 %v748_v49 }
 0x180   : > { %5740 = vmatpush3.msra.mxu1 %v748_v49 }
 0x181   : > { %5741 = vmatprep.subr.mxu1 %v747_v50 }
 0x182   : > { %5742 = vmatpush3.msra.mxu1 %v747_v50 }
 0x183   : > { %5743 = vmatprep.subr.mxu1 %v746_v51 }
 0x184   : > { %5744 = vmatpush3.msra.mxu1 %v746_v51 }
 0x185   : > { %5767 = vmatprep.subr.bf16.mxu1 %v6511_v16 }
 0x225   : > { %v954_v53 = vpop.f32.mrf.mxu1  ;;  %v1096_v54 = vpop.f32.mrf.mxu0 }
 0x226   : > { %v955_v55 = vadd.f32 %v5091_v52, %v954_v53  ;;  %v1097_v7 = vadd.f32 %v5103_v2, %v1096_v54  ;;  %v6867_v53 = vld [vmem:[%s7853_s27] sm:$0xff]  ;;  %s7855_s27 = sld [smem:[#allocation6_spill]] }
 0x227   : > { %v5703_v56 = vpop.f32.mrf.mxu1  ;;  %v5727_v57 = vpop.f32.mrf.mxu0 }
 0x228   : > { %5745 = vmatprep.mubr.msk.f32.mxu1 %vm842_vm0, %v955_v55  ;;  %v1103_v26 = vmul.f32 %v955_v55, %v742_v20 }
 0x229   : > { %v957_v58 = vpop.f32.mrf.mxu1  ;;  %v1099_v59 = vpop.f32.mrf.mxu0 }
 0x22a   : > { %v958_v60 = vadd.f32 %v5091_v52, %v957_v58  ;;  %v1100_v3 = vadd.f32 %v5103_v2, %v1099_v59  ;;  %v6874_v58 = vld [vmem:[%s7854_s24 + $0x8] sm:$0xff] }
 0x22b   : > { %v5704_v61 = vpop.f32.mrf.mxu1  ;;  %v5728_v62 = vpop.f32.mrf.mxu0 }
 0x22c   : > { %5746 = vmatmul.mubr.msk.f32.vlgmr.msra.gmra.mxu1 %vm842_vm0, %v958_v60  ;;  %v6812_v10 = vpack.c.bf16 %v1100_v3, %v1097_v7  ;;  %v1104_v23 = vmul.f32 %v958_v60, %v743_v18  ;;  %s729_s2 = sand.u32 1, %s7855_s27  }
 0x22d   : > { %5769 = vmatprep.mubr.msk.bf16.mxu1 %vm6512_vm1, %v6511_v16  ;;  %s5086_s23 = sshll.u32 %s729_s2, 4  ;;  %s7730_s26 = scalar_lea.sflag [#allocation3], %s729_s2 }
 0x22e   : > { %v1437_v17 = vmul.bf16 %v6815_v12, %v6812_v10  ;;  %v1361_v48 = vmul.bf16 %v6847_v45, %v6812_v10 }
 0x235   : > { %v1025_v8 = vpop.f32.mrf.mxu1 }
 0x236   : > { %v1026_v9 = vadd.f32 %v5097_v4, %v1025_v8 }
 0x237   : > { %v5715_v11 = vpop.f32.mrf.mxu1 }
 0x238   : > { %5764 = vmatprep.mubr.msk.f32.mxu0 %vm842_vm0, %v1026_v9  ;;  %v1190_v36 = vmul.f32 %v1026_v9, %v742_v20 }
 0x239   : > { %v1028_v13 = vpop.f32.mrf.mxu1 }
 0x23a   : > { %v1029_v14 = vadd.f32 %v5097_v4, %v1028_v13 }
 0x23b   : > { %v5716_v15 = vpop.f32.mrf.mxu1 }
 0x23c   : > { %5765 = vmatmul.mubr.msk.f32.vlgmr.msra.gmra.mxu0 %vm842_vm0, %v1029_v14  ;;  %v1191_v37 = vmul.f32 %v1029_v14, %v743_v18 }
 0x23d   : > { %5780 = vmatpush3.bf16.msra.mxu0 %v1437_v17  ;;  %5781 = vmatprep.mubr.msk.bf16.mxu0 %vm6512_vm1, %v6511_v16 }
 0x23e   : > { %5791 = vmatprep.subr.bf16.mxu0 %v6511_v16 }
 0x2ec   : > { %v5747_v21 = vpop.f32.mrf.mxu1 }
 0x2ed   : > { %v1187_v24 = vmul.f32 %v5747_v21, %v745_v19 }
 0x2ee   : > { %v1177_v25 = vpop.f32.mrf.mxu1 }
 0x2ef   : > { %v1189_v27 = vadd.f32 %v1187_v24, %v1104_v23  ;;  %v1186_v28 = vmul.f32 %v1177_v25, %v744_v22  ;;  %v758_v24 = vld [vmem:[%s7848_s29 + $0x2] sm:$0x1] }
 0x2f1   : > { %v1188_v29 = vadd.f32 %v1186_v28, %v1103_v26  ;;  %v1278_v30 = vmul.f32 0.25, %v1189_v27  ;;  %v1527_v26 = vpack.i.b16 %v758_v24, %v758_v24  ;;  %v759_v28 = vld [vmem:[%s7848_s29 + $0x3] sm:$0x1] }
 0x2f3   : > { %v1277_v31 = vmul.f32 0.25, %v1188_v29  ;;  %v6893_v27 = vrot.slane %v1527_v26, %v6810_v5 }
 0x2f5   : > { %v6836_v32 = vpack.c.bf16 %v1278_v30, %v1277_v31  ;;  %v1649_v30 = vpack.i.b16 %v759_v28, %v759_v28 }
 0x2f7   : > { %v1289_v46 = vmul.bf16 %v6847_v45, %v6836_v32  ;;  %v1369_v47 = vmul.bf16 %v6815_v12, %v6836_v32  ;;  %v1533_v29 = vmul.bf16 %v6893_v27, %v6836_v32  ;;  %v6906_v31 = vrot.slane %v1649_v30, %v6810_v5 }
 0x2fc   : > { %v5766_v33 = vpop.f32.mrf.mxu0 }
 0x2fd   : > { %v1274_v34 = vmul.f32 %v5766_v33, %v745_v19  ;;  %v1655_v33 = vmul.bf16 %v6906_v31, %v6836_v32 }
 0x2fe   : > { %v1264_v35 = vpop.f32.mrf.mxu0 }
 0x2ff   : > { %v1273_v38 = vmul.f32 %v1264_v35, %v744_v22  ;;  %v1276_v39 = vadd.f32 %v1274_v34, %v1191_v37 }
 0x301   : > { %v1275_v40 = vadd.f32 %v1273_v38, %v1190_v36 }
 0x303   : > { %v1280_v42 = vpack.c.bf16 %v1276_v39, %v1275_v40 }
 0x305   : > { %v6842_v43 = vsel %vm842_vm0, %v1280_v42, 0 }
 0x306   : > { %5768 = vmatpush3.bf16.xpose.msra.mxu1 %v6842_v43 }
 0x307   : > { %5773 = vmatprep.subr.bf16.mxu1 %v6511_v16 }
 0x30d   : > { %5770 = vmatmul.mubr.msk.bf16.vlgmr.msra.gmra.mxu1 %vm842_vm0, %v1289_v46 }
 0x30e   : > { %5774 = vmatpush3.bf16.xpose.msra.mxu1 %v6842_v43  ;;  %5775 = vmatprep.mubr.msk.bf16.mxu1 %vm6512_vm1, %v6511_v16 }
 0x30f   : > { %5785 = vmatprep.subr.bf16.mxu1 %v6511_v16 }
 0x315   : > { %5776 = vmatmul.mubr.msk.bf16.vlgmr.msra.gmra.mxu1 %vm842_vm0, %v1369_v47 }
 0x316   : > { %5786 = vmatpush3.bf16.msra.mxu1 %v1361_v48  ;;  %5787 = vmatprep.mubr.msk.bf16.mxu1 %vm6512_vm1, %v6511_v16 }
 0x317   : > { %5797 = vmatprep.subr.bf16.mxu1 %v6511_v16 }
 0x3cd   : > { %v1330_v49 = vpop.f32.mrf.mxu1 }
 0x3ce   : > { %v1331_v8 = vadd.f32 %v1330_v49, %v6867_v53 }
 0x3cf   : > { %v5771_v50 = vpop.f32.mrf.mxu1 }
 0x3d0   : > { %v1338_v14 = vsel %vm1337_vm2, %v1331_v8, -inf }
 0x3d1   : > { %v1333_v51 = vpop.f32.mrf.mxu1 }
 0x3d2   : > { %v1334_v13 = vadd.f32 %v1333_v51, %v6874_v58 }
 0x3d3   : > { %v5772_v52 = vpop.f32.mrf.mxu1 }
 0x3d4   : > { %v1341_v17 = vsel %vm1337_vm2, %v1334_v13, -inf }
 0x3d5   : > { %v1407_v54 = vpop.f32.mrf.mxu1 }
 0x3d6   : > { %v1408_v55 = vadd.f32 %v1407_v54, %v6867_v53 }
 0x3d7   : > { %v5777_v56 = vpop.f32.mrf.mxu1 }
 0x3d8   : > { %v1414_v57 = vsel %vm1337_vm2, %v1408_v55, -inf }
 0x3d9   : > { %1415 = vmax.xlane.f32.xlu0 %v1414_v57  ;;  %v1410_v59 = vpop.f32.mrf.mxu1 }
 0x3da   : > { %v1411_v60 = vadd.f32 %v1410_v59, %v6874_v58 }
 0x3db   : > { %v5778_v61 = vpop.f32.mrf.mxu1 }
 0x3dc   : > { %v1417_v62 = vsel %vm1337_vm2, %v1411_v60, -inf }
 0x3dd   : > { %1418 = vmax.xlane.f32.xlu1 %v1417_v62 }
 0x462   : > { %v1416_v63 = vpop.xlane.xlu0 %1415 }
 0x463   : > { %v1420_v1 = vsub.f32 %v1408_v55, %v1416_v63 }
 0x465   : > { %v1422_v2 = vmul.f32 1.442695, %v1420_v1 }
 0x466   : > { %v1419_v3 = vpop.xlane.xlu1 %1418 }
 0x467   : > { %6275 = vpow2.f32 %v1422_v2  ;;  %v1421_v4 = vsub.f32 %v1411_v60, %v1419_v3 }
 0x469   : > { %v1424_v6 = vmul.f32 1.442695, %v1421_v4 }
 0x46b   : > { %6277 = vpow2.f32 %v1424_v6 }
 0x474   : > { %v6276_v7 = vpop.eup %6275 }
 0x475   : > { %v1426_v9 = vsel %vm1337_vm2, %v6276_v7, 0.0 }
 0x476   : > { %1427 = vadd.xlane.f32.xlu0 %v1426_v9 }
 0x478   : > { %v6278_v11 = vpop.eup %6277 }
 0x479   : > { %v1429_v15 = vsel %vm1337_vm2, %v6278_v11, 0.0 }
 0x47a   : > { %1339 = vmax.xlane.f32.xlu0 %v1338_v14  ;;  %1430 = vadd.xlane.f32.xlu1 %v1429_v15 }
 0x47e   : > { %1342 = vmax.xlane.f32.xlu1 %v1341_v17 }
 0x4ff   : > { %v1428_v18 = vpop.xlane.xlu0 %1427 }
 0x500   : > { %6279 = vrcp.f32 %v1428_v18 }
 0x503   : > { %v1431_v19 = vpop.xlane.xlu1 %1430  ;;  %v1340_v34 = vpop.xlane.xlu0 %1339 }
 0x504   : > { %6281 = vrcp.f32 %v1431_v19  ;;  %v1344_v35 = vsub.f32 %v1331_v8, %v1340_v34 }
 0x506   : > { %v1346_v39 = vmul.f32 1.442695, %v1344_v35  ;;  %v1601_v35 = vmul.bf16 %v6893_v27, %v6812_v10 }
 0x507   : > { %v1343_v36 = vpop.xlane.xlu1 %1342 }
 0x508   : > { %v1345_v40 = vsub.f32 %v1334_v13, %v1343_v36  ;;  %6283 = vpow2.f32 %v1346_v39 }
 0x50d   : > { %v6280_v20 = vpop.eup %6279 }
 0x50e   : > { %v1433_v22 = vmul.f32 %v6280_v20, %v6276_v7 }
 0x511   : > { %v6282_v21 = vpop.eup %6281 }
 0x512   : > { %v1435_v23 = vmul.f32 %v6282_v21, %v6278_v11 }
 0x514   : > { %v1436_v25 = vpack.c.bf16 %v1435_v23, %v1433_v22 }
 0x515   : > { %v6284_v57 = vpop.eup %6283 }
 0x516   : > { %5782 = vmatmul.mubr.msk.bf16.vlgmr.msra.gmra.mxu0 %vm1337_vm2, %v1436_v25  ;;  %v1350_v62 = vsel %vm1337_vm2, %v6284_v57, 0.0 }
 0x517   : > { %5792 = vmatpush3.bf16.xpose.msra.mxu0 %v6842_v43  ;;  %5793 = vmatprep.mubr.msk.bf16.mxu0 %vm6512_vm1, %v6511_v16 }
 0x518   : > { %5803 = vmatprep.subr.bf16.mxu0 %v6511_v16 }
 0x51e   : > { %5794 = vmatmul.mubr.msk.bf16.vlgmr.msra.gmra.mxu0 %vm842_vm0, %v1533_v29 }
 0x51f   : > { %5804 = vmatpush3.bf16.xpose.msra.mxu0 %v6842_v43  ;;  %5805 = vmatprep.mubr.msk.bf16.mxu0 %vm6512_vm1, %v6511_v16  ;;  %v1348_v43 = vmul.f32 1.442695, %v1345_v40 }
 0x520   : > { %5815 = vmatprep.subr.bf16.mxu0 %v6511_v16 }
 0x521   : > { %6285 = vpow2.f32 %v1348_v43 }
 0x526   : > { %5806 = vmatmul.mubr.msk.bf16.vlgmr.msra.gmra.mxu0 %vm842_vm0, %v1655_v33 }
 0x527   : > { %5823 = vmatprep.mubr.msk.bf16.mxu0 %vm6512_vm1, %v6511_v16 }
 0x52e   : > { %v6286_v1 = vpop.eup %6285 }
 0x52f   : > { %v1353_v2 = vsel %vm1337_vm2, %v6286_v1, 0.0 }
 0x5d6   : > { %v6913_v37 = vpop.f32.mrf.mxu0 }
 0x5d8   : > { %v5783_v38 = vpop.f32.mrf.mxu0 }
 0x5da   : > { %v6915_v41 = vpop.f32.mrf.mxu0 }
 0x5dc   : > { %v5784_v42 = vpop.f32.mrf.mxu0 }
 0x5de   : > { %v1571_v44 = vpop.f32.mrf.mxu0 }
 0x5df   : > { %v1572_v32 = vadd.f32 %v1571_v44, %v6867_v53 }
 0x5e0   : > { %v5795_v46 = vpop.f32.mrf.mxu0 }
 0x5e1   : > { %v1578_v47 = vsel %vm1337_vm2, %v1572_v32, -inf }
 0x5e2   : > { %1579 = vmax.xlane.f32.xlu0 %v1578_v47  ;;  %v1574_v48 = vpop.f32.mrf.mxu0  ;;  %v1723_v47 = vmul.bf16 %v6906_v31, %v6812_v10  ;;  %v6151_v10 = vld [vmem:[%s7784_s14 + $0x18] sm:$0xff]  }
 0x5e3   : > { %v1575_v49 = vadd.f32 %v1574_v48, %v6874_v58  ;;  %5816 = vmatpush3.bf16.msra.mxu0 %v6151_v10 }
 0x5e4   : > { %v5796_v50 = vpop.f32.mrf.mxu0  ;;  %5817 = vmatprep.subr.bf16.mxu0 %v6511_v16 }
 0x5e5   : > { %v1581_v51 = vsel %vm1337_vm2, %v1575_v49, -inf }
 0x5e6   : > { %1582 = vmax.xlane.f32.xlu1 %v1581_v51  ;;  %v1693_v52 = vpop.f32.mrf.mxu0 }
 0x5e7   : > { %v1694_v54 = vadd.f32 %v1693_v52, %v6867_v53 }
 0x5e8   : > { %v5807_v55 = vpop.f32.mrf.mxu0 }
 0x5e9   : > { %v1700_v56 = vsel %vm1337_vm2, %v1694_v54, -inf }
 0x5ea   : > { %1701 = vmax.xlane.f32.xlu0 %v1700_v56  ;;  %v1696_v59 = vpop.f32.mrf.mxu0 }
 0x5eb   : > { %v1697_v60 = vadd.f32 %v1696_v59, %v6874_v58  ;;  %v6152_v59 = vld [vmem:[%s7784_s14 + $0x10] sm:$0xff]  }
 0x5ec   : > { %v5808_v61 = vpop.f32.mrf.mxu0  ;;  %5818 = vmatpush3.bf16.msra.mxu0 %v6152_v59 }
 0x5ed   : > { %v1703_v63 = vsel %vm1337_vm2, %v1697_v60, -inf  ;;  %5819 = vmatprep.subr.bf16.mxu0 %v6511_v16  ;;  %v6154_v61 = vld [vmem:[%s7784_s14] sm:$0xff]  }
 0x5ee   : > { %1351 = vadd.xlane.f32.xlu0 %v1350_v62  ;;  %1704 = vmax.xlane.f32.xlu1 %v1703_v63 }
 0x5f2   : > { %1354 = vadd.xlane.f32.xlu1 %v1353_v2 }
 0x66b   : > { %v1580_v53 = vpop.xlane.xlu0 %1579 }
 0x66c   : > { %v1584_v3 = vsub.f32 %v1572_v32, %v1580_v53 }
 0x66e   : > { %v1586_v4 = vmul.f32 1.442695, %v1584_v3 }
 0x66f   : > { %v1583_v6 = vpop.xlane.xlu1 %1582 }
 0x670   : > { %6287 = vpow2.f32 %v1586_v4  ;;  %v1585_v7 = vsub.f32 %v1575_v49, %v1583_v6 }
 0x672   : > { %v1588_v8 = vmul.f32 1.442695, %v1585_v7 }
 0x673   : > { %v1702_v9 = vpop.xlane.xlu0 %1701 }
 0x674   : > { %6289 = vpow2.f32 %v1588_v8  ;;  %v1706_v58 = vsub.f32 %v1694_v54, %v1702_v9 }
 0x676   : > { %v1708_v11 = vmul.f32 1.442695, %v1706_v58 }
 0x677   : > { %v1705_v13 = vpop.xlane.xlu1 %1704  ;;  %v1352_v14 = vpop.xlane.xlu0 %1351 }
 0x678   : > { %6291 = vpow2.f32 %v1708_v11  ;;  %v1707_v15 = vsub.f32 %v1697_v60, %v1705_v13  ;;  %v6153_v60 = vld [vmem:[%s7784_s14 + $0x8] sm:$0xff]  }
 0x679   : > { %6293 = vrcp.f32 %v1352_v14  ;;  %5820 = vmatpush3.bf16.msra.mxu0 %v6153_v60  ;;  %v5127_v60 = vld [vmem:[%s7786_s16] ss:$0 sm:$0xff] }
 0x67a   : > { %v1710_v17 = vmul.f32 1.442695, %v1707_v15  ;;  %5821 = vmatprep.subr.bf16.mxu0 %v6511_v16  ;;  %v5121_v15 = vld [vmem:[%s7785_s15] ss:$0 sm:$0xff] }
 0x67b   : > { %v1355_v18 = vpop.xlane.xlu1 %1354 }
 0x67c   : > { %6295 = vpow2.f32 %v1710_v17 }
 0x67d   : > { %v6288_v19 = vpop.eup %6287  ;;  %6297 = vrcp.f32 %v1355_v18  ;;  %5822 = vmatpush3.bf16.msra.mxu0 %v6154_v61 }
 0x67e   : > { %v1590_v20 = vsel %vm1337_vm2, %v6288_v19, 0.0 }
 0x67f   : > { %1591 = vadd.xlane.f32.xlu0 %v1590_v20 }
 0x681   : > { %v6290_v21 = vpop.eup %6289 }
 0x682   : > { %v1593_v22 = vsel %vm1337_vm2, %v6290_v21, 0.0 }
 0x683   : > { %1594 = vadd.xlane.f32.xlu1 %v1593_v22 }
 0x685   : > { %v6292_v23 = vpop.eup %6291 }
 0x686   : > { %v1712_v24 = vsel %vm1337_vm2, %v6292_v23, 0.0  ;;  %v6294_v25 = vpop.eup %6293 }
 0x687   : > { %1713 = vadd.xlane.f32.xlu0 %v1712_v24  ;;  %v1357_v30 = vmul.f32 %v6294_v25, %v6284_v57  ;;  %v6420_v24 = vld [vmem:[%s6694_s7 + $0x8] sm:$0xff] }
 0x689   : > { %v6296_v26 = vpop.eup %6295 }
 0x68a   : > { %v6298_v28 = vpop.eup %6297  ;;  %v1715_v29 = vsel %vm1337_vm2, %v6296_v26, 0.0 }
 0x68b   : > { %1716 = vadd.xlane.f32.xlu1 %v1715_v29  ;;  %v1359_v33 = vmul.f32 %v6298_v28, %v6286_v1 }
 0x68d   : > { %v1360_v34 = vpack.c.bf16 %v1359_v33, %v1357_v30 }
 0x68f   : > { %5788 = vmatmul.mubr.msk.bf16.vlgmr.msra.gmra.mxu1 %vm1337_vm2, %v1360_v34 }
 0x690   : > { %5798 = vmatpush3.bf16.msra.mxu1 %v1601_v35  ;;  %5799 = vmatprep.mubr.msk.bf16.mxu1 %vm6512_vm1, %v6511_v16 }
 0x691   : > { %5809 = vmatprep.subr.bf16.mxu1 %v6511_v16 }
 0x708   : > { %v1592_v36 = vpop.xlane.xlu0 %1591 }
 0x709   : > { %6299 = vrcp.f32 %v1592_v36 }
 0x70c   : > { %v1595_v38 = vpop.xlane.xlu1 %1594 }
 0x70d   : > { %6301 = vrcp.f32 %v1595_v38 }
 0x710   : > { %v1714_v39 = vpop.xlane.xlu0 %1713 }
 0x711   : > { %6303 = vrcp.f32 %v1714_v39 }
 0x714   : > { %v1717_v40 = vpop.xlane.xlu1 %1716 }
 0x715   : > { %6305 = vrcp.f32 %v1717_v40 }
 0x716   : > { %v6300_v42 = vpop.eup %6299 }
 0x717   : > { %v1597_v44 = vmul.f32 %v6300_v42, %v6288_v19  ;;  %v6419_v19 = vld [vmem:[%s6694_s7] sm:$0xff]  ;;  %v6157_v42 = vld [vmem:[%s7788_s18 + $0x34] ss:$8 sps:$4 sm:$0xff]  }
 0x71a   : > { %v6302_v43 = vpop.eup %6301 }
 0x71b   : > { %v1599_v32 = vmul.f32 %v6302_v43, %v6290_v21  ;;  %v6155_v43 = vld [vmem:[%s7788_s18 + $0x30] ss:$8 sps:$4 sm:$0xff]  }
 0x71d   : > { %v1600_v46 = vpack.c.bf16 %v1599_v32, %v1597_v44  ;;  %v6160_v44 = vld [vmem:[%s7788_s18 + $0x24] ss:$8 sps:$4 sm:$0xff]   ;;  %v6158_v32 = vld [vmem:[%s7788_s18 + $0x20] ss:$8 sps:$4 sm:$0xff]  }
 0x71e   : > { %v6304_v48 = vpop.eup %6303 }
 0x71f   : > { %5800 = vmatmul.mubr.msk.bf16.vlgmr.msra.gmra.mxu1 %vm1337_vm2, %v1600_v46  ;;  %v1719_v50 = vmul.f32 %v6304_v48, %v6292_v23  ;;  %v6161_v46 = vld [vmem:[%s7788_s18 + $0x10] ss:$8 sps:$4 sm:$0xff]   ;;  %v6166_v48 = vld [vmem:[%s7788_s18 + $0x4] ss:$8 sps:$4 sm:$0xff]  }
 0x720   : > { %5810 = vmatpush3.bf16.msra.mxu1 %v1723_v47  ;;  %5811 = vmatprep.mubr.msk.bf16.mxu1 %vm6512_vm1, %v6511_v16  ;;  %v6163_v47 = vld [vmem:[%s7788_s18 + $0x14] ss:$8 sps:$4 sm:$0xff]  }
 0x721   : > { %1952 = vmatprep.subr.bf16.mxu1 %v6157_v42 }
 0x722   : > { %v6306_v49 = vpop.eup %6305 }
 0x723   : > { %v1721_v51 = vmul.f32 %v6306_v49, %v6296_v26  ;;  %v6513_v49 = vmov 0  }
 0x725   : > { %v1722_v52 = vpack.c.bf16 %v1721_v51, %v1719_v50  ;;  %v6164_v50 = vld [vmem:[%s7788_s18] ss:$8 sps:$4 sm:$0xff]  }
 0x727   : > { %5812 = vmatmul.mubr.msk.bf16.vlgmr.msra.gmra.mxu1 %vm1337_vm2, %v1722_v52 }
 0x728   : > { %1953 = vmatpush1.bf16.msra.mxu1 %v6155_v43  ;;  %1976 = vmatprep.mubr.bf16.mxu1 %v6513_v49 }
 0x729   : > { %1954 = vmatprep.subr.bf16.mxu1 %v6160_v44 }
 0x72c   : > { %1955 = vmatpush1.bf16.msra.mxu1 %v6158_v32 }
 0x72d   : > { %1956 = vmatprep.subr.bf16.mxu1 %v6163_v47 }
 0x730   : > { %1957 = vmatpush1.bf16.msra.mxu1 %v6161_v46 }
 0x731   : > { %1958 = vmatprep.subr.bf16.mxu1 %v6166_v48 }
 0x734   : > { %1959 = vmatpush1.bf16.msra.mxu1 %v6164_v50 }
 0x735   : > { %5827 = vmatprep.subr.bf16.mxu1 %v6511_v16 }
 0x74f   : > { %v1519_v54 = vpop.f32.mrf.mxu1 }
 0x750   : > { %v1520_v3 = vadd.f32 %v1519_v54, %v6913_v37 }
 0x751   : > { %v5789_v55 = vpop.f32.mrf.mxu1 }
 0x753   : > { %v1522_v56 = vpop.f32.mrf.mxu1 }
 0x754   : > { %v1523_v4 = vadd.f32 %v1522_v56, %v6915_v41 }
 0x755   : > { %v5790_v57 = vpop.f32.mrf.mxu1 }
 0x7df   : > { %v1639_v62 = vpop.f32.mrf.mxu1 }
 0x7e0   : > { %v1646_v7 = vadd.f32 %v1639_v62, %v1520_v3 }
 0x7e1   : > { %v5801_v63 = vpop.f32.mrf.mxu1 }
 0x7e3   : > { %v1642_v1 = vpop.f32.mrf.mxu1 }
 0x7e4   : > { %v1647_v8 = vadd.f32 %v1642_v1, %v1523_v4  ;;  %v5128_v1 = vld [vmem:[%s7787_s17] ss:$0 sm:$0xff] }
 0x7e5   : > { %v5802_v2 = vpop.f32.mrf.mxu1 }
 0x7e7   : > { %v1761_v53 = vpop.f32.mrf.mxu1 }
 0x7e8   : > { %v1768_v58 = vadd.f32 %v1761_v53, %v1646_v7  ;;  %v6168_v7 = vld [vmem:[%s7790_s20 + $0x38] sm:$0xff]  }
 0x7e9   : > { %v5813_v6 = vpop.f32.mrf.mxu1 }
 0x7ea   : > { %v6167_v6 = vld [vmem:[%s7790_s20 + $0x78] sm:$0xff]  }
 0x7eb   : > { %v1764_v9 = vpop.f32.mrf.mxu1  ;;  %5515 = vmatprep.subr.bf16.mxu0 %v6167_v6 }
 0x7ec   : > { %v1769_v11 = vadd.f32 %v1764_v9, %v1647_v8  ;;  %v6169_v8 = vld [vmem:[%s7790_s20 + $0x70] sm:$0xff]  }
 0x7ed   : > { %v5814_v13 = vpop.f32.mrf.mxu1  ;;  %v6170_v9 = vld [vmem:[%s7790_s20 + $0x30] sm:$0xff]  }
 0x7ee   : > { %v1770_v14 = vpack.c.bf16 %v1769_v11, %v1768_v58  ;;  %v6171_v58 = vld [vmem:[%s7790_s20 + $0x68] sm:$0xff]   ;;  %v6173_v13 = vld [vmem:[%s7790_s20 + $0x60] sm:$0xff]  }
 0x7ef   : > { %v6172_v11 = vld [vmem:[%s7790_s20 + $0x28] sm:$0xff]  }
 0x7f0   : > { %5824 = vmatmul.mubr.msk.bf16.vlgmr.msra.gmra.mxu0 %vm842_vm0, %v1770_v14  ;;  %v6174_v14 = vld [vmem:[%s7790_s20 + $0x20] sm:$0xff]  }
 0x7f1   : > { %5516 = vmatpush3.bf16.msra.mxu0 %v6168_v7 }
 0x7f2   : > { %5517 = vmatprep.subr.bf16.mxu0 %v6169_v8 }
 0x7f5   : > { %5518 = vmatpush3.bf16.msra.mxu0 %v6170_v9 }
 0x7f6   : > { %5519 = vmatprep.subr.bf16.mxu0 %v6171_v58 }
 0x7f9   : > { %5520 = vmatpush3.bf16.msra.mxu0 %v6172_v11 }
 0x7fa   : > { %5521 = vmatprep.subr.bf16.mxu0 %v6173_v13 }
 0x7fd   : > { %5522 = vmatpush3.bf16.msra.mxu0 %v6174_v14 }
 0x8b0   : > { %v1838_v17 = vpop.f32.mrf.mxu0 }
 0x8b1   : > { %v1839_v18 = vadd.f32 %v5121_v15, %v1838_v17  ;;  %v6176_v17 = vld [vmem:[%s7790_s20 + $0x18] sm:$0xff]  }
 0x8b2   : > { %v5825_v37 = vpop.f32.mrf.mxu0 }
 0x8b3   : > { %v6965_v41 = vadd.f32 %v6419_v19, %v1839_v18  ;;  %v6177_v18 = vld [vmem:[%s7790_s20 + $0x50] sm:$0xff]   ;;  %v6179_v19 = vld [vmem:[%s7790_s20 + $0x48] sm:$0xff]  }
 0x8b4   : > { %v1841_v20 = vpop.f32.mrf.mxu0  ;;  %v6178_v37 = vld [vmem:[%s7790_s20 + $0x10] sm:$0xff]  }
 0x8b5   : > { %v1842_v21 = vadd.f32 %v5121_v15, %v1841_v20  ;;  %v1847_v22 = vsel %vm842_vm0, %v6965_v41, 0.0  ;;  %v6175_v15 = vld [vmem:[%s7790_s20 + $0x58] sm:$0xff]   ;;  %v6180_v20 = vld [vmem:[%s7790_s20 + $0x8] sm:$0xff]  }
 0x8b6   : > { %1848 = vadd.xlane.f32.xlu0 %v1847_v22  ;;  %v5826_v23 = vpop.f32.mrf.mxu0  ;;  %5523 = vmatprep.subr.bf16.mxu0 %v6175_v15  ;;  %v6182_v22 = vld [vmem:[%s7790_s20] sm:$0xff]  }
 0x8b7   : > { %v6970_v25 = vadd.f32 %v6420_v24, %v1842_v21  ;;  %5524 = vmatpush3.bf16.msra.mxu0 %v6176_v17  ;;  %v6181_v21 = vld [vmem:[%s7790_s20 + $0x40] sm:$0xff]   ;;  %v7066_v24 = vsub.s32 1, %v6798_v0 }
 0x8b8   : > { %5525 = vmatprep.subr.bf16.mxu0 %v6177_v18  ;;  %v808_v23 = vld [vmem:[%s7789_s19] sm:$0x3] }
 0x8b9   : > { %v1850_v26 = vsel %vm842_vm0, %v6970_v25, 0.0 }
 0x8ba   : > { %1851 = vadd.xlane.f32.xlu1 %v1850_v26  ;;  %v1894_v26 = vrot.slane %v808_v23, %v6810_v5 }
 0x8bb   : > { %5526 = vmatpush3.bf16.msra.mxu0 %v6178_v37 }
 0x8bc   : > { %5527 = vmatprep.subr.bf16.mxu0 %v6179_v19  ;;  %v5138_v19 = vld [vmem:[%s7791_s21] ss:$0 sm:$0xff] }
 0x8bf   : > { %5528 = vmatpush3.bf16.msra.mxu0 %v6180_v20 }
 0x8c0   : > { %5529 = vmatprep.subr.bf16.mxu0 %v6181_v21 }
 0x8c3   : > { %5530 = vmatpush3.bf16.msra.mxu0 %v6182_v22 }
 0x8c4   : > { %5851 = vmatprep.subr.bf16.mxu0 %v6511_v16 }
 0x93f   : > { %v1849_v28 = vpop.xlane.xlu0 %1848 }
 0x940   : > { %v1853_v29 = vmul.f32 0.015625, %v1849_v28  ;;  %v1898_v28 = vrot.slane %v808_v23, %v7066_v24 }
 0x942   : > { %v1855_v30 = vsub.f32 %v6965_v41, %v1853_v29 }
 0x943   : > { %v1852_v33 = vpop.xlane.xlu1 %1851 }
 0x944   : > { %v1854_v34 = vmul.f32 0.015625, %v1852_v33  ;;  %v1857_v35 = vmul.f32 %v1855_v30, %v1855_v30 }
 0x946   : > { %v1856_v36 = vsub.f32 %v6970_v25, %v1854_v34  ;;  %v1859_v38 = vsel %vm842_vm0, %v1857_v35, 0.0 }
 0x947   : > { %1860 = vadd.xlane.f32.xlu0 %v1859_v38 }
 0x948   : > { %v1858_v39 = vmul.f32 %v1856_v36, %v1856_v36 }
 0x94a   : > { %v1862_v40 = vsel %vm842_vm0, %v1858_v39, 0.0 }
 0x94b   : > { %1863 = vadd.xlane.f32.xlu1 %v1862_v40 }
 0x9d0   : > { %v1861_v51 = vpop.xlane.xlu0 %1860 }
 0x9d1   : > { %v1865_v52 = vmul.f32 0.015625, %v1861_v51 }
 0x9d3   : > { %v1867_v54 = vadd.f32 1e-05, %v1865_v52 }
 0x9d4   : > { %v1864_v55 = vpop.xlane.xlu1 %1863 }
 0x9d5   : > { %6307 = vrsqrt.f32 %v1867_v54  ;;  %v1866_v56 = vmul.f32 0.015625, %v1864_v55 }
 0x9d7   : > { %v1868_v57 = vadd.f32 1e-05, %v1866_v56 }
 0x9d9   : > { %6309 = vrsqrt.f32 %v1868_v57 }
 0x9e2   : > { %v6308_v10 = vpop.eup %6307 }
 0x9e3   : > { %v1871_v59 = vmul.f32 %v6308_v10, %v1855_v30 }
 0x9e5   : > { %v1879_v63 = vmul.f32 %v5127_v60, %v1871_v59 }
 0x9e6   : > { %v6310_v61 = vpop.eup %6309 }
 0x9e7   : > { %v1872_v62 = vmul.f32 %v6310_v61, %v1856_v36  ;;  %v1887_v53 = vadd.f32 %v5128_v1, %v1879_v63 }
 0x9e9   : > { %v1880_v2 = vmul.f32 %v5127_v60, %v1872_v62 }
 0x9eb   : > { %v1888_v3 = vadd.f32 %v5128_v1, %v1880_v2 }
 0x9ed   : > { %v1889_v4 = vpack.c.bf16 %v1888_v3, %v1887_v53 }
 0x9ef   : > { %5137 = vmatmul.mubr.msk.bf16.vlgmr.msra.gmra.mxu1 %vm842_vm0, %v1889_v4 }
 0x9f0   : > { %5835 = vmatprep.mubr.msk.bf16.mxu1 %vm6512_vm1, %v6511_v16 }
 0xaaf   : > { %v1978_v29 = vpop.f32.mrf.mxu1 }
 0xab0   : > { %v1979_v30 = vadd.f32 %v1978_v29, %v1894_v26 }
 0xab1   : > { %v1980_v33 = vpop.f32.mrf.mxu1 }
 0xab2   : > { %v1987_v34 = vmul.f32 %v1979_v30, %v1979_v30  ;;  %v1981_v35 = vadd.f32 %v1980_v33, %v1898_v28 }
 0xab3   : > { %v1982_v36 = vpop.f32.mrf.mxu1 }
 0xab4   : > { %v1991_v38 = vmul.f32 %v1987_v34, %v1979_v30  ;;  %v1988_v39 = vmul.f32 %v1981_v35, %v1981_v35  ;;  %v1983_v40 = vadd.f32 %v1982_v36, %v1894_v26 }
 0xab5   : > { %v1984_v42 = vpop.f32.mrf.mxu1 }
 0xab6   : > { %v1995_v43 = vmul.f32 0.044715, %v1991_v38  ;;  %v1992_v44 = vmul.f32 %v1988_v39, %v1981_v35  ;;  %v1989_v32 = vmul.f32 %v1983_v40, %v1983_v40  ;;  %v1985_v46 = vadd.f32 %v1984_v42, %v1898_v28 }
 0xab8   : > { %v1999_v0 = vadd.f32 %v1995_v43, %v1979_v30  ;;  %v1996_v47 = vmul.f32 0.044715, %v1992_v44  ;;  %v1993_v48 = vmul.f32 %v1989_v32, %v1983_v40  ;;  %v1990_v50 = vmul.f32 %v1985_v46, %v1985_v46 }
 0xaba   : > { %v2003_v51 = vmul.f32 0.7978846, %v1999_v0  ;;  %v2000_v52 = vadd.f32 %v1996_v47, %v1981_v35  ;;  %v1997_v54 = vmul.f32 0.044715, %v1993_v48  ;;  %v1994_v55 = vmul.f32 %v1990_v50, %v1985_v46  ;;  %v6184_v0 = vld [vmem:[%s7780_s10 + $0x38] sm:$0xff]   ;;  %v6185_v47 = vld [vmem:[%s7843_s1 + $0x30] sm:$0xff]  }
 0xabb   : > { %v6186_v48 = vld [vmem:[%s7780_s10 + $0x30] sm:$0xff]   ;;  %v6187_v50 = vld [vmem:[%s7843_s1 + $0x28] sm:$0xff]  }
 0xabc   : > { %v2004_v56 = vmul.f32 0.7978846, %v2000_v52  ;;  %v2001_v57 = vadd.f32 %v1997_v54, %v1983_v40  ;;  %v1998_v10 = vmul.f32 0.044715, %v1994_v55  ;;  %6311 = vtanh.f32 %v2003_v51  ;;  %v6188_v51 = vld [vmem:[%s7780_s10 + $0x28] sm:$0xff]   ;;  %v6189_v52 = vld [vmem:[%s7843_s1 + $0x20] sm:$0xff]  }
 0xabd   : > { %v6190_v54 = vld [vmem:[%s7780_s10 + $0x20] sm:$0xff]   ;;  %v6421_v55 = vld [vmem:[%s7844_s30 + $0x38] sm:$0xff] }
 0xabe   : > { %6313 = vtanh.f32 %v2004_v56  ;;  %v2005_v59 = vmul.f32 0.7978846, %v2001_v57  ;;  %v2002_v60 = vadd.f32 %v1998_v10, %v1985_v46 }
 0xac0   : > { %6315 = vtanh.f32 %v2005_v59  ;;  %v2006_v61 = vmul.f32 0.7978846, %v2002_v60 }
 0xac2   : > { %6317 = vtanh.f32 %v2006_v61 }
 0xac9   : > { %v6312_v62 = vpop.eup %6311 }
 0xaca   : > { %v2011_v53 = vadd.f32 1.0, %v6312_v62 }
 0xacb   : > { %v6314_v63 = vpop.eup %6313 }
 0xacc   : > { %v2012_v1 = vadd.f32 1.0, %v6314_v63  ;;  %v2015_v9 = vmul.f32 0.5, %v2011_v53 }
 0xacd   : > { %v6316_v2 = vpop.eup %6315 }
 0xace   : > { %v2013_v3 = vadd.f32 1.0, %v6316_v2  ;;  %v2016_v8 = vmul.f32 0.5, %v2012_v1  ;;  %v2019_v15 = vmul.f32 %v2015_v9, %v1979_v30  ;;  %v5237_v1 = vld [vmem:[%s7845_s4 + $0x1] ss:$0 sm:$0xff]  ;;  %v6191_v9 = vld [vmem:[%s7847_s9 + $0x38] sm:$0xff]  }
 0xacf   : > { %v6318_v4 = vpop.eup %6317 }
 0xad0   : > { %v2017_v6 = vmul.f32 0.5, %v2013_v3  ;;  %v2014_v7 = vadd.f32 1.0, %v6318_v4  ;;  %v2020_v13 = vmul.f32 %v2016_v8, %v1981_v35  ;;  %v5238_v4 = vld [vmem:[%s7846_s8 + $0x1] ss:$0 sm:$0xff] }
 0xad2   : > { %v2018_v58 = vmul.f32 0.5, %v2014_v7  ;;  %v2021_v11 = vmul.f32 %v2017_v6, %v1983_v40 }
 0xad4   : > { %v2022_v14 = vmul.f32 %v2018_v58, %v1985_v46  ;;  %v2023_v18 = vpack.c.bf16 %v2021_v11, %v2019_v15  ;;  %v6183_v46 = vld [vmem:[%s7843_s1 + $0x38] sm:$0xff]   ;;  %v6192_v11 = vld [vmem:[%s7847_s9 + $0x30] sm:$0xff]   ;;  %v6423_v15 = vld [vmem:[%s7844_s30 + $0x28] sm:$0xff] }
 0xad5   : > { %5828 = vmatpush3.bf16.msra.mxu1 %v6183_v46 }
 0xad6   : > { %v2024_v17 = vpack.c.bf16 %v2022_v14, %v2020_v13  ;;  %5829 = vmatprep.subr.bf16.mxu1 %v6511_v16  ;;  %v6422_v13 = vld [vmem:[%s7844_s30 + $0x30] sm:$0xff]  ;;  %v6193_v14 = vld [vmem:[%s7847_s9 + $0x28] sm:$0xff]  }
 0xad8   : > { %2159 = vmatprep.mubr.bf16.mxu0 %v2024_v17  ;;  %v6424_v17 = vld [vmem:[%s7844_s30 + $0x20] sm:$0xff] }
 0xad9   : > { %2160 = vmatmul.mubr.bf16.vlgmr.msra.gmra.mxu0 %v2023_v18  ;;  %5830 = vmatpush3.bf16.msra.mxu1 %v6185_v47  ;;  %v6194_v18 = vld [vmem:[%s7847_s9 + $0x20] sm:$0xff]  }
 0xada   : > { %5859 = vmatprep.mubr.msk.bf16.mxu0 %vm6512_vm1, %v6511_v16  ;;  %5852 = vmatpush3.bf16.msra.mxu0 %v6184_v0 }
 0xadb   : > { %5853 = vmatprep.subr.bf16.mxu0 %v6511_v16  ;;  %5831 = vmatprep.subr.bf16.mxu1 %v6511_v16 }
 0xadd   : > { %5832 = vmatpush3.bf16.msra.mxu1 %v6187_v50 }
 0xade   : > { %5854 = vmatpush3.bf16.msra.mxu0 %v6186_v48  ;;  %5833 = vmatprep.subr.bf16.mxu1 %v6511_v16 }
 0xadf   : > { %5855 = vmatprep.subr.bf16.mxu0 %v6511_v16 }
 0xae1   : > { %5834 = vmatpush3.bf16.msra.mxu1 %v6189_v52 }
 0xae2   : > { %5856 = vmatpush3.bf16.msra.mxu0 %v6188_v51  ;;  %5839 = vmatprep.subr.bf16.mxu1 %v6511_v16 }
 0xae3   : > { %5857 = vmatprep.subr.bf16.mxu0 %v6511_v16 }
 0xae6   : > { %5858 = vmatpush3.bf16.msra.mxu0 %v6190_v54  ;;  %v6429_v54 = vld [vmem:[%s7850_s25 + $0x8] sm:$0xff] }
 0xae7   : > { %5882 = vmatprep.subr.mxu0 %v6421_v55 }
 0xb99   : > { %v5531_v37 = vpop.f32.mrf.mxu0 }
 0xb9b   : > { %v5532_v20 = vpop.f32.mrf.mxu0 }
 0xb9c   : > { %v5533_v21 = vadd.f32 %v5532_v20, %v5531_v37  ;;  %v6425_v37 = vld [vmem:[%s7844_s30 + $0x18] sm:$0xff]  ;;  %v6427_v20 = vld [vmem:[%s7844_s30 + $0x8] sm:$0xff] }
 0xb9d   : > { %v5534_v22 = vpop.f32.mrf.mxu0 }
 0xb9e   : > { %v2162_v23 = vadd.f32 %v5533_v21, %v5138_v19  ;;  %v6428_v21 = vld [vmem:[%s7844_s30] sm:$0xff] }
 0xb9f   : > { %v5535_v26 = vpop.f32.mrf.mxu0 }
 0xba0   : > { %v7076_v28 = vadd.f32 %v2162_v23, %v6965_v41  ;;  %v5536_v29 = vadd.f32 %v5535_v26, %v5534_v22  ;;  %v5239_v22 = vld [vmem:[%s7781_s11 + $0x1] ss:$0 sm:$0xff] }
 0xba2   : > { %v2165_v30 = vadd.f32 %v5536_v29, %v5138_v19  ;;  %v2268_v33 = vsel %vm842_vm0, %v7076_v28, 0.0  ;;  %v6426_v19 = vld [vmem:[%s7844_s30 + $0x10] sm:$0xff] }
 0xba3   : > { %2269 = vadd.xlane.f32.xlu0 %v2268_v33 }
 0xba4   : > { %v7081_v34 = vadd.f32 %v2165_v30, %v6970_v25 }
 0xba6   : > { %v2271_v35 = vsel %vm842_vm0, %v7081_v34, 0.0 }
 0xba7   : > { %2272 = vadd.xlane.f32.xlu1 %v2271_v35 }
 0xc2c   : > { %v2270_v36 = vpop.xlane.xlu0 %2269 }
 0xc2d   : > { %v2274_v38 = vmul.f32 0.015625, %v2270_v36 }
 0xc2f   : > { %v2276_v39 = vsub.f32 %v7076_v28, %v2274_v38 }
 0xc30   : > { %v2273_v40 = vpop.xlane.xlu1 %2272 }
 0xc31   : > { %v2275_v41 = vmul.f32 0.015625, %v2273_v40  ;;  %v2278_v42 = vmul.f32 %v2276_v39, %v2276_v39 }
 0xc33   : > { %v2277_v43 = vsub.f32 %v7081_v34, %v2275_v41  ;;  %v2280_v44 = vsel %vm842_vm0, %v2278_v42, 0.0  ;;  %v5251_v41 = vld [vmem:[%s7783_s13 + $0x1] ss:$0 sm:$0xff] }
 0xc34   : > { %2281 = vadd.xlane.f32.xlu0 %v2280_v44 }
 0xc35   : > { %v2279_v32 = vmul.f32 %v2277_v43, %v2277_v43 }
 0xc37   : > { %v2283_v25 = vsel %vm842_vm0, %v2279_v32, 0.0 }
 0xc38   : > { %2284 = vadd.xlane.f32.xlu1 %v2283_v25 }
 0xcbd   : > { %v2282_v56 = vpop.xlane.xlu0 %2281 }
 0xcbe   : > { %v2286_v57 = vmul.f32 0.015625, %v2282_v56  ;;  %v6430_v56 = vld [vmem:[%s7852_s3 + $0x8] sm:$0xff] }
 0xcc0   : > { %v2288_v10 = vadd.f32 1e-05, %v2286_v57 }
 0xcc1   : > { %v2285_v59 = vpop.xlane.xlu1 %2284 }
 0xcc2   : > { %6319 = vrsqrt.f32 %v2288_v10  ;;  %v2287_v60 = vmul.f32 0.015625, %v2285_v59  ;;  %v6431_v59 = vld [vmem:[%s7850_s25] sm:$0xff] }
 0xcc4   : > { %v2289_v61 = vadd.f32 1e-05, %v2287_v60 }
 0xcc6   : > { %6321 = vrsqrt.f32 %v2289_v61 }
 0xccf   : > { %v6320_v62 = vpop.eup %6319 }
 0xcd0   : > { %v2292_v63 = vmul.f32 %v6320_v62, %v2276_v39  ;;  %v6432_v62 = vld [vmem:[%s7852_s3] sm:$0xff] }
 0xcd2   : > { %v2300_v3 = vmul.f32 %v5237_v1, %v2292_v63 }
 0xcd3   : > { %v6322_v2 = vpop.eup %6321 }
 0xcd4   : > { %v2293_v53 = vmul.f32 %v6322_v2, %v2277_v43  ;;  %v2308_v7 = vadd.f32 %v5238_v4, %v2300_v3  ;;  %v5245_v43 = vld [vmem:[%s7782_s12 + $0x1] ss:$0 sm:$0xff] }
 0xcd6   : > { %v2301_v6 = vmul.f32 %v5237_v1, %v2293_v53 }
 0xcd8   : > { %v2309_v8 = vadd.f32 %v5238_v4, %v2301_v6 }
 0xcda   : > { %v2310_v58 = vpack.c.bf16 %v2309_v8, %v2308_v7 }
 0xcdc   : > { %5836 = vmatmul.mubr.msk.bf16.vlgmr.msra.gmra.mxu1 %vm842_vm0, %v2310_v58  ;;  %5860 = vmatmul.mubr.msk.bf16.vlgmr.msra.gmra.mxu0 %vm842_vm0, %v2310_v58 }
 0xcdd   : > { %5840 = vmatpush3.bf16.msra.mxu1 %v6191_v9  ;;  %5847 = vmatprep.mubr.msk.bf16.mxu1 %vm6512_vm1, %v6511_v16 }
 0xcde   : > { %5841 = vmatprep.subr.bf16.mxu1 %v6511_v16  ;;  %5883 = vmatpush3.msra.mxu0 %v6421_v55 }
 0xcdf   : > { %5884 = vmatprep.subr.mxu0 %v6422_v13 }
 0xce0   : > { %5885 = vmatpush3.msra.mxu0 %v6422_v13 }
 0xce1   : > { %5842 = vmatpush3.bf16.msra.mxu1 %v6192_v11  ;;  %5886 = vmatprep.subr.mxu0 %v6423_v15 }
 0xce2   : > { %5843 = vmatprep.subr.bf16.mxu1 %v6511_v16  ;;  %5887 = vmatpush3.msra.mxu0 %v6423_v15 }
 0xce3   : > { %5888 = vmatprep.subr.mxu0 %v6424_v17 }
 0xce4   : > { %5889 = vmatpush3.msra.mxu0 %v6424_v17 }
 0xce5   : > { %5844 = vmatpush3.bf16.msra.mxu1 %v6193_v14  ;;  %5890 = vmatprep.subr.mxu0 %v6425_v37 }
 0xce6   : > { %5845 = vmatprep.subr.bf16.mxu1 %v6511_v16  ;;  %5891 = vmatpush3.msra.mxu0 %v6425_v37 }
 0xce7   : > { %5892 = vmatprep.subr.mxu0 %v6426_v19 }
 0xce8   : > { %5893 = vmatpush3.msra.mxu0 %v6426_v19 }
 0xce9   : > { %5846 = vmatpush3.bf16.msra.mxu1 %v6194_v18  ;;  %5894 = vmatprep.subr.mxu0 %v6427_v20 }
 0xcea   : > { %5863 = vmatprep.subr.mxu1 %v6421_v55  ;;  %5895 = vmatpush3.msra.mxu0 %v6427_v20 }
 0xceb   : > { %5896 = vmatprep.subr.mxu0 %v6428_v21 }
 0xcec   : > { %5848 = vmatmul.mubr.msk.bf16.vlgmr.msra.gmra.mxu1 %vm842_vm0, %v2310_v58  ;;  %5897 = vmatpush3.msra.mxu0 %v6428_v21 }
 0xced   : > { %5864 = vmatpush3.msra.mxu1 %v6421_v55  ;;  %5913 = vmatprep.subr.bf16.mxu0 %v6511_v16 }
 0xcee   : > { %5865 = vmatprep.subr.mxu1 %v6422_v13 }
 0xcef   : > { %5866 = vmatpush3.msra.mxu1 %v6422_v13 }
 0xcf0   : > { %5867 = vmatprep.subr.mxu1 %v6423_v15 }
 0xcf1   : > { %5868 = vmatpush3.msra.mxu1 %v6423_v15 }
 0xcf2   : > { %5869 = vmatprep.subr.mxu1 %v6424_v17 }
 0xcf3   : > { %5870 = vmatpush3.msra.mxu1 %v6424_v17 }
 0xcf4   : > { %5871 = vmatprep.subr.mxu1 %v6425_v37 }
 0xcf5   : > { %5872 = vmatpush3.msra.mxu1 %v6425_v37 }
 0xcf6   : > { %5873 = vmatprep.subr.mxu1 %v6426_v19 }
 0xcf7   : > { %5874 = vmatpush3.msra.mxu1 %v6426_v19 }
 0xcf8   : > { %5875 = vmatprep.subr.mxu1 %v6427_v20 }
 0xcf9   : > { %5876 = vmatpush3.msra.mxu1 %v6427_v20 }
 0xcfa   : > { %5877 = vmatprep.subr.mxu1 %v6428_v21 }
 0xcfb   : > { %5878 = vmatpush3.msra.mxu1 %v6428_v21 }
 0xcfc   : > { %5901 = vmatprep.subr.bf16.mxu1 %v6511_v16 }
 0xd9c   : > { %v2378_v23 = vpop.f32.mrf.mxu1  ;;  %v2520_v26 = vpop.f32.mrf.mxu0 }
 0xd9d   : > { %v2379_v29 = vadd.f32 %v5239_v22, %v2378_v23  ;;  %v2521_v44 = vadd.f32 %v5251_v41, %v2520_v26 }
 0xd9e   : > { %v5837_v30 = vpop.f32.mrf.mxu1  ;;  %v5861_v33 = vpop.f32.mrf.mxu0 }
 0xd9f   : > { %5879 = vmatprep.mubr.msk.f32.mxu1 %vm842_vm0, %v2379_v29  ;;  %v2527_v60 = vmul.f32 %v6431_v59, %v2379_v29  ;;  %v6433_v29 = vld [vmem:[%s7854_s24] sm:$0xff] }
 0xda0   : > { %v2381_v35 = vpop.f32.mrf.mxu1  ;;  %v2523_v36 = vpop.f32.mrf.mxu0 }
 0xda1   : > { %v2382_v38 = vadd.f32 %v5239_v22, %v2381_v35  ;;  %v2524_v42 = vadd.f32 %v5251_v41, %v2523_v36 }
 0xda2   : > { %v5838_v39 = vpop.f32.mrf.mxu1  ;;  %v5862_v40 = vpop.f32.mrf.mxu0 }
 0xda3   : > { %5880 = vmatmul.mubr.msk.f32.vlgmr.msra.gmra.mxu1 %vm842_vm0, %v2382_v38  ;;  %v7185_v46 = vpack.c.bf16 %v2524_v42, %v2521_v44  ;;  %v2528_v55 = vmul.f32 %v6429_v54, %v2382_v38  ;;  %v6434_v39 = vld [vmem:[%s7854_s24 + $0x8] sm:$0xff] }
 0xda4   : > { %5903 = vmatprep.mubr.msk.bf16.mxu1 %vm6512_vm1, %v6511_v16 }
 0xda5   : > { %v2846_v51 = vmul.bf16 %v7185_v46, %v6815_v12 }
 0xdac   : > { %v2449_v32 = vpop.f32.mrf.mxu1 }
 0xdad   : > { %v2450_v25 = vadd.f32 %v5245_v43, %v2449_v32 }
 0xdae   : > { %v5849_v0 = vpop.f32.mrf.mxu1 }
 0xdaf   : > { %5898 = vmatprep.mubr.msk.f32.mxu0 %vm842_vm0, %v2450_v25  ;;  %v2614_v8 = vmul.f32 %v6431_v59, %v2450_v25 }
 0xdb0   : > { %v2452_v47 = vpop.f32.mrf.mxu1 }
 0xdb1   : > { %v2453_v48 = vadd.f32 %v5245_v43, %v2452_v47 }
 0xdb2   : > { %v5850_v50 = vpop.f32.mrf.mxu1 }
 0xdb3   : > { %5899 = vmatmul.mubr.msk.f32.vlgmr.msra.gmra.mxu0 %vm842_vm0, %v2453_v48  ;;  %v2615_v9 = vmul.f32 %v6429_v54, %v2453_v48 }
 0xdb4   : > { %5914 = vmatpush3.bf16.msra.mxu0 %v2846_v51  ;;  %5915 = vmatprep.mubr.msk.bf16.mxu0 %vm6512_vm1, %v6511_v16 }
 0xdb5   : > { %5919 = vmatprep.subr.bf16.mxu0 %v6511_v16 }
 0xe63   : > { %v5881_v52 = vpop.f32.mrf.mxu1 }
 0xe64   : > { %v2611_v57 = vmul.f32 %v6430_v56, %v5881_v52 }
 0xe65   : > { %v2601_v10 = vpop.f32.mrf.mxu1 }
 0xe66   : > { %v2613_v61 = vadd.f32 %v2611_v57, %v2528_v55  ;;  %v2610_v63 = vmul.f32 %v6432_v62, %v2601_v10 }
 0xe68   : > { %v2612_v1 = vadd.f32 %v2610_v63, %v2527_v60  ;;  %v2702_v2 = vmul.f32 0.25, %v2613_v61 }
 0xe6a   : > { %v2701_v53 = vmul.f32 0.25, %v2612_v1 }
 0xe6c   : > { %v2703_v3 = vpack.c.bf16 %v2702_v2, %v2701_v53 }
 0xe6e   : > { %v2706_v17 = vmul.bf16 %v2703_v3, %v6847_v45  ;;  %v2778_v18 = vmul.bf16 %v2703_v3, %v6815_v12  ;;  %v2935_v37 = vmul.bf16 %v2703_v3, %v6893_v27  ;;  %v3050_v19 = vmul.bf16 %v2703_v3, %v6906_v31 }
 0xe73   : > { %v5900_v4 = vpop.f32.mrf.mxu0 }
 0xe74   : > { %v2698_v6 = vmul.f32 %v6430_v56, %v5900_v4 }
 0xe75   : > { %v2688_v7 = vpop.f32.mrf.mxu0 }
 0xe76   : > { %v2697_v58 = vmul.f32 %v6432_v62, %v2688_v7  ;;  %v2700_v11 = vadd.f32 %v2698_v6, %v2615_v9 }
 0xe78   : > { %v2699_v13 = vadd.f32 %v2697_v58, %v2614_v8 }
 0xe7a   : > { %v2704_v14 = vpack.c.bf16 %v2700_v11, %v2699_v13 }
 0xe7c   : > { %v2711_v15 = vsel %vm842_vm0, %v2704_v14, 0 }
 0xe7d   : > { %5902 = vmatpush3.bf16.xpose.msra.mxu1 %v2711_v15 }
 0xe7e   : > { %5907 = vmatprep.subr.bf16.mxu1 %v6511_v16 }
 0xe84   : > { %5904 = vmatmul.mubr.msk.bf16.vlgmr.msra.gmra.mxu1 %vm842_vm0, %v2706_v17 }
 0xe85   : > { %5908 = vmatpush3.bf16.xpose.msra.mxu1 %v2711_v15  ;;  %5909 = vmatprep.mubr.msk.bf16.mxu1 %vm6512_vm1, %v6511_v16 }
 0xe86   : > { %5925 = vmatprep.subr.bf16.mxu1 %v6511_v16 }
 0xe8c   : > { %5910 = vmatmul.mubr.msk.bf16.vlgmr.msra.gmra.mxu1 %vm842_vm0, %v2778_v18 }
 0xe8d   : > { %5926 = vmatpush3.bf16.xpose.msra.mxu1 %v2711_v15  ;;  %5927 = vmatprep.mubr.msk.bf16.mxu1 %vm6512_vm1, %v6511_v16 }
 0xe8e   : > { %5937 = vmatprep.subr.bf16.mxu1 %v6511_v16 }
 0xe94   : > { %5928 = vmatmul.mubr.msk.bf16.vlgmr.msra.gmra.mxu1 %vm842_vm0, %v2935_v37 }
 0xe95   : > { %5938 = vmatpush3.bf16.xpose.msra.mxu1 %v2711_v15  ;;  %5939 = vmatprep.mubr.msk.bf16.mxu1 %vm6512_vm1, %v6511_v16 }
 0xe96   : > { %5949 = vmatprep.subr.bf16.mxu1 %v6511_v16 }
 0xe9c   : > { %5940 = vmatmul.mubr.msk.bf16.vlgmr.msra.gmra.mxu1 %vm842_vm0, %v3050_v19 }
 0xe9d   : > { %5957 = vmatprep.mubr.msk.bf16.mxu1 %vm6512_vm1, %v6511_v16 }
 0xf44   : > { %v2747_v20 = vpop.f32.mrf.mxu1 }
 0xf45   : > { %v2748_v35 = vadd.f32 %v6433_v29, %v2747_v20 }
 0xf46   : > { %v5905_v21 = vpop.f32.mrf.mxu1 }
 0xf47   : > { %v2754_v43 = vsel %vm1337_vm2, %v2748_v35, -inf }
 0xf48   : > { %v2750_v22 = vpop.f32.mrf.mxu1 }
 0xf49   : > { %v2751_v42 = vadd.f32 %v6434_v39, %v2750_v22 }
 0xf4a   : > { %v5906_v23 = vpop.f32.mrf.mxu1 }
 0xf4b   : > { %v2757_v47 = vsel %vm1337_vm2, %v2751_v42, -inf }
 0xf4c   : > { %v2816_v26 = vpop.f32.mrf.mxu1 }
 0xf4d   : > { %v2817_v30 = vadd.f32 %v6433_v29, %v2816_v26 }
 0xf4e   : > { %v5911_v33 = vpop.f32.mrf.mxu1 }
 0xf4f   : > { %v2823_v36 = vsel %vm1337_vm2, %v2817_v30, -inf }
 0xf50   : > { %2824 = vmax.xlane.f32.xlu0 %v2823_v36  ;;  %v2819_v38 = vpop.f32.mrf.mxu1 }
 0xf51   : > { %v2820_v40 = vadd.f32 %v6434_v39, %v2819_v38 }
 0xf52   : > { %v5912_v41 = vpop.f32.mrf.mxu1 }
 0xf53   : > { %v2826_v44 = vsel %vm1337_vm2, %v2820_v40, -inf }
 0xf54   : > { %2755 = vmax.xlane.f32.xlu0 %v2754_v43  ;;  %2827 = vmax.xlane.f32.xlu1 %v2826_v44  ;;  %v2973_v32 = vpop.f32.mrf.mxu1 }
 0xf55   : > { %v2974_v25 = vadd.f32 %v6433_v29, %v2973_v32 }
 0xf56   : > { %v5929_v0 = vpop.f32.mrf.mxu1 }
 0xf57   : > { %v2980_v48 = vsel %vm1337_vm2, %v2974_v25, -inf }
 0xf58   : > { %2758 = vmax.xlane.f32.xlu1 %v2757_v47  ;;  %2981 = vmax.xlane.f32.xlu0 %v2980_v48  ;;  %v2976_v50 = vpop.f32.mrf.mxu1 }
 0xf59   : > { %v2977_v51 = vadd.f32 %v6434_v39, %v2976_v50 }
 0xf5a   : > { %v5930_v52 = vpop.f32.mrf.mxu1 }
 0xf5b   : > { %v2983_v54 = vsel %vm1337_vm2, %v2977_v51, -inf }
 0xf5c   : > { %2984 = vmax.xlane.f32.xlu1 %v2983_v54  ;;  %v3088_v55 = vpop.f32.mrf.mxu1 }
 0xf5d   : > { %v3089_v56 = vadd.f32 %v6433_v29, %v3088_v55 }
 0xf5e   : > { %v5941_v57 = vpop.f32.mrf.mxu1 }
 0xf5f   : > { %v3095_v10 = vsel %vm1337_vm2, %v3089_v56, -inf }
 0xf60   : > { %3096 = vmax.xlane.f32.xlu0 %v3095_v10  ;;  %v3091_v59 = vpop.f32.mrf.mxu1 }
 0xf61   : > { %v3092_v60 = vadd.f32 %v6434_v39, %v3091_v59 }
 0xf62   : > { %v5942_v61 = vpop.f32.mrf.mxu1 }
 0xf63   : > { %v3098_v62 = vsel %vm1337_vm2, %v3092_v60, -inf }
 0xf64   : > { %3099 = vmax.xlane.f32.xlu1 %v3098_v62  ;;  %v2777_v62 = vmul.bf16 %v7185_v46, %v6847_v45 }
 0xfd9   : > { %v2825_v63 = vpop.xlane.xlu0 %2824 }
 0xfda   : > { %v2829_v1 = vsub.f32 %v2817_v30, %v2825_v63 }
 0xfdc   : > { %v2831_v2 = vmul.f32 1.442695, %v2829_v1 }
 0xfdd   : > { %v2756_v53 = vpop.xlane.xlu0 %2755  ;;  %v2828_v3 = vpop.xlane.xlu1 %2827 }
 0xfde   : > { %6323 = vpow2.f32 %v2831_v2  ;;  %v2760_v4 = vsub.f32 %v2748_v35, %v2756_v53  ;;  %v2830_v6 = vsub.f32 %v2820_v40, %v2828_v3 }
 0xfe0   : > { %v2762_v7 = vmul.f32 1.442695, %v2760_v4  ;;  %v2833_v8 = vmul.f32 1.442695, %v2830_v6 }
 0xfe1   : > { %v2759_v9 = vpop.xlane.xlu1 %2758  ;;  %v2982_v58 = vpop.xlane.xlu0 %2981 }
 0xfe2   : > { %6325 = vpow2.f32 %v2762_v7  ;;  %v2761_v11 = vsub.f32 %v2751_v42, %v2759_v9  ;;  %v2986_v13 = vsub.f32 %v2974_v25, %v2982_v58  ;;  %v3003_v7 = vmul.bf16 %v7185_v46, %v6893_v27 }
 0xfe3   : > { %6327 = vpow2.f32 %v2833_v8 }
 0xfe4   : > { %v2764_v14 = vmul.f32 1.442695, %v2761_v11  ;;  %v2988_v15 = vmul.f32 1.442695, %v2986_v13 }
 0xfe5   : > { %v2985_v17 = vpop.xlane.xlu1 %2984 }
 0xfe6   : > { %6329 = vpow2.f32 %v2764_v14  ;;  %v2987_v18 = vsub.f32 %v2977_v51, %v2985_v17  ;;  %v3118_v14 = vmul.bf16 %v7185_v46, %v6906_v31  ;;  %v6196_v46 = vld [vmem:[%s7784_s14 + $0x30] sm:$0xff]  }
 0xfe7   : > { %6331 = vpow2.f32 %v2988_v15 }
 0xfe8   : > { %v2990_v37 = vmul.f32 1.442695, %v2987_v18 }
 0xfe9   : > { %v3097_v19 = vpop.xlane.xlu0 %3096 }
 0xfea   : > { %6333 = vpow2.f32 %v2990_v37  ;;  %v3101_v20 = vsub.f32 %v3089_v56, %v3097_v19  ;;  %v6195_v19 = vld [vmem:[%s7784_s14 + $0x38] sm:$0xff]  }
 0xfeb   : > { %v6324_v21 = vpop.eup %6323  ;;  %5950 = vmatpush3.bf16.msra.mxu1 %v6195_v19 }
 0xfec   : > { %v3103_v22 = vmul.f32 1.442695, %v3101_v20  ;;  %v2835_v23 = vsel %vm1337_vm2, %v6324_v21, 0.0  ;;  %5951 = vmatprep.subr.bf16.mxu1 %v6511_v16  ;;  %v6197_v20 = vld [vmem:[%s7784_s14 + $0x28] sm:$0xff]  }
 0xfed   : > { %2836 = vadd.xlane.f32.xlu0 %v2835_v23  ;;  %v3100_v26 = vpop.xlane.xlu1 %3099 }
 0xfee   : > { %6335 = vpow2.f32 %v3103_v22  ;;  %v3102_v29 = vsub.f32 %v3092_v60, %v3100_v26 }
 0xfef   : > { %v6326_v30 = vpop.eup %6325  ;;  %5952 = vmatpush3.bf16.msra.mxu1 %v6196_v46 }
 0xff0   : > { %v6328_v33 = vpop.eup %6327  ;;  %v3105_v35 = vmul.f32 1.442695, %v3102_v29  ;;  %v2766_v36 = vsel %vm1337_vm2, %v6326_v30, 0.0  ;;  %5953 = vmatprep.subr.bf16.mxu1 %v6511_v16 }
 0xff1   : > { %2767 = vadd.xlane.f32.xlu0 %v2766_v36  ;;  %v2838_v38 = vsel %vm1337_vm2, %v6328_v33, 0.0 }
 0xff2   : > { %6337 = vpow2.f32 %v3105_v35  ;;  %2839 = vadd.xlane.f32.xlu1 %v2838_v38 }
 0xff3   : > { %v6330_v39 = vpop.eup %6329  ;;  %5954 = vmatpush3.bf16.msra.mxu1 %v6197_v20 }
 0xff4   : > { %v6332_v40 = vpop.eup %6331  ;;  %v2769_v41 = vsel %vm1337_vm2, %v6330_v39, 0.0  ;;  %5955 = vmatprep.subr.bf16.mxu1 %v6511_v16 }
 0xff5   : > { %v2992_v42 = vsel %vm1337_vm2, %v6332_v40, 0.0 }
 0xff6   : > { %2993 = vadd.xlane.f32.xlu0 %v2992_v42  ;;  %2770 = vadd.xlane.f32.xlu1 %v2769_v41 }
 0xff7   : > { %v6334_v43 = vpop.eup %6333 }
 0xff8   : > { %v2995_v44 = vsel %vm1337_vm2, %v6334_v43, 0.0 }
 0xffa   : > { %2996 = vadd.xlane.f32.xlu1 %v2995_v44 }
 0xffb   : > { %v6336_v32 = vpop.eup %6335 }
 0xffc   : > { %v3107_v25 = vsel %vm1337_vm2, %v6336_v32, 0.0 }
 0xffd   : > { %3108 = vadd.xlane.f32.xlu0 %v3107_v25 }
 0xfff   : > { %v6338_v0 = vpop.eup %6337 }
0x1000   : > { %v3110_v47 = vsel %vm1337_vm2, %v6338_v0, 0.0 }
0x1001   : > { %3111 = vadd.xlane.f32.xlu1 %v3110_v47 }
0x1076   : > { %v2837_v48 = vpop.xlane.xlu0 %2836 }
0x1077   : > { %6339 = vrcp.f32 %v2837_v48 }
0x107a   : > { %v2768_v51 = vpop.xlane.xlu0 %2767 }
0x107b   : > { %v2840_v50 = vpop.xlane.xlu1 %2839 }
0x107c   : > { %6341 = vrcp.f32 %v2840_v50 }
0x107f   : > { %v2771_v52 = vpop.xlane.xlu1 %2770  ;;  %v2994_v56 = vpop.xlane.xlu0 %2993 }
0x1080   : > { %6343 = vrcp.f32 %v2771_v52 }
0x1081   : > { %6345 = vrcp.f32 %v2768_v51 }
0x1083   : > { %v2997_v54 = vpop.xlane.xlu1 %2996 }
0x1084   : > { %v6340_v55 = vpop.eup %6339  ;;  %6347 = vrcp.f32 %v2997_v54  ;;  %v5269_v54 = vld [vmem:[%s7785_s15 + $0x1] ss:$0 sm:$0xff] }
0x1085   : > { %6349 = vrcp.f32 %v2994_v56  ;;  %v2842_v10 = vmul.f32 %v6340_v55, %v6324_v21  ;;  %v6198_v21 = vld [vmem:[%s7784_s14 + $0x20] sm:$0xff]  }
0x1086   : > { %v3109_v2 = vpop.xlane.xlu0 %3108  ;;  %5956 = vmatpush3.bf16.msra.mxu1 %v6198_v21 }
0x1089   : > { %v6342_v57 = vpop.eup %6341 }
0x108a   : > { %v2844_v59 = vmul.f32 %v6342_v57, %v6328_v33  ;;  %v3112_v61 = vpop.xlane.xlu1 %3111 }
0x108b   : > { %6351 = vrcp.f32 %v3112_v61 }
0x108c   : > { %v2845_v60 = vpack.c.bf16 %v2844_v59, %v2842_v10  ;;  %6353 = vrcp.f32 %v3109_v2 }
0x108d   : > { %v6344_v63 = vpop.eup %6343 }
0x108e   : > { %5916 = vmatmul.mubr.msk.bf16.vlgmr.msra.gmra.mxu0 %vm1337_vm2, %v2845_v60  ;;  %v6346_v1 = vpop.eup %6345  ;;  %v2775_v53 = vmul.f32 %v6344_v63, %v6330_v39 }
0x108f   : > { %5920 = vmatpush3.bf16.msra.mxu0 %v2777_v62  ;;  %5921 = vmatprep.mubr.msk.bf16.mxu0 %vm6512_vm1, %v6511_v16  ;;  %v2773_v3 = vmul.f32 %v6346_v1, %v6326_v30 }
0x1090   : > { %5931 = vmatprep.subr.bf16.mxu0 %v6511_v16 }
0x1091   : > { %v2776_v4 = vpack.c.bf16 %v2775_v53, %v2773_v3  ;;  %v6348_v6 = vpop.eup %6347 }
0x1092   : > { %v6350_v8 = vpop.eup %6349  ;;  %v3001_v9 = vmul.f32 %v6348_v6, %v6334_v43 }
0x1093   : > { %v2999_v58 = vmul.f32 %v6350_v8, %v6332_v40 }
0x1095   : > { %v3002_v11 = vpack.c.bf16 %v3001_v9, %v2999_v58  ;;  %v6201_v58 = vld [vmem:[%s7788_s18 + $0x74] ss:$8 sps:$4 sm:$0xff]  }
0x1096   : > { %5922 = vmatmul.mubr.msk.bf16.vlgmr.msra.gmra.mxu0 %vm1337_vm2, %v2776_v4 }
0x1097   : > { %5932 = vmatpush3.bf16.msra.mxu0 %v3003_v7  ;;  %5933 = vmatprep.mubr.msk.bf16.mxu0 %vm6512_vm1, %v6511_v16 }
0x1098   : > { %5943 = vmatprep.subr.bf16.mxu0 %v6511_v16  ;;  %v6352_v13 = vpop.eup %6351 }
0x1099   : > { %v6354_v15 = vpop.eup %6353  ;;  %v3116_v17 = vmul.f32 %v6352_v13, %v6338_v0  ;;  %v6204_v13 = vld [vmem:[%s7788_s18 + $0x64] ss:$8 sps:$4 sm:$0xff]  }
0x109a   : > { %v3114_v18 = vmul.f32 %v6354_v15, %v6336_v32  ;;  %v6207_v15 = vld [vmem:[%s7788_s18 + $0x54] ss:$8 sps:$4 sm:$0xff]  }
0x109c   : > { %v3117_v37 = vpack.c.bf16 %v3116_v17, %v3114_v18  ;;  %v6205_v17 = vld [vmem:[%s7788_s18 + $0x50] ss:$8 sps:$4 sm:$0xff]   ;;  %v6210_v18 = vld [vmem:[%s7788_s18 + $0x44] ss:$8 sps:$4 sm:$0xff]  }
0x109e   : > { %5934 = vmatmul.mubr.msk.bf16.vlgmr.msra.gmra.mxu0 %vm1337_vm2, %v3002_v11  ;;  %v6199_v11 = vld [vmem:[%s7788_s18 + $0x70] ss:$8 sps:$4 sm:$0xff]  }
0x109f   : > { %5944 = vmatpush3.bf16.msra.mxu0 %v3118_v14  ;;  %5945 = vmatprep.mubr.msk.bf16.mxu0 %vm6512_vm1, %v6511_v16  ;;  %v6202_v14 = vld [vmem:[%s7788_s18 + $0x60] ss:$8 sps:$4 sm:$0xff]  }
0x10a0   : > { %3347 = vmatprep.subr.bf16.mxu0 %v6201_v58 }
0x10a6   : > { %5946 = vmatmul.mubr.msk.bf16.vlgmr.msra.gmra.mxu0 %vm1337_vm2, %v3117_v37  ;;  %v6208_v37 = vld [vmem:[%s7788_s18 + $0x40] ss:$8 sps:$4 sm:$0xff]  }
0x10a7   : > { %3371 = vmatprep.mubr.bf16.mxu0 %v6513_v49  ;;  %3348 = vmatpush1.bf16.msra.mxu0 %v6199_v11 }
0x10a8   : > { %3349 = vmatprep.subr.bf16.mxu0 %v6204_v13 }
0x10ab   : > { %3350 = vmatpush1.bf16.msra.mxu0 %v6202_v14 }
0x10ac   : > { %3351 = vmatprep.subr.bf16.mxu0 %v6207_v15 }
0x10af   : > { %3352 = vmatpush1.bf16.msra.mxu0 %v6205_v17 }
0x10b0   : > { %3353 = vmatprep.subr.bf16.mxu0 %v6210_v18 }
0x10b3   : > { %3354 = vmatpush1.bf16.msra.mxu0 %v6208_v37 }
0x10b4   : > { %5961 = vmatprep.subr.bf16.mxu0 %v6511_v16 }
0x114e   : > { %v2884_v22 = vpop.f32.mrf.mxu0 }
0x1150   : > { %v5917_v23 = vpop.f32.mrf.mxu0 }
0x1152   : > { %v2887_v26 = vpop.f32.mrf.mxu0 }
0x1154   : > { %v5918_v29 = vpop.f32.mrf.mxu0 }
0x1156   : > { %v2928_v30 = vpop.f32.mrf.mxu0 }
0x1157   : > { %v2929_v43 = vadd.f32 %v2928_v30, %v2884_v22  ;;  %v5275_v30 = vld [vmem:[%s7786_s16 + $0x1] ss:$0 sm:$0xff] }
0x1158   : > { %v5923_v33 = vpop.f32.mrf.mxu0 }
0x115a   : > { %v2931_v35 = vpop.f32.mrf.mxu0 }
0x115b   : > { %v2932_v44 = vadd.f32 %v2931_v35, %v2887_v26 }
0x115c   : > { %v5924_v36 = vpop.f32.mrf.mxu0 }
0x115e   : > { %v3041_v38 = vpop.f32.mrf.mxu0 }
0x115f   : > { %v3048_v25 = vadd.f32 %v3041_v38, %v2929_v43  ;;  %v5276_v38 = vld [vmem:[%s7787_s17 + $0x1] ss:$0 sm:$0xff]  ;;  %v6211_v43 = vld [vmem:[%s7790_s20 + $0xf8] sm:$0xff]  }
0x1160   : > { %v5935_v39 = vpop.f32.mrf.mxu0  ;;  %5593 = vmatprep.subr.bf16.mxu1 %v6211_v43 }
0x1162   : > { %v3044_v40 = vpop.f32.mrf.mxu0 }
0x1163   : > { %v3049_v0 = vadd.f32 %v3044_v40, %v2932_v44  ;;  %v6212_v44 = vld [vmem:[%s7790_s20 + $0xb8] sm:$0xff]  }
0x1164   : > { %v5936_v41 = vpop.f32.mrf.mxu0 }
0x1166   : > { %v3156_v42 = vpop.f32.mrf.mxu0 }
0x1167   : > { %v3163_v48 = vadd.f32 %v3156_v42, %v3048_v25  ;;  %v6214_v25 = vld [vmem:[%s7790_s20 + $0xb0] sm:$0xff]  }
0x1168   : > { %v5947_v32 = vpop.f32.mrf.mxu0 }
0x1169   : > { %v6213_v32 = vld [vmem:[%s7790_s20 + $0xf0] sm:$0xff]  }
0x116a   : > { %v3159_v47 = vpop.f32.mrf.mxu0 }
0x116b   : > { %v3164_v50 = vadd.f32 %v3159_v47, %v3049_v0  ;;  %v6215_v0 = vld [vmem:[%s7790_s20 + $0xe8] sm:$0xff]  }
0x116c   : > { %v5948_v51 = vpop.f32.mrf.mxu0  ;;  %v6216_v47 = vld [vmem:[%s7790_s20 + $0xa8] sm:$0xff]  }
0x116d   : > { %v3165_v52 = vpack.c.bf16 %v3164_v50, %v3163_v48  ;;  %v6217_v48 = vld [vmem:[%s7790_s20 + $0xe0] sm:$0xff]   ;;  %v6219_v51 = vld [vmem:[%s7790_s20 + $0xd8] sm:$0xff]  }
0x116e   : > { %v6218_v50 = vld [vmem:[%s7790_s20 + $0xa0] sm:$0xff]  }
0x116f   : > { %5958 = vmatmul.mubr.msk.bf16.vlgmr.msra.gmra.mxu1 %vm842_vm0, %v3165_v52  ;;  %v6220_v52 = vld [vmem:[%s7790_s20 + $0x98] sm:$0xff]  }
0x1170   : > { %5594 = vmatpush3.bf16.msra.mxu1 %v6212_v44 }
0x1171   : > { %5595 = vmatprep.subr.bf16.mxu1 %v6213_v32 }
0x1174   : > { %5596 = vmatpush3.bf16.msra.mxu1 %v6214_v25 }
0x1175   : > { %5597 = vmatprep.subr.bf16.mxu1 %v6215_v0 }
0x1178   : > { %5598 = vmatpush3.bf16.msra.mxu1 %v6216_v47 }
0x1179   : > { %5599 = vmatprep.subr.bf16.mxu1 %v6217_v48 }
0x117c   : > { %5600 = vmatpush3.bf16.msra.mxu1 %v6218_v50 }
0x117d   : > { %5601 = vmatprep.subr.bf16.mxu1 %v6219_v51 }
0x1180   : > { %5602 = vmatpush3.bf16.msra.mxu1 %v6220_v52 }
0x122f   : > { %v3233_v55 = vpop.f32.mrf.mxu1 }
0x1230   : > { %v3234_v56 = vadd.f32 %v5269_v54, %v3233_v55  ;;  %v6222_v55 = vld [vmem:[%s7790_s20 + $0x90] sm:$0xff]  }
0x1231   : > { %v5959_v57 = vpop.f32.mrf.mxu1 }
0x1232   : > { %v7288_v10 = vadd.f32 %v3234_v56, %v7076_v28  ;;  %v6223_v56 = vld [vmem:[%s7790_s20 + $0xc8] sm:$0xff]  }
0x1233   : > { %v3236_v59 = vpop.f32.mrf.mxu1  ;;  %v6224_v57 = vld [vmem:[%s7790_s20 + $0x88] sm:$0xff]  }
0x1234   : > { %v3237_v60 = vadd.f32 %v5269_v54, %v3236_v59  ;;  %v3242_v61 = vsel %vm842_vm0, %v7288_v10, 0.0  ;;  %v6221_v54 = vld [vmem:[%s7790_s20 + $0xd0] sm:$0xff]   ;;  %v6225_v59 = vld [vmem:[%s7790_s20 + $0xc0] sm:$0xff]  }
0x1235   : > { %3243 = vadd.xlane.f32.xlu0 %v3242_v61  ;;  %v5960_v62 = vpop.f32.mrf.mxu1  ;;  %5603 = vmatprep.subr.bf16.mxu1 %v6221_v54  ;;  %v5203_v61 = vld [vmem:[%s7789_s19 + $0x2] sm:$0x3] }
0x1236   : > { %v7293_v63 = vadd.f32 %v3237_v60, %v7081_v34  ;;  %5604 = vmatpush3.bf16.msra.mxu1 %v6222_v55  ;;  %v6226_v60 = vld [vmem:[%s7790_s20 + $0x80] sm:$0xff]   ;;  %v3289_v62 = vrot.slane %v5203_v61, %v6810_v5 }
0x1237   : > { %5605 = vmatprep.subr.bf16.mxu1 %v6223_v56  ;;  %v5286_v56 = vld [vmem:[%s7791_s21 + $0x1] ss:$0 sm:$0xff] }
0x1238   : > { %v3245_v1 = vsel %vm842_vm0, %v7293_v63, 0.0 }
0x1239   : > { %3246 = vadd.xlane.f32.xlu1 %v3245_v1  ;;  %v3293_v1 = vrot.slane %v5203_v61, %v7066_v24 }
0x123a   : > { %5606 = vmatpush3.bf16.msra.mxu1 %v6224_v57 }
0x123b   : > { %5607 = vmatprep.subr.bf16.mxu1 %v6225_v59 }
0x123e   : > { %5608 = vmatpush3.bf16.msra.mxu1 %v6226_v60 }
0x123f   : > { %5985 = vmatprep.subr.bf16.mxu1 %v6511_v16 }
0x12be   : > { %v3244_v2 = vpop.xlane.xlu0 %3243 }
0x12bf   : > { %v3248_v53 = vmul.f32 0.015625, %v3244_v2 }
0x12c1   : > { %v3250_v3 = vsub.f32 %v7288_v10, %v3248_v53 }
0x12c2   : > { %v3247_v28 = vpop.xlane.xlu1 %3246 }
0x12c3   : > { %v3249_v4 = vmul.f32 0.015625, %v3247_v28  ;;  %v3252_v6 = vmul.f32 %v3250_v3, %v3250_v3 }
0x12c5   : > { %v3251_v7 = vsub.f32 %v7293_v63, %v3249_v4  ;;  %v3254_v8 = vsel %vm842_vm0, %v3252_v6, 0.0 }
0x12c6   : > { %3255 = vadd.xlane.f32.xlu0 %v3254_v8 }
0x12c7   : > { %v3253_v9 = vmul.f32 %v3251_v7, %v3251_v7 }
0x12c9   : > { %v3257_v34 = vsel %vm842_vm0, %v3253_v9, 0.0 }
0x12ca   : > { %3258 = vadd.xlane.f32.xlu1 %v3257_v34 }
0x134f   : > { %v3256_v19 = vpop.xlane.xlu0 %3255 }
0x1350   : > { %v3260_v46 = vmul.f32 0.015625, %v3256_v19 }
0x1352   : > { %v3262_v20 = vadd.f32 1e-05, %v3260_v46 }
0x1353   : > { %v3259_v21 = vpop.xlane.xlu1 %3258 }
0x1354   : > { %6355 = vrsqrt.f32 %v3262_v20  ;;  %v3261_v22 = vmul.f32 0.015625, %v3259_v21 }
0x1356   : > { %v3263_v23 = vadd.f32 1e-05, %v3261_v22 }
0x1358   : > { %6357 = vrsqrt.f32 %v3263_v23 }
0x1361   : > { %v6356_v26 = vpop.eup %6355 }
0x1362   : > { %v3266_v29 = vmul.f32 %v6356_v26, %v3250_v3 }
0x1364   : > { %v3274_v36 = vmul.f32 %v5275_v30, %v3266_v29 }
0x1365   : > { %v6358_v33 = vpop.eup %6357 }
0x1366   : > { %v3267_v35 = vmul.f32 %v6358_v33, %v3251_v7  ;;  %v3282_v40 = vadd.f32 %v5276_v38, %v3274_v36 }
0x1368   : > { %v3275_v39 = vmul.f32 %v5275_v30, %v3267_v35 }
0x136a   : > { %v3283_v41 = vadd.f32 %v5276_v38, %v3275_v39 }
0x136c   : > { %v3284_v42 = vpack.c.bf16 %v3283_v41, %v3282_v40 }
0x136e   : > { %5285 = vmatmul.mubr.msk.bf16.vlgmr.msra.gmra.mxu0 %vm842_vm0, %v3284_v42 }
0x136f   : > { %5969 = vmatprep.mubr.msk.bf16.mxu0 %vm6512_vm1, %v6511_v16 }
0x142e   : > { %v3373_v2 = vpop.f32.mrf.mxu0 }
0x142f   : > { %v3374_v53 = vadd.f32 %v3373_v2, %v3289_v62 }
0x1430   : > { %v3375_v3 = vpop.f32.mrf.mxu0 }
0x1431   : > { %v3382_v28 = vmul.f32 %v3374_v53, %v3374_v53  ;;  %v3376_v4 = vadd.f32 %v3375_v3, %v3293_v1 }
0x1432   : > { %v3377_v6 = vpop.f32.mrf.mxu0 }
0x1433   : > { %v3386_v7 = vmul.f32 %v3382_v28, %v3374_v53  ;;  %v3383_v8 = vmul.f32 %v3376_v4, %v3376_v4  ;;  %v3378_v9 = vadd.f32 %v3377_v6, %v3289_v62 }
0x1434   : > { %v3379_v34 = vpop.f32.mrf.mxu0 }
0x1435   : > { %v3390_v58 = vmul.f32 0.044715, %v3386_v7  ;;  %v3387_v11 = vmul.f32 %v3383_v8, %v3376_v4  ;;  %v3384_v13 = vmul.f32 %v3378_v9, %v3378_v9  ;;  %v3380_v14 = vadd.f32 %v3379_v34, %v3293_v1 }
0x1437   : > { %v3394_v15 = vadd.f32 %v3390_v58, %v3374_v53  ;;  %v3391_v17 = vmul.f32 0.044715, %v3387_v11  ;;  %v3388_v18 = vmul.f32 %v3384_v13, %v3378_v9  ;;  %v3385_v37 = vmul.f32 %v3380_v14, %v3380_v14 }
0x1439   : > { %v3398_v19 = vmul.f32 0.7978846, %v3394_v15  ;;  %v3395_v46 = vadd.f32 %v3391_v17, %v3376_v4  ;;  %v3392_v20 = vmul.f32 0.044715, %v3388_v18  ;;  %v3389_v21 = vmul.f32 %v3385_v37, %v3380_v14  ;;  %v6228_v15 = vld [vmem:[%s7780_s10 + $0x58] sm:$0xff]   ;;  %v6229_v17 = vld [vmem:[%s7843_s1 + $0x50] sm:$0xff]  }
0x143a   : > { %v6230_v18 = vld [vmem:[%s7780_s10 + $0x50] sm:$0xff]   ;;  %v6231_v37 = vld [vmem:[%s7843_s1 + $0x48] sm:$0xff]  }
0x143b   : > { %v3399_v22 = vmul.f32 0.7978846, %v3395_v46  ;;  %v3396_v23 = vadd.f32 %v3392_v20, %v3378_v9  ;;  %v3393_v26 = vmul.f32 0.044715, %v3389_v21  ;;  %6359 = vtanh.f32 %v3398_v19  ;;  %v6232_v19 = vld [vmem:[%s7780_s10 + $0x48] sm:$0xff]   ;;  %v6233_v46 = vld [vmem:[%s7843_s1 + $0x40] sm:$0xff]  }
0x143c   : > { %v6234_v20 = vld [vmem:[%s7780_s10 + $0x40] sm:$0xff]   ;;  %v6435_v21 = vld [vmem:[%s7844_s30 + $0x38] sm:$0xff] }
0x143d   : > { %6361 = vtanh.f32 %v3399_v22  ;;  %v3400_v29 = vmul.f32 0.7978846, %v3396_v23  ;;  %v3397_v30 = vadd.f32 %v3393_v26, %v3380_v14 }
0x143f   : > { %6363 = vtanh.f32 %v3400_v29  ;;  %v3401_v33 = vmul.f32 0.7978846, %v3397_v30 }
0x1441   : > { %6365 = vtanh.f32 %v3401_v33 }
0x1448   : > { %v6360_v35 = vpop.eup %6359 }
0x1449   : > { %v3406_v40 = vadd.f32 1.0, %v6360_v35 }
0x144a   : > { %v6362_v36 = vpop.eup %6361 }
0x144b   : > { %v3407_v38 = vadd.f32 1.0, %v6362_v36  ;;  %v3410_v25 = vmul.f32 0.5, %v3406_v40 }
0x144c   : > { %v6364_v39 = vpop.eup %6363 }
0x144d   : > { %v3408_v41 = vadd.f32 1.0, %v6364_v39  ;;  %v3411_v32 = vmul.f32 0.5, %v3407_v38  ;;  %v3414_v51 = vmul.f32 %v3410_v25, %v3374_v53  ;;  %v5385_v38 = vld [vmem:[%s7845_s4 + $0x2] ss:$0 sm:$0xff]  ;;  %v6235_v25 = vld [vmem:[%s7847_s9 + $0x58] sm:$0xff]   ;;  %s731_s4 = scalar_lea.vmem [#allocation2], %s5086_s23 }
0x144e   : > { %v6366_v42 = vpop.eup %6365  ;;  %s6514_s23 = smov [#allocation2]  }
0x144f   : > { %v3412_v43 = vmul.f32 0.5, %v3408_v41  ;;  %v3409_v44 = vadd.f32 1.0, %v6366_v42  ;;  %v3415_v48 = vmul.f32 %v3411_v32, %v3376_v4  ;;  %v5386_v42 = vld [vmem:[%s7846_s8 + $0x2] ss:$0 sm:$0xff]  ;;  %s5020_s8 = sshll.u32 %s731_s4, 4  ;;  %s6453_s7 = sshll.u32 %s6514_s23, 4  ;;  %s7727_s8 = int_to_ptr.vmem [resolvable:$true] %s5020_s8  ;;  %s6454_s7 = int_to_ptr.vmem [resolvable:$false] %s6453_s7 }
0x1450   : > { %p6456_p0 = scmp.lt.s32.totalorder %s7727_s8, %s6454_s7 }
0x1451   : > { %v3413_v0 = vmul.f32 0.5, %v3409_v44  ;;  %v3416_v47 = vmul.f32 %v3412_v43, %v3378_v9 }
0x1453   : > { %v3417_v50 = vmul.f32 %v3413_v0, %v3380_v14  ;;  %v3418_v54 = vpack.c.bf16 %v3416_v47, %v3414_v51  ;;  %v6227_v14 = vld [vmem:[%s7843_s1 + $0x58] sm:$0xff]   ;;  %v6236_v47 = vld [vmem:[%s7847_s9 + $0x50] sm:$0xff]   ;;  %v6437_v51 = vld [vmem:[%s7844_s30 + $0x28] sm:$0xff] }
0x1454   : > { %5962 = vmatpush3.bf16.msra.mxu0 %v6227_v14 }
0x1455   : > { %v3419_v52 = vpack.c.bf16 %v3417_v50, %v3415_v48  ;;  %5963 = vmatprep.subr.bf16.mxu0 %v6511_v16  ;;  %v6436_v48 = vld [vmem:[%s7844_s30 + $0x30] sm:$0xff]  ;;  %v6237_v50 = vld [vmem:[%s7847_s9 + $0x48] sm:$0xff]  }
0x1457   : > { %3554 = vmatprep.mubr.bf16.mxu1 %v3419_v52  ;;  %v6438_v52 = vld [vmem:[%s7844_s30 + $0x20] sm:$0xff] }
0x1458   : > { %3555 = vmatmul.mubr.bf16.vlgmr.msra.gmra.mxu1 %v3418_v54  ;;  %5964 = vmatpush3.bf16.msra.mxu0 %v6229_v17  ;;  %v6238_v54 = vld [vmem:[%s7847_s9 + $0x40] sm:$0xff]  }
0x1459   : > { %5993 = vmatprep.mubr.msk.bf16.mxu1 %vm6512_vm1, %v6511_v16  ;;  %5986 = vmatpush3.bf16.msra.mxu1 %v6228_v15 }
0x145a   : > { %5987 = vmatprep.subr.bf16.mxu1 %v6511_v16  ;;  %5965 = vmatprep.subr.bf16.mxu0 %v6511_v16 }
0x145c   : > { %5966 = vmatpush3.bf16.msra.mxu0 %v6231_v37 }
0x145d   : > { %5988 = vmatpush3.bf16.msra.mxu1 %v6230_v18  ;;  %5967 = vmatprep.subr.bf16.mxu0 %v6511_v16 }
0x145e   : > { %5989 = vmatprep.subr.bf16.mxu1 %v6511_v16 }
0x1460   : > { %5968 = vmatpush3.bf16.msra.mxu0 %v6233_v46 }
0x1461   : > { %5990 = vmatpush3.bf16.msra.mxu1 %v6232_v19  ;;  %5973 = vmatprep.subr.bf16.mxu0 %v6511_v16 }
0x1462   : > { %5991 = vmatprep.subr.bf16.mxu1 %v6511_v16 }
0x1465   : > { %5992 = vmatpush3.bf16.msra.mxu1 %v6234_v20  ;;  %v6443_v20 = vld [vmem:[%s7850_s25 + $0x8] sm:$0xff] }
0x1466   : > { %6016 = vmatprep.subr.mxu1 %v6435_v21 }
0x1518   : > { %v5609_v55 = vpop.f32.mrf.mxu1 }
0x151a   : > { %v5610_v57 = vpop.f32.mrf.mxu1 }
0x151b   : > { %v5611_v59 = vadd.f32 %v5610_v57, %v5609_v55  ;;  %v6439_v55 = vld [vmem:[%s7844_s30 + $0x18] sm:$0xff]  ;;  %v6441_v57 = vld [vmem:[%s7844_s30 + $0x8] sm:$0xff] }
0x151c   : > { %v5612_v60 = vpop.f32.mrf.mxu1 }
0x151d   : > { %v3557_v61 = vadd.f32 %v5611_v59, %v5286_v56  ;;  %v6442_v59 = vld [vmem:[%s7844_s30] sm:$0xff] }
0x151e   : > { %v5613_v62 = vpop.f32.mrf.mxu1 }
0x151f   : > { %v7395_v1 = vadd.f32 %v3557_v61, %v7288_v10  ;;  %v5614_v2 = vadd.f32 %v5613_v62, %v5612_v60  ;;  %v5387_v60 = vld [vmem:[%s7781_s11 + $0x2] ss:$0 sm:$0xff] }
0x1521   : > { %v3560_v53 = vadd.f32 %v5614_v2, %v5286_v56  ;;  %v3663_v3 = vsel %vm842_vm0, %v7395_v1, 0.0  ;;  %v6440_v56 = vld [vmem:[%s7844_s30 + $0x10] sm:$0xff] }
0x1522   : > { %3664 = vadd.xlane.f32.xlu0 %v3663_v3 }
0x1523   : > { %v7400_v28 = vadd.f32 %v3560_v53, %v7293_v63 }
0x1525   : > { %v3666_v4 = vsel %vm842_vm0, %v7400_v28, 0.0 }
0x1526   : > { %3667 = vadd.xlane.f32.xlu1 %v3666_v4 }
0x15ab   : > { %v3665_v6 = vpop.xlane.xlu0 %3664 }
0x15ac   : > { %v3669_v7 = vmul.f32 0.015625, %v3665_v6 }
0x15ae   : > { %v3671_v8 = vsub.f32 %v7395_v1, %v3669_v7 }
0x15af   : > { %v3668_v9 = vpop.xlane.xlu1 %3667 }
0x15b0   : > { %v3670_v10 = vmul.f32 0.015625, %v3668_v9  ;;  %v3673_v34 = vmul.f32 %v3671_v8, %v3671_v8 }
0x15b2   : > { %v3672_v58 = vsub.f32 %v7400_v28, %v3670_v10  ;;  %v3675_v11 = vsel %vm842_vm0, %v3673_v34, 0.0  ;;  %v5399_v10 = vld [vmem:[%s7783_s13 + $0x2] ss:$0 sm:$0xff] }
0x15b3   : > { %3676 = vadd.xlane.f32.xlu0 %v3675_v11 }
0x15b4   : > { %v3674_v13 = vmul.f32 %v3672_v58, %v3672_v58 }
0x15b6   : > { %v3678_v63 = vsel %vm842_vm0, %v3674_v13, 0.0 }
0x15b7   : > { %3679 = vadd.xlane.f32.xlu1 %v3678_v63 }
0x163c   : > { %v3677_v22 = vpop.xlane.xlu0 %3676 }
0x163d   : > { %v3681_v23 = vmul.f32 0.015625, %v3677_v22  ;;  %v6444_v22 = vld [vmem:[%s7852_s3 + $0x8] sm:$0xff] }
0x163f   : > { %v3683_v26 = vadd.f32 1e-05, %v3681_v23 }
0x1640   : > { %v3680_v29 = vpop.xlane.xlu1 %3679 }
0x1641   : > { %6367 = vrsqrt.f32 %v3683_v26  ;;  %v3682_v30 = vmul.f32 0.015625, %v3680_v29  ;;  %v6445_v29 = vld [vmem:[%s7850_s25] sm:$0xff] }
0x1643   : > { %v3684_v33 = vadd.f32 1e-05, %v3682_v30 }
0x1645   : > { %6369 = vrsqrt.f32 %v3684_v33 }
0x164e   : > { %v6368_v35 = vpop.eup %6367 }
0x164f   : > { %v3687_v36 = vmul.f32 %v6368_v35, %v3671_v8  ;;  %v6446_v35 = vld [vmem:[%s7852_s3] sm:$0xff]  ;;  %s5458_s3 = sshll.u32 %s7856_s28, 8  ;;  %s6449_s28 = scalar_lea.vmem %s7727_s8, 256 }
0x1650   : > { %s7725_s9 = scalar_lea.hbm %s7860_s5, %s5458_s3  ;;  %p6450_p11 = scmp.ne.s32.totalorder %s7727_s8, %s6449_s28 }
0x1651   : > { %v3695_v41 = vmul.f32 %v5385_v38, %v3687_v36  ;;  %s6455_s3 = scalar_lea.vmem %s6454_s7, 512 }
0x1652   : > { %v6370_v39 = vpop.eup %6369  ;;  %p6451_p12 = pnand %p6450_p11, %p6680_p5  ;;  %p6457_p1 = scmp.lt.s32.totalorder %s6455_s3, %s6449_s28 }
0x1653   : > { %v3688_v40 = vmul.f32 %v6370_v39, %v3672_v58  ;;  %v3703_v44 = vadd.f32 %v5386_v42, %v3695_v41  ;;  %v5393_v58 = vld [vmem:[%s7782_s12 + $0x2] ss:$0 sm:$0xff] }
0x1654   : > { %p6452_p13 = pneg %p6451_p12  ;;  %p6458_p2 = por %p6457_p1, %p6456_p0 }
0x1655   : > { %v3696_v43 = vmul.f32 %v5385_v38, %v3688_v40 }
0x1656   : > { %p6459_p3 = pnand %p6458_p2, %p6452_p13 }
0x1657   : > { %v3704_v32 = vadd.f32 %v5386_v42, %v3696_v43 }
0x1659   : > { %v3705_v0 = vpack.c.bf16 %v3704_v32, %v3703_v44 }
0x165b   : > { %5970 = vmatmul.mubr.msk.bf16.vlgmr.msra.gmra.mxu0 %vm842_vm0, %v3705_v0  ;;  %5994 = vmatmul.mubr.msk.bf16.vlgmr.msra.gmra.mxu1 %vm842_vm0, %v3705_v0 }
0x165c   : > { %5974 = vmatpush3.bf16.msra.mxu0 %v6235_v25  ;;  %5981 = vmatprep.mubr.msk.bf16.mxu0 %vm6512_vm1, %v6511_v16 }
0x165d   : > { %5975 = vmatprep.subr.bf16.mxu0 %v6511_v16  ;;  %6017 = vmatpush3.msra.mxu1 %v6435_v21 }
0x165e   : > { %6018 = vmatprep.subr.mxu1 %v6436_v48 }
0x165f   : > { %6019 = vmatpush3.msra.mxu1 %v6436_v48 }
0x1660   : > { %5976 = vmatpush3.bf16.msra.mxu0 %v6236_v47  ;;  %6020 = vmatprep.subr.mxu1 %v6437_v51 }
0x1661   : > { %5977 = vmatprep.subr.bf16.mxu0 %v6511_v16  ;;  %6021 = vmatpush3.msra.mxu1 %v6437_v51 }
0x1662   : > { %6022 = vmatprep.subr.mxu1 %v6438_v52 }
0x1663   : > { %6023 = vmatpush3.msra.mxu1 %v6438_v52 }
0x1664   : > { %5978 = vmatpush3.bf16.msra.mxu0 %v6237_v50  ;;  %6024 = vmatprep.subr.mxu1 %v6439_v55 }
0x1665   : > { %5979 = vmatprep.subr.bf16.mxu0 %v6511_v16  ;;  %6025 = vmatpush3.msra.mxu1 %v6439_v55 }
0x1666   : > { %6026 = vmatprep.subr.mxu1 %v6440_v56 }
0x1667   : > { %6027 = vmatpush3.msra.mxu1 %v6440_v56 }
0x1668   : > { %5980 = vmatpush3.bf16.msra.mxu0 %v6238_v54  ;;  %6028 = vmatprep.subr.mxu1 %v6441_v57 }
0x1669   : > { %5997 = vmatprep.subr.mxu0 %v6435_v21  ;;  %6029 = vmatpush3.msra.mxu1 %v6441_v57 }
0x166a   : > { %6030 = vmatprep.subr.mxu1 %v6442_v59 }
0x166b   : > { %5982 = vmatmul.mubr.msk.bf16.vlgmr.msra.gmra.mxu0 %vm842_vm0, %v3705_v0  ;;  %6031 = vmatpush3.msra.mxu1 %v6442_v59 }
0x166c   : > { %5998 = vmatpush3.msra.mxu0 %v6435_v21  ;;  %6047 = vmatprep.subr.bf16.mxu1 %v6511_v16 }
0x166d   : > { %5999 = vmatprep.subr.mxu0 %v6436_v48 }
0x166e   : > { %6000 = vmatpush3.msra.mxu0 %v6436_v48 }
0x166f   : > { %6001 = vmatprep.subr.mxu0 %v6437_v51 }
0x1670   : > { %6002 = vmatpush3.msra.mxu0 %v6437_v51 }
0x1671   : > { %6003 = vmatprep.subr.mxu0 %v6438_v52 }
0x1672   : > { %6004 = vmatpush3.msra.mxu0 %v6438_v52 }
0x1673   : > { %6005 = vmatprep.subr.mxu0 %v6439_v55 }
0x1674   : > { %6006 = vmatpush3.msra.mxu0 %v6439_v55 }
0x1675   : > { %6007 = vmatprep.subr.mxu0 %v6440_v56 }
0x1676   : > { %6008 = vmatpush3.msra.mxu0 %v6440_v56 }
0x1677   : > { %6009 = vmatprep.subr.mxu0 %v6441_v57 }
0x1678   : > { %6010 = vmatpush3.msra.mxu0 %v6441_v57 }
0x1679   : > { %6011 = vmatprep.subr.mxu0 %v6442_v59 }
0x167a   : > { %6012 = vmatpush3.msra.mxu0 %v6442_v59 }
0x167b   : > { %6035 = vmatprep.subr.bf16.mxu0 %v6511_v16 }
0x171b   : > { %v3773_v61 = vpop.f32.mrf.mxu0  ;;  %v3915_v62 = vpop.f32.mrf.mxu1 }
0x171c   : > { %v3774_v2 = vadd.f32 %v5387_v60, %v3773_v61  ;;  %v3916_v11 = vadd.f32 %v5399_v10, %v3915_v62  ;;  %v6447_v62 = vld [vmem:[%s7854_s24] sm:$0xff] }
0x171d   : > { %v5971_v53 = vpop.f32.mrf.mxu0  ;;  %v5995_v3 = vpop.f32.mrf.mxu1 }
0x171e   : > { %6013 = vmatprep.mubr.msk.f32.mxu0 %vm842_vm0, %v3774_v2  ;;  %v3922_v30 = vmul.f32 %v6445_v29, %v3774_v2 }
0x171f   : > { %v3776_v4 = vpop.f32.mrf.mxu0  ;;  %v3918_v6 = vpop.f32.mrf.mxu1 }
0x1720   : > { %v3777_v7 = vadd.f32 %v5387_v60, %v3776_v4  ;;  %v3919_v34 = vadd.f32 %v5399_v10, %v3918_v6 }
0x1721   : > { %v5972_v8 = vpop.f32.mrf.mxu0  ;;  %v5996_v9 = vpop.f32.mrf.mxu1 }
0x1722   : > { %6014 = vmatmul.mubr.msk.f32.vlgmr.msra.gmra.mxu0 %vm842_vm0, %v3777_v7  ;;  %v7504_v14 = vpack.c.bf16 %v3919_v34, %v3916_v11  ;;  %v3923_v21 = vmul.f32 %v6443_v20, %v3777_v7  ;;  %v6448_v7 = vld [vmem:[%s7854_s24 + $0x8] sm:$0xff] }
0x1723   : > { %6037 = vmatprep.mubr.msk.bf16.mxu0 %vm6512_vm1, %v6511_v16 }
0x1724   : > { %v4241_v19 = vmul.bf16 %v7504_v14, %v6815_v12 }
0x172b   : > { %v3844_v13 = vpop.f32.mrf.mxu0 }
0x172c   : > { %v3845_v63 = vadd.f32 %v5393_v58, %v3844_v13 }
0x172d   : > { %v5983_v15 = vpop.f32.mrf.mxu0 }
0x172e   : > { %6032 = vmatprep.mubr.msk.f32.mxu1 %vm842_vm0, %v3845_v63  ;;  %v4009_v32 = vmul.f32 %v6445_v29, %v3845_v63 }
0x172f   : > { %v3847_v17 = vpop.f32.mrf.mxu0 }
0x1730   : > { %v3848_v18 = vadd.f32 %v5393_v58, %v3847_v17 }
0x1731   : > { %v5984_v37 = vpop.f32.mrf.mxu0 }
0x1732   : > { %6033 = vmatmul.mubr.msk.f32.vlgmr.msra.gmra.mxu1 %vm842_vm0, %v3848_v18  ;;  %v4010_v25 = vmul.f32 %v6443_v20, %v3848_v18 }
0x1733   : > { %6048 = vmatpush3.bf16.msra.mxu1 %v4241_v19  ;;  %6049 = vmatprep.mubr.msk.bf16.mxu1 %vm6512_vm1, %v6511_v16 }
0x1734   : > { %6053 = vmatprep.subr.bf16.mxu1 %v6511_v16 }
0x17e2   : > { %v6015_v46 = vpop.f32.mrf.mxu0 }
0x17e3   : > { %v4006_v23 = vmul.f32 %v6444_v22, %v6015_v46 }
0x17e4   : > { %v3996_v26 = vpop.f32.mrf.mxu0 }
0x17e5   : > { %v4008_v33 = vadd.f32 %v4006_v23, %v3923_v21  ;;  %v4005_v36 = vmul.f32 %v6446_v35, %v3996_v26 }
0x17e7   : > { %v4007_v38 = vadd.f32 %v4005_v36, %v3922_v30  ;;  %v4097_v39 = vmul.f32 0.25, %v4008_v33 }
0x17e9   : > { %v4096_v40 = vmul.f32 0.25, %v4007_v38 }
0x17eb   : > { %v4098_v41 = vpack.c.bf16 %v4097_v39, %v4096_v40 }
0x17ed   : > { %v4101_v52 = vmul.bf16 %v4098_v41, %v6847_v45  ;;  %v4173_v54 = vmul.bf16 %v4098_v41, %v6815_v12  ;;  %v4330_v55 = vmul.bf16 %v4098_v41, %v6893_v27  ;;  %v4445_v12 = vmul.bf16 %v4098_v41, %v6906_v31 }
0x17f2   : > { %v6034_v42 = vpop.f32.mrf.mxu1 }
0x17f3   : > { %v4093_v43 = vmul.f32 %v6444_v22, %v6034_v42 }
0x17f4   : > { %v4083_v44 = vpop.f32.mrf.mxu1 }
0x17f5   : > { %v4092_v0 = vmul.f32 %v6446_v35, %v4083_v44  ;;  %v4095_v47 = vadd.f32 %v4093_v43, %v4010_v25 }
0x17f7   : > { %v4094_v48 = vadd.f32 %v4092_v0, %v4009_v32 }
0x17f9   : > { %v4099_v50 = vpack.c.bf16 %v4095_v47, %v4094_v48 }
0x17fb   : > { %v4106_v51 = vsel %vm842_vm0, %v4099_v50, 0 }
0x17fc   : > { %6036 = vmatpush3.bf16.xpose.msra.mxu0 %v4106_v51 }
0x17fd   : > { %6041 = vmatprep.subr.bf16.mxu0 %v6511_v16 }
0x1803   : > { %6038 = vmatmul.mubr.msk.bf16.vlgmr.msra.gmra.mxu0 %vm842_vm0, %v4101_v52 }
0x1804   : > { %6042 = vmatpush3.bf16.xpose.msra.mxu0 %v4106_v51  ;;  %6043 = vmatprep.mubr.msk.bf16.mxu0 %vm6512_vm1, %v6511_v16 }
0x1805   : > { %6059 = vmatprep.subr.bf16.mxu0 %v6511_v16 }
0x180b   : > { %6044 = vmatmul.mubr.msk.bf16.vlgmr.msra.gmra.mxu0 %vm842_vm0, %v4173_v54 }
0x180c   : > { %6060 = vmatpush3.bf16.xpose.msra.mxu0 %v4106_v51  ;;  %6061 = vmatprep.mubr.msk.bf16.mxu0 %vm6512_vm1, %v6511_v16 }
0x180d   : > { %6071 = vmatprep.subr.bf16.mxu0 %v6511_v16 }
0x1813   : > { %6062 = vmatmul.mubr.msk.bf16.vlgmr.msra.gmra.mxu0 %vm842_vm0, %v4330_v55 }
0x1814   : > { %6072 = vmatpush3.bf16.xpose.msra.mxu0 %v4106_v51  ;;  %6073 = vmatprep.mubr.msk.bf16.mxu0 %vm6512_vm1, %v6511_v16 }
0x1815   : > { %6083 = vmatprep.subr.bf16.mxu0 %v6511_v16 }
0x181b   : > { %6074 = vmatmul.mubr.msk.bf16.vlgmr.msra.gmra.mxu0 %vm842_vm0, %v4445_v12 }
0x181c   : > { %6091 = vmatprep.mubr.msk.bf16.mxu0 %vm6512_vm1, %v6511_v16 }
0x18c3   : > { %v4142_v56 = vpop.f32.mrf.mxu0 }
0x18c4   : > { %v4143_v3 = vadd.f32 %v6447_v62, %v4142_v56 }
0x18c5   : > { %v6039_v57 = vpop.f32.mrf.mxu0 }
0x18c6   : > { %v4149_v34 = vsel %vm1337_vm2, %v4143_v3, -inf }
0x18c7   : > { %v4145_v59 = vpop.f32.mrf.mxu0 }
0x18c8   : > { %v4146_v10 = vadd.f32 %v6448_v7, %v4145_v59 }
0x18c9   : > { %v6040_v60 = vpop.f32.mrf.mxu0 }
0x18ca   : > { %v4152_v15 = vsel %vm1337_vm2, %v4146_v10, -inf }
0x18cb   : > { %v4211_v61 = vpop.f32.mrf.mxu0 }
0x18cc   : > { %v4212_v2 = vadd.f32 %v6447_v62, %v4211_v61 }
0x18cd   : > { %v6045_v53 = vpop.f32.mrf.mxu0 }
0x18ce   : > { %v4218_v4 = vsel %vm1337_vm2, %v4212_v2, -inf }
0x18cf   : > { %4219 = vmax.xlane.f32.xlu0 %v4218_v4  ;;  %v4214_v6 = vpop.f32.mrf.mxu0 }
0x18d0   : > { %v4215_v8 = vadd.f32 %v6448_v7, %v4214_v6 }
0x18d1   : > { %v6046_v9 = vpop.f32.mrf.mxu0 }
0x18d2   : > { %v4221_v58 = vsel %vm1337_vm2, %v4215_v8, -inf }
0x18d3   : > { %4150 = vmax.xlane.f32.xlu0 %v4149_v34  ;;  %4222 = vmax.xlane.f32.xlu1 %v4221_v58  ;;  %v4368_v11 = vpop.f32.mrf.mxu0 }
0x18d4   : > { %v4369_v13 = vadd.f32 %v6447_v62, %v4368_v11 }
0x18d5   : > { %v6063_v63 = vpop.f32.mrf.mxu0 }
0x18d6   : > { %v4375_v17 = vsel %vm1337_vm2, %v4369_v13, -inf }
0x18d7   : > { %4153 = vmax.xlane.f32.xlu1 %v4152_v15  ;;  %4376 = vmax.xlane.f32.xlu0 %v4375_v17  ;;  %v4371_v18 = vpop.f32.mrf.mxu0 }
0x18d8   : > { %v4372_v37 = vadd.f32 %v6448_v7, %v4371_v18 }
0x18d9   : > { %v6064_v19 = vpop.f32.mrf.mxu0 }
0x18da   : > { %v4378_v46 = vsel %vm1337_vm2, %v4372_v37, -inf }
0x18db   : > { %4379 = vmax.xlane.f32.xlu1 %v4378_v46  ;;  %v4483_v20 = vpop.f32.mrf.mxu0 }
0x18dc   : > { %v4484_v21 = vadd.f32 %v6447_v62, %v4483_v20 }
0x18dd   : > { %v6075_v22 = vpop.f32.mrf.mxu0 }
0x18de   : > { %v4490_v23 = vsel %vm1337_vm2, %v4484_v21, -inf }
0x18df   : > { %4491 = vmax.xlane.f32.xlu0 %v4490_v23  ;;  %v4486_v26 = vpop.f32.mrf.mxu0 }
0x18e0   : > { %v4487_v29 = vadd.f32 %v6448_v7, %v4486_v26 }
0x18e1   : > { %v6076_v30 = vpop.f32.mrf.mxu0 }
0x18e2   : > { %v4493_v33 = vsel %vm1337_vm2, %v4487_v29, -inf  ;;  %v4172_v30 = vmul.bf16 %v7504_v14, %v6847_v45  ;;  %v4398_v45 = vmul.bf16 %v7504_v14, %v6893_v27 }
0x18e3   : > { %4494 = vmax.xlane.f32.xlu1 %v4493_v33 }
0x1958   : > { %v4220_v35 = vpop.xlane.xlu0 %4219 }
0x1959   : > { %v4224_v36 = vsub.f32 %v4212_v2, %v4220_v35 }
0x195b   : > { %v4226_v38 = vmul.f32 1.442695, %v4224_v36 }
0x195c   : > { %v4151_v39 = vpop.xlane.xlu0 %4150  ;;  %v4223_v40 = vpop.xlane.xlu1 %4222 }
0x195d   : > { %6371 = vpow2.f32 %v4226_v38  ;;  %v4155_v41 = vsub.f32 %v4143_v3, %v4151_v39  ;;  %v4225_v42 = vsub.f32 %v4215_v8, %v4223_v40 }
0x195f   : > { %v4157_v43 = vmul.f32 1.442695, %v4155_v41  ;;  %v4228_v44 = vmul.f32 1.442695, %v4225_v42 }
0x1960   : > { %v4154_v32 = vpop.xlane.xlu1 %4153  ;;  %v4377_v25 = vpop.xlane.xlu0 %4376 }
0x1961   : > { %6373 = vpow2.f32 %v4157_v43  ;;  %v4156_v0 = vsub.f32 %v4146_v10, %v4154_v32  ;;  %v4381_v47 = vsub.f32 %v4369_v13, %v4377_v25 }
0x1962   : > { %6375 = vpow2.f32 %v4228_v44 }
0x1963   : > { %v4159_v48 = vmul.f32 1.442695, %v4156_v0  ;;  %v4383_v50 = vmul.f32 1.442695, %v4381_v47  ;;  %v4513_v0 = vmul.bf16 %v7504_v14, %v6906_v31  ;;  %v6240_v31 = vld [vmem:[%s7784_s14 + $0x50] sm:$0xff]   ;;  %v6241_v14 = vld [vmem:[%s7784_s14 + $0x48] sm:$0xff]  }
0x1964   : > { %v4380_v51 = vpop.xlane.xlu1 %4379 }
0x1965   : > { %6377 = vpow2.f32 %v4159_v48  ;;  %v4382_v52 = vsub.f32 %v4372_v37, %v4380_v51  ;;  %v6239_v51 = vld [vmem:[%s7784_s14 + $0x58] sm:$0xff]  }
0x1966   : > { %6379 = vpow2.f32 %v4383_v50  ;;  %6084 = vmatpush3.bf16.msra.mxu0 %v6239_v51 }
0x1967   : > { %v4385_v54 = vmul.f32 1.442695, %v4382_v52  ;;  %6085 = vmatprep.subr.bf16.mxu0 %v6511_v16 }
0x1968   : > { %v4492_v55 = vpop.xlane.xlu0 %4491 }
0x1969   : > { %6381 = vpow2.f32 %v4385_v54  ;;  %v4496_v12 = vsub.f32 %v4484_v21, %v4492_v55 }
0x196a   : > { %v6372_v56 = vpop.eup %6371  ;;  %6086 = vmatpush3.bf16.msra.mxu0 %v6240_v31 }
0x196b   : > { %v4498_v57 = vmul.f32 1.442695, %v4496_v12  ;;  %v4230_v59 = vsel %vm1337_vm2, %v6372_v56, 0.0  ;;  %6087 = vmatprep.subr.bf16.mxu0 %v6511_v16 }
0x196c   : > { %4231 = vadd.xlane.f32.xlu0 %v4230_v59  ;;  %v4495_v60 = vpop.xlane.xlu1 %4494 }
0x196d   : > { %6383 = vpow2.f32 %v4498_v57  ;;  %v4497_v61 = vsub.f32 %v4487_v29, %v4495_v60 }
0x196e   : > { %v6374_v62 = vpop.eup %6373  ;;  %6088 = vmatpush3.bf16.msra.mxu0 %v6241_v14  ;;  %v5423_v14 = vld [vmem:[%s7786_s16 + $0x2] ss:$0 sm:$0xff] }
0x196f   : > { %v6376_v2 = vpop.eup %6375  ;;  %v4500_v53 = vmul.f32 1.442695, %v4497_v61  ;;  %v4161_v3 = vsel %vm1337_vm2, %v6374_v62, 0.0  ;;  %6089 = vmatprep.subr.bf16.mxu0 %v6511_v16 }
0x1970   : > { %4162 = vadd.xlane.f32.xlu0 %v4161_v3  ;;  %v4233_v4 = vsel %vm1337_vm2, %v6376_v2, 0.0 }
0x1971   : > { %6385 = vpow2.f32 %v4500_v53  ;;  %4234 = vadd.xlane.f32.xlu1 %v4233_v4 }
0x1972   : > { %v6378_v6 = vpop.eup %6377 }
0x1973   : > { %v6380_v7 = vpop.eup %6379  ;;  %v4164_v8 = vsel %vm1337_vm2, %v6378_v6, 0.0 }
0x1974   : > { %v4387_v9 = vsel %vm1337_vm2, %v6380_v7, 0.0 }
0x1975   : > { %4388 = vadd.xlane.f32.xlu0 %v4387_v9  ;;  %4165 = vadd.xlane.f32.xlu1 %v4164_v8 }
0x1976   : > { %v6382_v10 = vpop.eup %6381 }
0x1977   : > { %v4390_v34 = vsel %vm1337_vm2, %v6382_v10, 0.0 }
0x1979   : > { %4391 = vadd.xlane.f32.xlu1 %v4390_v34 }
0x197a   : > { %v6384_v58 = vpop.eup %6383 }
0x197b   : > { %v4502_v11 = vsel %vm1337_vm2, %v6384_v58, 0.0 }
0x197c   : > { %4503 = vadd.xlane.f32.xlu0 %v4502_v11 }
0x197e   : > { %v6386_v13 = vpop.eup %6385 }
0x197f   : > { %v4505_v63 = vsel %vm1337_vm2, %v6386_v13, 0.0 }
0x1980   : > { %4506 = vadd.xlane.f32.xlu1 %v4505_v63 }
0x19f5   : > { %v4232_v15 = vpop.xlane.xlu0 %4231 }
0x19f6   : > { %6387 = vrcp.f32 %v4232_v15 }
0x19f9   : > { %v4163_v18 = vpop.xlane.xlu0 %4162 }
0x19fa   : > { %v4235_v17 = vpop.xlane.xlu1 %4234 }
0x19fb   : > { %6389 = vrcp.f32 %v4235_v17 }
0x19fe   : > { %v4166_v37 = vpop.xlane.xlu1 %4165  ;;  %v4389_v20 = vpop.xlane.xlu0 %4388 }
0x19ff   : > { %6391 = vrcp.f32 %v4166_v37 }
0x1a00   : > { %6393 = vrcp.f32 %v4163_v18 }
0x1a02   : > { %v4392_v19 = vpop.xlane.xlu1 %4391 }
0x1a03   : > { %v6388_v46 = vpop.eup %6387  ;;  %6395 = vrcp.f32 %v4392_v19 }
0x1a04   : > { %6397 = vrcp.f32 %v4389_v20  ;;  %v4237_v22 = vmul.f32 %v6388_v46, %v6372_v56 }
0x1a05   : > { %v4504_v36 = vpop.xlane.xlu0 %4503 }
0x1a08   : > { %v6390_v21 = vpop.eup %6389 }
0x1a09   : > { %v4239_v23 = vmul.f32 %v6390_v21, %v6376_v2  ;;  %v4507_v29 = vpop.xlane.xlu1 %4506 }
0x1a0a   : > { %6399 = vrcp.f32 %v4507_v29 }
0x1a0b   : > { %v4240_v26 = vpack.c.bf16 %v4239_v23, %v4237_v22  ;;  %6401 = vrcp.f32 %v4504_v36 }
0x1a0c   : > { %v6392_v33 = vpop.eup %6391 }
0x1a0d   : > { %6050 = vmatmul.mubr.msk.bf16.vlgmr.msra.gmra.mxu1 %vm1337_vm2, %v4240_v26  ;;  %v6394_v35 = vpop.eup %6393  ;;  %v4170_v38 = vmul.f32 %v6392_v33, %v6378_v6 }
0x1a0e   : > { %6054 = vmatpush3.bf16.msra.mxu1 %v4172_v30  ;;  %6055 = vmatprep.mubr.msk.bf16.mxu1 %vm6512_vm1, %v6511_v16  ;;  %v4168_v39 = vmul.f32 %v6394_v35, %v6374_v62 }
0x1a0f   : > { %6065 = vmatprep.subr.bf16.mxu1 %v6511_v16 }
0x1a10   : > { %v4171_v40 = vpack.c.bf16 %v4170_v38, %v4168_v39  ;;  %v6396_v41 = vpop.eup %6395  ;;  %v6245_v39 = vld [vmem:[%s7788_s18 + $0xb4] ss:$8 sps:$4 sm:$0xff]  }
0x1a11   : > { %v6398_v42 = vpop.eup %6397  ;;  %v4396_v43 = vmul.f32 %v6396_v41, %v6382_v10  ;;  %v6248_v41 = vld [vmem:[%s7788_s18 + $0xa4] ss:$8 sps:$4 sm:$0xff]  }
0x1a12   : > { %v4394_v44 = vmul.f32 %v6398_v42, %v6380_v7  ;;  %v6251_v42 = vld [vmem:[%s7788_s18 + $0x94] ss:$8 sps:$4 sm:$0xff]  }
0x1a14   : > { %v4397_v32 = vpack.c.bf16 %v4396_v43, %v4394_v44  ;;  %v6249_v43 = vld [vmem:[%s7788_s18 + $0x90] ss:$8 sps:$4 sm:$0xff]   ;;  %v6254_v44 = vld [vmem:[%s7788_s18 + $0x84] ss:$8 sps:$4 sm:$0xff]  }
0x1a15   : > { %6056 = vmatmul.mubr.msk.bf16.vlgmr.msra.gmra.mxu1 %vm1337_vm2, %v4171_v40  ;;  %v6243_v40 = vld [vmem:[%s7788_s18 + $0xb0] ss:$8 sps:$4 sm:$0xff]  }
0x1a16   : > { %6066 = vmatpush3.bf16.msra.mxu1 %v4398_v45  ;;  %6067 = vmatprep.mubr.msk.bf16.mxu1 %vm6512_vm1, %v6511_v16  ;;  %v6246_v45 = vld [vmem:[%s7788_s18 + $0xa0] ss:$8 sps:$4 sm:$0xff]  }
0x1a17   : > { %6077 = vmatprep.subr.bf16.mxu1 %v6511_v16  ;;  %v6400_v25 = vpop.eup %6399 }
0x1a18   : > { %v6402_v47 = vpop.eup %6401  ;;  %v4511_v27 = vmul.f32 %v6400_v25, %v6386_v13  ;;  %v5417_v13 = vld [vmem:[%s7785_s15 + $0x2] ss:$0 sm:$0xff] }
0x1a19   : > { %v4509_v48 = vmul.f32 %v6402_v47, %v6384_v58 }
0x1a1b   : > { %v4512_v50 = vpack.c.bf16 %v4511_v27, %v4509_v48 }
0x1a1d   : > { %6068 = vmatmul.mubr.msk.bf16.vlgmr.msra.gmra.mxu1 %vm1337_vm2, %v4397_v32  ;;  %v6252_v32 = vld [vmem:[%s7788_s18 + $0x80] ss:$8 sps:$4 sm:$0xff]  }
0x1a1e   : > { %6078 = vmatpush3.bf16.msra.mxu1 %v4513_v0  ;;  %6079 = vmatprep.mubr.msk.bf16.mxu1 %vm6512_vm1, %v6511_v16 }
0x1a1f   : > { %4742 = vmatprep.subr.bf16.mxu1 %v6245_v39 }
0x1a25   : > { %6080 = vmatmul.mubr.msk.bf16.vlgmr.msra.gmra.mxu1 %vm1337_vm2, %v4512_v50 }
0x1a26   : > { %4766 = vmatprep.mubr.bf16.mxu1 %v6513_v49  ;;  %v6242_v49 = vld [vmem:[%s7784_s14 + $0x40] sm:$0xff]   ;;  %4743 = vmatpush1.bf16.msra.mxu1 %v6243_v40 }
0x1a27   : > { %6090 = vmatpush3.bf16.msra.mxu0 %v6242_v49  ;;  %4744 = vmatprep.subr.bf16.mxu1 %v6248_v41 }
0x1a2a   : > { %4745 = vmatpush1.bf16.msra.mxu1 %v6246_v45 }
0x1a2b   : > { %4746 = vmatprep.subr.bf16.mxu1 %v6251_v42 }
0x1a2e   : > { %4747 = vmatpush1.bf16.msra.mxu1 %v6249_v43 }
0x1a2f   : > { %4748 = vmatprep.subr.bf16.mxu1 %v6254_v44 }
0x1a32   : > { %4749 = vmatpush1.bf16.msra.mxu1 %v6252_v32 }
0x1acd   : > { %v4279_v52 = vpop.f32.mrf.mxu1 }
0x1acf   : > { %v6051_v54 = vpop.f32.mrf.mxu1 }
0x1ad1   : > { %v4282_v55 = vpop.f32.mrf.mxu1 }
0x1ad3   : > { %v6052_v12 = vpop.f32.mrf.mxu1 }
0x1ad5   : > { %v4323_v56 = vpop.f32.mrf.mxu1 }
0x1ad6   : > { %v4324_v4 = vadd.f32 %v4323_v56, %v4279_v52 }
0x1ad7   : > { %v6057_v57 = vpop.f32.mrf.mxu1 }
0x1ad9   : > { %v4326_v59 = vpop.f32.mrf.mxu1 }
0x1ada   : > { %v4327_v16 = vadd.f32 %v4326_v59, %v4282_v55  ;;  %v5424_v55 = vld [vmem:[%s7787_s17 + $0x2] ss:$0 sm:$0xff] }
0x1adb   : > { %v6058_v60 = vpop.f32.mrf.mxu1 }
0x1adc   : > { %v6255_v60 = vld [vmem:[%s7790_s20 + $0x178] sm:$0xff]  }
0x1add   : > { %v4436_v61 = vpop.f32.mrf.mxu1  ;;  %5671 = vmatprep.subr.bf16.mxu0 %v6255_v60 }
0x1ade   : > { %v4443_v7 = vadd.f32 %v4436_v61, %v4324_v4  ;;  %v6256_v61 = vld [vmem:[%s7790_s20 + $0x138] sm:$0xff]   ;;  %v6261_v4 = vld [vmem:[%s7790_s20 + $0x160] sm:$0xff]  }
0x1adf   : > { %v6069_v62 = vpop.f32.mrf.mxu1 }
0x1ae0   : > { %v6257_v62 = vld [vmem:[%s7790_s20 + $0x170] sm:$0xff]  }
0x1ae1   : > { %v4439_v2 = vpop.f32.mrf.mxu1 }
0x1ae2   : > { %v4444_v8 = vadd.f32 %v4439_v2, %v4327_v16  ;;  %v6258_v2 = vld [vmem:[%s7790_s20 + $0x130] sm:$0xff]   ;;  %v6262_v16 = vld [vmem:[%s7790_s20 + $0x120] sm:$0xff]  }
0x1ae3   : > { %v6070_v53 = vpop.f32.mrf.mxu1 }
0x1ae4   : > { %v6259_v53 = vld [vmem:[%s7790_s20 + $0x168] sm:$0xff]  }
0x1ae5   : > { %v4551_v3 = vpop.f32.mrf.mxu1 }
0x1ae6   : > { %v4558_v10 = vadd.f32 %v4551_v3, %v4443_v7  ;;  %v6260_v3 = vld [vmem:[%s7790_s20 + $0x128] sm:$0xff]   ;;  %v6264_v7 = vld [vmem:[%s7790_s20 + $0x118] sm:$0xff]  }
0x1ae7   : > { %v6081_v6 = vpop.f32.mrf.mxu1 }
0x1ae8   : > { %v6263_v6 = vld [vmem:[%s7790_s20 + $0x158] sm:$0xff]  }
0x1ae9   : > { %v4554_v9 = vpop.f32.mrf.mxu1 }
0x1aea   : > { %v4559_v34 = vadd.f32 %v4554_v9, %v4444_v8  ;;  %v6265_v8 = vld [vmem:[%s7790_s20 + $0x150] sm:$0xff]  }
0x1aeb   : > { %v6082_v58 = vpop.f32.mrf.mxu1  ;;  %v6266_v9 = vld [vmem:[%s7790_s20 + $0x110] sm:$0xff]  }
0x1aec   : > { %v4560_v11 = vpack.c.bf16 %v4559_v34, %v4558_v10  ;;  %v6267_v10 = vld [vmem:[%s7790_s20 + $0x148] sm:$0xff]   ;;  %v6269_v58 = vld [vmem:[%s7790_s20 + $0x140] sm:$0xff]  }
0x1aed   : > { %v6268_v34 = vld [vmem:[%s7790_s20 + $0x108] sm:$0xff]  }
0x1aee   : > { %6092 = vmatmul.mubr.msk.bf16.vlgmr.msra.gmra.mxu0 %vm842_vm0, %v4560_v11  ;;  %v6270_v11 = vld [vmem:[%s7790_s20 + $0x100] sm:$0xff]  }
0x1aef   : > { %5672 = vmatpush3.bf16.msra.mxu0 %v6256_v61 }
0x1af0   : > { %5673 = vmatprep.subr.bf16.mxu0 %v6257_v62 }
0x1af3   : > { %5674 = vmatpush3.bf16.msra.mxu0 %v6258_v2 }
0x1af4   : > { %5675 = vmatprep.subr.bf16.mxu0 %v6259_v53  ;;  %v5434_v53 = vld [vmem:[%s7791_s21 + $0x2] ss:$0 sm:$0xff] }
0x1af7   : > { %5676 = vmatpush3.bf16.msra.mxu0 %v6260_v3 }
0x1af8   : > { %5677 = vmatprep.subr.bf16.mxu0 %v6261_v4 }
0x1afb   : > { %5678 = vmatpush3.bf16.msra.mxu0 %v6262_v16 }
0x1afc   : > { %5679 = vmatprep.subr.bf16.mxu0 %v6263_v6 }
0x1aff   : > { %5680 = vmatpush3.bf16.msra.mxu0 %v6264_v7 }
0x1b00   : > { %5681 = vmatprep.subr.bf16.mxu0 %v6265_v8 }
0x1b03   : > { %5682 = vmatpush3.bf16.msra.mxu0 %v6266_v9 }
0x1b04   : > { %5683 = vmatprep.subr.bf16.mxu0 %v6267_v10 }
0x1b07   : > { %5684 = vmatpush3.bf16.msra.mxu0 %v6268_v34 }
0x1b08   : > { %5685 = vmatprep.subr.bf16.mxu0 %v6269_v58 }
0x1b0b   : > { %5686 = vmatpush3.bf16.msra.mxu0 %v6270_v11 }
0x1bae   : > { %v4628_v63 = vpop.f32.mrf.mxu0 }
0x1baf   : > { %v4629_v15 = vadd.f32 %v5417_v13, %v4628_v63 }
0x1bb0   : > { %v6093_v17 = vpop.f32.mrf.mxu0 }
0x1bb1   : > { %v7607_v18 = vadd.f32 %v4629_v15, %v7395_v1 }
0x1bb2   : > { %v4631_v37 = vpop.f32.mrf.mxu0 }
0x1bb3   : > { %v4632_v19 = vadd.f32 %v5417_v13, %v4631_v37  ;;  %v4637_v46 = vsel %vm842_vm0, %v7607_v18, 0.0  ;;  %v5351_v13 = vld [vmem:[%s7789_s19 + $0x4] sm:$0x3] }
0x1bb4   : > { %4638 = vadd.xlane.f32.xlu0 %v4637_v46  ;;  %v6094_v20 = vpop.f32.mrf.mxu0  ;;  %v4684_v63 = vrot.slane %v5351_v13, %v6810_v5  ;;  %v4688_v15 = vrot.slane %v5351_v13, %v7066_v24 }
0x1bb5   : > { %v7612_v21 = vadd.f32 %v4632_v19, %v7400_v28 }
0x1bb7   : > { %v4640_v22 = vsel %vm842_vm0, %v7612_v21, 0.0 }
0x1bb8   : > { %4641 = vadd.xlane.f32.xlu1 %v4640_v22 }
0x1c3d   : > { %v4639_v23 = vpop.xlane.xlu0 %4638 }
0x1c3e   : > { %v4643_v26 = vmul.f32 0.015625, %v4639_v23 }
0x1c40   : > { %v4645_v29 = vsub.f32 %v7607_v18, %v4643_v26 }
0x1c41   : > { %v4642_v1 = vpop.xlane.xlu1 %4641 }
0x1c42   : > { %v4644_v30 = vmul.f32 0.015625, %v4642_v1  ;;  %v4647_v33 = vmul.f32 %v4645_v29, %v4645_v29 }
0x1c44   : > { %v4646_v35 = vsub.f32 %v7612_v21, %v4644_v30  ;;  %v4649_v36 = vsel %vm842_vm0, %v4647_v33, 0.0 }
0x1c45   : > { %4650 = vadd.xlane.f32.xlu0 %v4649_v36 }
0x1c46   : > { %v4648_v38 = vmul.f32 %v4646_v35, %v4646_v35 }
0x1c48   : > { %v4652_v28 = vsel %vm842_vm0, %v4648_v38, 0.0 }
0x1c49   : > { %4653 = vadd.xlane.f32.xlu1 %v4652_v28 }
0x1cce   : > { %v4651_v25 = vpop.xlane.xlu0 %4650 }
0x1ccf   : > { %v4655_v0 = vmul.f32 0.015625, %v4651_v25 }
0x1cd1   : > { %v4657_v47 = vadd.f32 1e-05, %v4655_v0 }
0x1cd2   : > { %v4654_v27 = vpop.xlane.xlu1 %4653 }
0x1cd3   : > { %6403 = vrsqrt.f32 %v4657_v47  ;;  %v4656_v48 = vmul.f32 0.015625, %v4654_v27 }
0x1cd5   : > { %v4658_v50 = vadd.f32 1e-05, %v4656_v48 }
0x1cd7   : > { %6405 = vrsqrt.f32 %v4658_v50 }
0x1ce0   : > { %v6404_v51 = vpop.eup %6403 }
0x1ce1   : > { %v4661_v31 = vmul.f32 %v6404_v51, %v4645_v29 }
0x1ce3   : > { %v4669_v54 = vmul.f32 %v5423_v14, %v4661_v31 }
0x1ce4   : > { %v6406_v49 = vpop.eup %6405 }
0x1ce5   : > { %v4662_v52 = vmul.f32 %v6406_v49, %v4646_v35  ;;  %v4677_v56 = vadd.f32 %v5424_v55, %v4669_v54 }
0x1ce7   : > { %v4670_v12 = vmul.f32 %v5423_v14, %v4662_v52 }
0x1ce9   : > { %v4678_v57 = vadd.f32 %v5424_v55, %v4670_v12 }
0x1ceb   : > { %v4679_v59 = vpack.c.bf16 %v4678_v57, %v4677_v56 }
0x1ced   : > { %5433 = vmatmul.mubr.msk.bf16.vlgmr.msra.gmra.mxu1 %vm842_vm0, %v4679_v59 }
0x1dad   : > { %v4768_v17 = vpop.f32.mrf.mxu1 }
0x1dae   : > { %v4769_v37 = vadd.f32 %v4768_v17, %v4684_v63 }
0x1daf   : > { %v4770_v19 = vpop.f32.mrf.mxu1 }
0x1db0   : > { %v4777_v46 = vmul.f32 %v4769_v37, %v4769_v37  ;;  %v4771_v20 = vadd.f32 %v4770_v19, %v4688_v15 }
0x1db1   : > { %v4772_v22 = vpop.f32.mrf.mxu1 }
0x1db2   : > { %v4781_v23 = vmul.f32 %v4777_v46, %v4769_v37  ;;  %v4778_v26 = vmul.f32 %v4771_v20, %v4771_v20  ;;  %v4773_v29 = vadd.f32 %v4772_v22, %v4684_v63 }
0x1db3   : > { %v4774_v1 = vpop.f32.mrf.mxu1 }
0x1db4   : > { %v4785_v30 = vmul.f32 0.044715, %v4781_v23  ;;  %v4782_v33 = vmul.f32 %v4778_v26, %v4771_v20  ;;  %v4779_v35 = vmul.f32 %v4773_v29, %v4773_v29  ;;  %v4775_v36 = vadd.f32 %v4774_v1, %v4688_v15 }
0x1db6   : > { %v4789_v38 = vadd.f32 %v4785_v30, %v4769_v37  ;;  %v4786_v28 = vmul.f32 0.044715, %v4782_v33  ;;  %v4783_v39 = vmul.f32 %v4779_v35, %v4773_v29  ;;  %v4780_v5 = vmul.f32 %v4775_v36, %v4775_v36  ;;  %v5451_v35 = vld [vmem:[%s7857_s22] ss:$0 sm:$0xff]  ;;  %s7861_s22 = smov %s7860_s5 }
0x1db8   : > { %v4793_v40 = vmul.f32 0.7978846, %v4789_v38  ;;  %v4790_v24 = vadd.f32 %v4786_v28, %v4771_v20  ;;  %v4787_v41 = vmul.f32 0.044715, %v4783_v39  ;;  %v4784_v45 = vmul.f32 %v4780_v5, %v4775_v36  ;;  %v5452_v38 = vld [vmem:[%s7858_s6] ss:$0 sm:$0xff] }
0x1dba   : > { %v4794_v42 = vmul.f32 0.7978846, %v4790_v24  ;;  %v4791_v43 = vadd.f32 %v4787_v41, %v4773_v29  ;;  %v4788_v44 = vmul.f32 0.044715, %v4784_v45  ;;  %6407 = vtanh.f32 %v4793_v40 }
0x1dbc   : > { %6409 = vtanh.f32 %v4794_v42  ;;  %v4795_v32 = vmul.f32 0.7978846, %v4791_v43  ;;  %v4792_v25 = vadd.f32 %v4788_v44, %v4775_v36 }
0x1dbe   : > { %6411 = vtanh.f32 %v4795_v32  ;;  %v4796_v0 = vmul.f32 0.7978846, %v4792_v25 }
0x1dc0   : > { %6413 = vtanh.f32 %v4796_v0 }
0x1dc7   : > { %v6408_v47 = vpop.eup %6407 }
0x1dc8   : > { %v4801_v51 = vadd.f32 1.0, %v6408_v47 }
0x1dc9   : > { %v6410_v27 = vpop.eup %6409 }
0x1dca   : > { %v4802_v48 = vadd.f32 1.0, %v6410_v27  ;;  %v4805_v55 = vmul.f32 0.5, %v4801_v51 }
0x1dcb   : > { %v6412_v50 = vpop.eup %6411 }
0x1dcc   : > { %v4803_v31 = vadd.f32 1.0, %v6412_v50  ;;  %v4806_v54 = vmul.f32 0.5, %v4802_v48  ;;  %v4809_v60 = vmul.f32 %v4805_v55, %v4769_v37 }
0x1dcd   : > { %v6414_v14 = vpop.eup %6413 }
0x1dce   : > { %v4807_v49 = vmul.f32 0.5, %v4803_v31  ;;  %v4804_v52 = vadd.f32 1.0, %v6414_v14  ;;  %v4810_v57 = vmul.f32 %v4806_v54, %v4771_v20 }
0x1dd0   : > { %v4808_v12 = vmul.f32 0.5, %v4804_v52  ;;  %v4811_v56 = vmul.f32 %v4807_v49, %v4773_v29 }
0x1dd2   : > { %v4812_v59 = vmul.f32 %v4808_v12, %v4775_v36  ;;  %v4813_v62 = vpack.c.bf16 %v4811_v56, %v4809_v60 }
0x1dd4   : > { %v4814_v61 = vpack.c.bf16 %v4812_v59, %v4810_v57 }
0x1dd6   : > { %4949 = vmatprep.mubr.bf16.mxu0 %v4814_v61 }
0x1dd7   : > { %4950 = vmatmul.mubr.bf16.vlgmr.msra.gmra.mxu0 %v4813_v62 }
0x1e97   : > { %v5687_v2 = vpop.f32.mrf.mxu0 }
0x1e99   : > { %v5688_v3 = vpop.f32.mrf.mxu0 }
0x1e9a   : > { %v5689_v4 = vadd.f32 %v5688_v3, %v5687_v2 }
0x1e9b   : > { %v5690_v16 = vpop.f32.mrf.mxu0 }
0x1e9c   : > { %v4952_v6 = vadd.f32 %v5689_v4, %v5434_v53 }
0x1e9d   : > { %v5691_v7 = vpop.f32.mrf.mxu0 }
0x1e9e   : > { %v5692_v8 = vadd.f32 %v5691_v7, %v5690_v16  ;;  %v4958_v9 = vadd.f32 %v4952_v6, %v7607_v18 }
0x1ea0   : > { %v4955_v10 = vadd.f32 %v5692_v8, %v5434_v53  ;;  %v4962_v34 = vsel %vm842_vm0, %v4958_v9, 0.0 }
0x1ea1   : > { %4963 = vadd.xlane.f32.xlu0 %v4962_v34 }
0x1ea2   : > { %v4959_v58 = vadd.f32 %v4955_v10, %v7612_v21 }
0x1ea4   : > { %v4965_v11 = vsel %vm842_vm0, %v4959_v58, 0.0 }
0x1ea5   : > { %4966 = vadd.xlane.f32.xlu1 %v4965_v11 }
0x1f2a   : > { %v4964_v13 = vpop.xlane.xlu0 %4963 }
0x1f2b   : > { %v4968_v63 = vmul.f32 0.015625, %v4964_v13 }
0x1f2d   : > { %v4970_v15 = vsub.f32 %v4958_v9, %v4968_v63 }
0x1f2e   : > { %v4967_v17 = vpop.xlane.xlu1 %4966 }
0x1f2f   : > { %v4969_v37 = vmul.f32 0.015625, %v4967_v17  ;;  %v4972_v19 = vmul.f32 %v4970_v15, %v4970_v15 }
0x1f31   : > { %v4971_v46 = vsub.f32 %v4959_v58, %v4969_v37  ;;  %v4974_v20 = vsel %vm842_vm0, %v4972_v19, 0.0 }
0x1f32   : > { %4975 = vadd.xlane.f32.xlu0 %v4974_v20 }
0x1f33   : > { %v4973_v18 = vmul.f32 %v4971_v46, %v4971_v46 }
0x1f35   : > { %v4977_v22 = vsel %vm842_vm0, %v4973_v18, 0.0 }
0x1f36   : > { %4978 = vadd.xlane.f32.xlu1 %v4977_v22 }
0x1fbb   : > { %v4976_v23 = vpop.xlane.xlu0 %4975 }
0x1fbc   : > { %v4980_v21 = vmul.f32 0.015625, %v4976_v23 }
0x1fbe   : > { %v4982_v26 = vadd.f32 1e-05, %v4980_v21 }
0x1fbf   : > { %v4979_v29 = vpop.xlane.xlu1 %4978 }
0x1fc0   : > { %6415 = vrsqrt.f32 %v4982_v26  ;;  %v4981_v1 = vmul.f32 0.015625, %v4979_v29 }
0x1fc2   : > { %v4983_v30 = vadd.f32 1e-05, %v4981_v1 }
0x1fc4   : > { %6417 = vrsqrt.f32 %v4983_v30 }
0x1fcd   : > { %v6416_v33 = vpop.eup %6415 }
0x1fce   : > { %v4986_v36 = vmul.f32 %v6416_v33, %v4970_v15 }
0x1fd0   : > { %v4994_v28 = vmul.f32 %v5451_v35, %v4986_v36 }
0x1fd1   : > { %v6418_v39 = vpop.eup %6417 }
0x1fd2   : > { %v4987_v5 = vmul.f32 %v6418_v39, %v4971_v46  ;;  %v5002_v40 = vadd.f32 %v5452_v38, %v4994_v28 }
0x1fd4   : > { %v4995_v24 = vmul.f32 %v5451_v35, %v4987_v5  ;;  %5004 = vst.msk [vmem:[%s731_s4] sm:$0xff] %vm842_vm0, %v5002_v40 }
0x1fd6   : > { %v5003_v41 = vadd.f32 %v5452_v38, %v4995_v24 }
0x1fd8   : > { %5005 = vst.msk [vmem:[%s731_s4 + $0x8] sm:$0xff] %vm842_vm0, %v5003_v41 }
0x1fd9   : > { %6462 = shalt.err (!%p6459_p3)
}
0x1fda   : > { %s6463_s4 = scalar_lea.hbm %s7725_s9, 256  ;;  %s6467_s27 = scalar_lea.hbm %s7861_s22, 512 }
0x1fdb   : > { %p6464_p4 = scmp.ne.s32.totalorder %s7725_s9, %s6463_s4  ;;  %p6468_p9 = scmp.lt.s32.totalorder %s7725_s9, %s7861_s22 }
0x1fdc   : > { %p6469_p10 = scmp.lt.s32.totalorder %s6467_s27, %s6463_s4 }
0x1fdd   : > { %p6465_p7 = pnand %p6464_p4, %p6680_p5 }
0x1fde   : > { %p6470_p11 = por %p6469_p10, %p6468_p9 }
0x1fdf   : > { %p6466_p8 = pneg %p6465_p7 }
0x1fe1   : > { %p6471_p12 = pnand %p6470_p11, %p6466_p8 }
0x1fe3   : > { %6474 = shalt.err (!%p6471_p12)
}
0x1fe4   : > { %s6515_s28 = smov 128   ;;  %s6516_s23 = smov 8  }
0x1fe5   : > { %6095 = dma.vmem_to_hbm [thread:$0]  (%p6680_p5), %s7727_s8, 256, %s7725_s9, %s7730_s26, %s6515_s28, %s6515_s28, %s6516_s23  }
0x1fe6 PF: > { %s7862_s7 = sld [smem:[#allocation8_spill]] }
0x1fe7   : > { %s7863_s3 = sld [smem:[#allocation5_spill]] }
0x1fec   : > { %p6101_p13 = scmp.ge.s32.totalorder %s7862_s7, 2 }
0x1fed   : > { %s5035_s6 = sand.u32 1, %s7863_s3  }
0x1fee   : > { %p6098_p0 = pnand %p6101_p13, %p6684_p6  ;;  %s5036_s4 = scalar_lea.sflag [#allocation3], %s5035_s6 }
0x1ff0   : > { %p6099_p1 = pneg %p6098_p0 }
0x1ff2   : > { %6492 = dma.done.wait (%p6099_p1), %s5036_s4, 256  }
0x1ff3   : > { %6494 = vsyncadd (%p6099_p1), %s5036_s4, 4294967040  ;;  %s7865_s28 = sld [smem:[#allocation10_spill]] }
0x1ff4   : > { %s7866_s5 = sld [smem:[#allocation6_spill]] }
0x1ff5   : > { %s7867_s26 = sld [smem:[#allocation7_spill]] }
0x1ff6   : > { %s7868_s27 = sld [smem:[#allocation11_spill]] }
0x1ff9   : > { %p34_p2 = scmp.ge.s32.totalorder %s7865_s28, 4  }
0x1ffb   :  { %36 = sbr.rel (!%p34_p2) target bundleno = 17 (0x11), region = 183 }
0x2000   :  { %5041 = vsyncpa [#allocation3], 1 }
0x2001   :  { %5043 = vsyncpa [#allocation3 + $0x1], 1 }

</bundles_post_ra>
